<compile_context>
chip_gen: v5e
topology: v5e:2x2
jax: 0.10.0
libtpu: 0.0.40
codegen_flags: <defaults>
</compile_context>

<pallas_src>
import jax
import jax.numpy as jnp
from jax.experimental import pallas as pl
from jax.experimental.pallas import tpu as pltpu

C = 2048           # channel count hard-coded by the module
C_RED = C // 16    # 128
KS = 7             # SpatialAttention conv kernel size
PAD = 3
BN_EPS = 1e-5

# Well under v7x's 64 MiB physical VMEM; every kernel below needs < ~13 MiB.
_VMEM_LIMIT = 32 * 1024 * 1024


def _sigmoid(z):
    # exp on the EUP + exact reciprocal (equivalent to jax.nn.sigmoid).
    return pl.reciprocal(1.0 + jnp.exp(-z))


# ------------------------------------------------------------- kernel 1 -----
def channel_stats_kernel(x_ref, s_ref):
    """Per-pixel channel mean and max for one spatial tile.

    x_ref: (C, t) f32   channels on sublanes, pixels on lanes.
    s_ref: (2, t) f32   row 0 = mean over C, row 1 = max over C.
    """
    x = x_ref[...]
    mean_c = jnp.mean(x, axis=0, keepdims=True)
    max_c = jnp.max(x, axis=0, keepdims=True)
    s_ref[...] = jnp.concatenate([mean_c, max_c], axis=0)


# ------------------------------------------------------------- kernel 2 -----
def spatial_conv_kernel(p_ref, w_ref, o_ref):
    """7x7, 2->1 channel conv (bias-free) + sigmoid on the zero-padded stats map.

    p_ref: (2, H+6, W+6) f32 VMEM    zero-padded [mean_c, max_c]
    w_ref: (98,)         f32 SMEM    conv weight, [ci][kh][kw] order
    o_ref: (H, W)        f32         sigmoid(conv): the spatial attention map
    """
    H, W = o_ref.shape
    acc = jnp.zeros((H, W), jnp.float32)
    for ci in range(2):
        plane = p_ref[ci]                                   # (H+6, W+6)
        for kh in range(KS):
            for kw in range(KS):
                wk = w_ref[ci * KS * KS + kh * KS + kw]     # scalar from SMEM
                acc = acc + wk * plane[kh:kh + H, kw:kw + W]
    o_ref[...] = _sigmoid(acc)


# ------------------------------------------------------------- kernel 3 -----
def gated_maxpool_kernel(x_ref, s_ref, o_ref):
    """Running spatial max of (spatial-attention * x).

    x_ref: (C, t) f32   s_ref: (1, t) f32
    o_ref: (C, 1) f32   resident accumulator (same block across spatial tiles)
    """
    i = pl.program_id(1)

    @pl.when(i == 0)
    def _init():
        # -inf init: correct even for all-negative channels.
        o_ref[...] = jnp.full(o_ref.shape, -jnp.inf, o_ref.dtype)

    gated = x_ref[...] * s_ref[...]                          # (C, t)
    o_ref[...] = jnp.maximum(o_ref[...], jnp.max(gated, axis=1, keepdims=True))


# ------------------------------------------------------------- kernel 4 -----
def head_kernel(p_ref, w1_ref, w2_ref, wfc_ref, bfc_ref, gamma_ref, beta_ref,
                o_ref):
    """attention_block + Linear + BatchNorm1d (batch stats) + ReLU.

    Gridded over fc output channels so the 2048x2048 fc weight streams through
    VMEM as bf16 (C, tn) tiles.  The tiny attention branch (M = B rows) is
    recomputed per tile; BN statistics only couple features across the batch
    dim, so a channel tile is self-contained.

    p_ref (B,C) f32; w1 (C,C_RED) bf16; w2 (C_RED,C) bf16; wfc tile (C,tn) bf16;
    bfc/gamma/beta tiles (1,tn) f32; o_ref (B,tn) f32.
    """
    pooled = p_ref[...]                                              # (B, C)

    h = jnp.dot(pooled, w1_ref[...].astype(jnp.float32),
                preferred_element_type=jnp.float32)
    h = jnp.maximum(h, 0.0)
    att = _sigmoid(jnp.dot(h, w2_ref[...].astype(jnp.float32),
                           preferred_element_type=jnp.float32))      # (B, C)
    gated = pooled * att                                             # (B, C)

    y = jnp.dot(gated, wfc_ref[...].astype(jnp.float32),
                preferred_element_type=jnp.float32) + bfc_ref[...]   # (B, tn)
    mu = jnp.mean(y, axis=0, keepdims=True)
    var = jnp.mean(jnp.square(y - mu), axis=0, keepdims=True)        # biased
    y = (y - mu) * jax.lax.rsqrt(var + BN_EPS)
    y = y * gamma_ref[...] + beta_ref[...]
    o_ref[...] = jnp.maximum(y, 0.0)


# --------------------------------------------------------------- wrapper ----
def _pick_hw_tile(hw):
    # >=512 keeps the ~0.35us/step pipeline overhead amortized (v5e note); a
    # (C, 512) f32 x-block is 4 MiB, double-buffering well inside every
    # generation's scoped-VMEM budget.
    for t in (512, 256, 128):
        if hw % t == 0:
            return t
    return hw   # tiny / odd spatial sizes: one full-width block


def spatial_max_attention(x_nchw, conv_w, w1, w2, wfc, bfc, gamma, beta):
    B, c, H, W = x_nchw.shape
    assert c == C, f"module hard-codes {C} channels, got {c}"
    HW = H * W
    # Native layout (B, C, H*W): a free contiguous reshape of NCHW -- no
    # transposed copy of x ever hits HBM.
    x = x_nchw.reshape(B, C, HW)

    t = _pick_hw_tile(HW)
    n_sp = HW // t

    # -- K1: per-pixel channel mean / max (first streaming pass over x) ------
    stats = pl.pallas_call(
        channel_stats_kernel,
        out_shape=jax.ShapeDtypeStruct((B, 2, HW), jnp.float32),
        grid=(B, n_sp),
        in_specs=[pl.BlockSpec((None, C, t), lambda b, i: (b, 0, i))],
        out_specs=pl.BlockSpec((None, 2, t), lambda b, i: (b, 0, i)),
        compiler_params=pltpu.CompilerParams(
            dimension_semantics=("parallel", "parallel"),
            vmem_limit_bytes=_VMEM_LIMIT),
    )(x)

    # -- K2: 7x7 conv + sigmoid on the tiny 2-channel stats map --------------
    # Zero-padding the (B,2,H,W) map in the wrapper is layout plumbing on a
    # tensor ~1/1024 the size of x.
    padded = jnp.pad(stats.reshape(B, 2, H, W),
                     ((0, 0), (0, 0), (PAD, PAD), (PAD, PAD)))
    att_map = pl.pallas_call(
        spatial_conv_kernel,
        out_shape=jax.ShapeDtypeStruct((B, H, W), jnp.float32),
        grid=(B,),
        in_specs=[
            pl.BlockSpec((None, 2, H + 2 * PAD, W + 2 * PAD),
                         lambda b: (b, 0, 0, 0)),
            pl.BlockSpec(memory_space=pltpu.MemorySpace.SMEM),
        ],
        out_specs=pl.BlockSpec((None, H, W), lambda b: (b, 0, 0)),
        compiler_params=pltpu.CompilerParams(
            dimension_semantics=("parallel",),
            vmem_limit_bytes=_VMEM_LIMIT),
    )(padded, conv_w.reshape(-1).astype(jnp.float32))

    # -- K3: spatial max-pool of (attention * x) (second streaming pass) -----
    sa = att_map.reshape(B, 1, HW)
    pooled = pl.pallas_call(
        gated_maxpool_kernel,
        out_shape=jax.ShapeDtypeStruct((B, C, 1), jnp.float32),
        grid=(B, n_sp),
        in_specs=[
            pl.BlockSpec((None, C, t), lambda b, i: (b, 0, i)),
            pl.BlockSpec((None, 1, t), lambda b, i: (b, 0, i)),
        ],
        out_specs=pl.BlockSpec((None, C, 1), lambda b, i: (b, 0, 0)),
        compiler_params=pltpu.CompilerParams(
            dimension_semantics=("parallel", "arbitrary"),
            vmem_limit_bytes=_VMEM_LIMIT),
    )(x, sa)

    # -- K4: attention_block + fc head, tiled over fc output channels --------
    tn = 512
    out = pl.pallas_call(
        head_kernel,
        out_shape=jax.ShapeDtypeStruct((B, C), jnp.float32),
        grid=(C // tn,),
        in_specs=[
            pl.BlockSpec((B, C), lambda j: (0, 0)),        # pooled   (resident)
            pl.BlockSpec((C, C_RED), lambda j: (0, 0)),    # w1       (resident)
            pl.BlockSpec((C_RED, C), lambda j: (0, 0)),    # w2       (resident)
            pl.BlockSpec((C, tn), lambda j: (0, j)),       # wfc tile (streamed)
            pl.BlockSpec((1, tn), lambda j: (0, j)),       # fc bias tile
            pl.BlockSpec((1, tn), lambda j: (0, j)),       # BN gamma tile
            pl.BlockSpec((1, tn), lambda j: (0, j)),       # BN beta tile
        ],
        out_specs=pl.BlockSpec((B, tn), lambda j: (0, j)),
        compiler_params=pltpu.CompilerParams(
            dimension_semantics=("parallel",),
            vmem_limit_bytes=_VMEM_LIMIT),
    )(pooled.reshape(B, C), w1, w2, wfc, bfc, gamma, beta)
    return out


# ------------------------------------------------------------------ init ----
def init_params(key):
    """Deterministic init in the spirit of the PyTorch module.

    Weights are stored transposed w.r.t. PyTorch ((in, out) instead of
    (out, in)) so they feed the MXU directly; w1/w2/wfc are kept in bfloat16
    (halves their HBM traffic) and upcast/accumulated in f32 inside the kernels.
    """
    kc, k1, k2, k3, kg = jax.random.split(key, 5)
    conv_w = 0.1 * jax.random.normal(kc, (1, 2, KS, KS), jnp.float32)   # Conv2d(2,1,7,bias=False)
    w1 = (jax.random.normal(k1, (C, C_RED), jnp.float32)
          * jnp.sqrt(2.0 / C)).astype(jnp.bfloat16)                     # Linear(2048,128,bias=False)
    w2 = (jax.random.normal(k2, (C_RED, C), jnp.float32)
          * jnp.sqrt(2.0 / C_RED)).astype(jnp.bfloat16)                 # Linear(128,2048,bias=False)
    wfc = (jax.random.normal(k3, (C, C), jnp.float32)
           * jnp.sqrt(2.0 / C)).astype(jnp.bfloat16)                    # Linear(2048,2048), kaiming fan_out
    bfc = jnp.zeros((1, C), jnp.float32)                                # bias init 0
    gamma = 1.0 + 0.02 * jax.random.normal(kg, (1, C), jnp.float32)     # BN weight ~ N(1, 0.02)
    beta = jnp.zeros((1, C), jnp.float32)                               # BN bias 0
    return conv_w, w1, w2, wfc, bfc, gamma, beta


# ------------------------------------------------------------- reference ----
def reference(x, conv_w, w1, w2, wfc, bfc, gamma, beta):
    """Pure-JAX forward matching the PyTorch module (training-mode BN).

    Mirrors the kernels' precision policy: bf16-stored weights are upcast to
    f32 and matmuls accumulate in f32.
    """
    B = x.shape[0]
    # SpatialAttention
    avg_c = jnp.mean(x, axis=1, keepdims=True)
    max_c = jnp.max(x, axis=1, keepdims=True)
    z = jax.lax.conv_general_dilated(
        jnp.concatenate([avg_c, max_c], axis=1), conv_w,
        window_strides=(1, 1), padding=((PAD, PAD), (PAD, PAD)),
        dimension_numbers=("NCHW", "OIHW", "NCHW"),
        precision=jax.lax.Precision.HIGHEST)
    sa = 1.0 / (1.0 + jnp.exp(-z))                                      # (B,1,H,W)
    # AdaptiveMaxPool2d((1,1)) + flatten
    pooled = jnp.max((sa * x).reshape(B, C, -1), axis=-1)               # (B, C)
    # attention_block
    w1f, w2f, wfcf = (w1.astype(jnp.float32), w2.astype(jnp.float32),
                      wfc.astype(jnp.float32))
    h = jnp.maximum(jnp.dot(pooled, w1f, preferred_element_type=jnp.float32), 0.0)
    att = 1.0 / (1.0 + jnp.exp(-jnp.dot(h, w2f,
                                        preferred_element_type=jnp.float32)))
    g = pooled * att
    # fc: Linear + BatchNorm1d (batch stats, biased var) + ReLU
    y = jnp.dot(g, wfcf, preferred_element_type=jnp.float32) + bfc
    mu = jnp.mean(y, axis=0, keepdims=True)
    var = jnp.mean(jnp.square(y - mu), axis=0, keepdims=True)
    y = (y - mu) * jax.lax.rsqrt(var + BN_EPS) * gamma + beta
    return jnp.maximum(y, 0.0)


if __name__ == "__main__":
    key = jax.random.PRNGKey(0)
    kx, kp = jax.random.split(key)

    B, H, W = 2, 32, 32                 # C is fixed at 2048 by the module
    x = jax.random.normal(kx, (B, C, H, W), jnp.float32)
    params = init_params(kp)

    out = jax.block_until_ready(spatial_max_attention(x, *params))
    ref = reference(x, *params)

    assert out.shape == (B, C)
    assert bool(jnp.all(jnp.isfinite(out)))
    max_err = float(jnp.max(jnp.abs(out - ref)))
    assert bool(jnp.allclose(out, ref, atol=1e-2, rtol=1e-2)), f"max abs err {max_err}"
    print("KERNEL_OK")
</pallas_src>

<mosaic_0001>
module attributes {stable_mosaic.version = 11 : i64} {
  func.func @channel_stats_kernel(%arg0: i32, %arg1: i32, %arg2: memref<1x2048x512xf32, #tpu.memory_space<vmem>>, %arg3: memref<1x2x512xf32, #tpu.memory_space<vmem>>) attributes {dimension_semantics = [#tpu.dimension_semantics<parallel>, #tpu.dimension_semantics<parallel>], iteration_bounds = array<i64: 2, 2>, scalar_prefetch = 0 : i64, scratch_operands = 0 : i64, tpu.core_type = #tpu.core_type<tc>, window_params = [{transform_indices = @transform_0, window_bounds = array<i64: 1, 2048, 512>}, {transform_indices = @transform_1, window_bounds = array<i64: 1, 2, 512>}]} {
    %c0 = arith.constant 0 : index
    %c0_0 = arith.constant 0 : index
    %c0_1 = arith.constant 0 : index
    %0 = vector.load %arg2[%c0, %c0_0, %c0_1] : memref<1x2048x512xf32, #tpu.memory_space<vmem>>, vector<1x2048x512xf32>
    %1 = vector.shape_cast %0 : vector<1x2048x512xf32> to vector<2048x512xf32>
    %cst = arith.constant dense<0.000000e+00> : vector<512xf32>
    %2 = vector.multi_reduction <add>, %1, %cst [0] : vector<2048x512xf32> to vector<512xf32>
    %3 = vector.shape_cast %2 : vector<512xf32> to vector<1x512xf32>
    %cst_2 = arith.constant 2.048000e+03 : f32
    %4 = vector.broadcast %cst_2 : f32 to vector<1x512xf32>
    %5 = arith.divf %3, %4 : vector<1x512xf32>
    %cst_3 = arith.constant dense<0xFF800000> : vector<512xf32>
    %6 = vector.multi_reduction <maximumf>, %1, %cst_3 [0] : vector<2048x512xf32> to vector<512xf32>
    %7 = vector.shape_cast %6 : vector<512xf32> to vector<1x512xf32>
    %8 = tpu.concatenate %5, %7 in 0 : vector<1x512xf32>, vector<1x512xf32> -> vector<2x512xf32>
    %c0_4 = arith.constant 0 : index
    %c0_5 = arith.constant 0 : index
    %c0_6 = arith.constant 0 : index
    %9 = vector.load %arg3[%c0_4, %c0_5, %c0_6] : memref<1x2x512xf32, #tpu.memory_space<vmem>>, vector<1x2x512xf32>
    %10 = vector.shape_cast %9 : vector<1x2x512xf32> to vector<2x512xf32>
    %11 = vector.shape_cast %8 : vector<2x512xf32> to vector<1x2x512xf32>
    tpu.vector_store %arg3[%c0_4, %c0_5, %c0_6], %11 {strides = array<i32>} : memref<1x2x512xf32, #tpu.memory_space<vmem>>, vector<1x2x512xf32>,
    return
  }
  func.func @transform_0(%arg0: i32, %arg1: i32) -> (i32, i32, i32) {
    %c0_i32 = arith.constant 0 : i32
    %c0_i32_0 = arith.constant 0 : i32
    return %arg0, %c0_i32, %arg1 : i32, i32, i32
  }
  func.func @transform_1(%arg0: i32, %arg1: i32) -> (i32, i32, i32) {
    %c0_i32 = arith.constant 0 : i32
    %c0_i32_0 = arith.constant 0 : i32
    return %arg0, %c0_i32, %arg1 : i32, i32, i32
  }
}

</mosaic_0001>

<bundles_post_ra>
// kernel: tpu_custom_call.1
= control target key start
LH: loop header
LB: loop body
LE: loop exit
PB: predicated region body
PF: predicated region fallthrough
CT: control target
= control target key end

     0   :  { %6 = vsyncpa [#allocation3], 0  ;;  %s4841_s0 = inlined_call_operand.hbm [shape: f32[2,2048,1024], index: 0, kind: input, shape index: {}]   ;;  %s4842_s1 = inlined_call_operand.hbm [shape: f32[2,2,1024], index: 1, kind: output, shape index: {}]  }
   0x1   :  { %8 = vsyncpa [#allocation3 + $0x1], 0 }
   0x2   :  { %9 = vsyncpa [#allocation4], 0 }
   0x3   :  { %11 = vsyncpa [#allocation4 + $0x1], 0  ;;  %s3659_s6 = smov 0   ;;  %s3661_s7 = smov 0  }
   0x4   :  { %s3663_s8 = smov 0   ;;  %s3665_s9 = smov 0  }
   0x5   :  { %s3667_s10 = smov 0   ;;  %s3669_s11 = smov 0  }
   0x6   :  { %s3671_s12 = smov 0   ;;  %s3673_s13 = smov 0  }
   0x7 LB: > { %s3406_s14 = sadd.s32 4294967295, %s3643_s13   ;;  %s3407_s15 = sadd.s32 4294967294, %s3643_s13   ;;  %s3643_s13 = sphi %s3673_s13, %s17_s13   ;;  %s3639_s12 = sphi %s3671_s12, %s4859_s12   ;;  %s3635_s11 = sphi %s3669_s11, %s4858_s11   ;;  %s3631_s10 = sphi %s3667_s10, %s4857_s10   ;;  %s3627_s9 = sphi %s3665_s9, %s4856_s9   ;;  %s3623_s8 = sphi %s3663_s8, %s4855_s8   ;;  %s3619_s7 = sphi %s3661_s7, %s4854_s7   ;;  %s3615_s6 = sphi %s3659_s6, %s4853_s6  }
   0x8   : > { %s26_s16 = sadd.s32 1, %s3635_s11  ;;  %s29_s17 = sadd.s32 1, %s3639_s12 }
   0x9   : > { %p27_p0 = scmp.ge.s32.totalorder %s26_s16, 2  ;;  %s38_s18 = sadd.s32 1, %s3623_s8 }
   0xa   : > { %p45_p1 = scmp.ne.s32.totalorder %s3623_s8, %s3619_s7  ;;  %p46_p2 = scmp.eq.s32.totalorder %s3643_s13, 0 }
   0xb   : > { %s4861_s16 = smov (%p27_p0, %s26_s16), 0  ;;  %s4863_s17 = smov (!%p27_p0, %s29_s17), %s3639_s12 }
   0xc   : > { %4845 = sst [smem:[#allocation8_spill]] %s4861_s16  ;;  %s34_s19 = ssub.s32 %s3635_s11, %s4861_s16 }
   0xd   : > { %p3712_p3 = por %p46_p2, %p45_p1  ;;  %p31_p4 = scmp.ge.s32.totalorder %s4863_s17, 2 }
   0xe   : > { %p51_p5 = scmp.ne.s32.totalorder %s3619_s7, %s3615_s6  ;;  %p52_p6 = scmp.eq.s32.totalorder %s3406_s14, 0 }
   0xf   : > { %p77_p7 = scmp.eq.s32.totalorder %s3406_s14, 3  ;;  %s4865_s17 = smov (%p31_p4, %s4863_s17), 0 }
  0x10   : > { %4847 = sst [smem:[#allocation9_spill]] %s4865_s17  ;;  %p3720_p8 = por %p52_p6, %p51_p5 }
  0x11   : > { %p3724_p9 = por %p77_p7, %p45_p1  ;;  %s33_s23 = ssub.s32 %s3639_s12, %s4865_s17 }
  0x12   : > { %p83_p10 = scmp.eq.s32.totalorder %s3407_s15, 3  ;;  %s35_s24 = sor.u32 %s34_s19, %s33_s23 }
  0x13   : > { %p36_p11 = scmp.eq.s32.totalorder %s35_s24, 0  ;;  %p3435_p13 = scmp.lt.s32.totalorder %s3643_s13, 4 }
  0x14   : > { %p3730_p12 = por %p83_p10, %p51_p5  ;;  %s103_s26 = sand.u32 1, %s3623_s8  }
  0x15   : > { %s3737_s27 = scalar_select %p36_p11, %s3623_s8, %s38_s18  }
  0x16   : > { %s3410_s28 = sshll.u32 %s103_s26, 13  ;;  %s3411_s29 = sshll.u32 %s3635_s11, 2 }
  0x17   : > { %s3412_s30 = sshll.u32 %s3639_s12, 11  ;;  %s107_s2 = scalar_lea.vmem [#allocation2], %s3410_s28 }
  0x18   : > { %s117_s3 = sshll.u32 %s107_s2, 4  ;;  %s112_s4 = sadd.s32 %s3412_s30, %s3411_s29  ;;  %s118_s3 = int_to_ptr.vmem [resolvable:$true] %s117_s3 }
  0x19   : > { %s3413_s5 = sshll.u32 %s112_s4, 3  ;;  %p3428_p0 = pnand %p3435_p13, %p3712_p3 }
  0x1a   : > { %s114_s19 = scalar_lea.hbm %s4841_s0, %s3413_s5  ;;  %p3414_p1 = scmp.ge.s32.totalorder %s3643_s13, 1 }
  0x1b   : > { %s115_s23 = sshll.u32 %s114_s19, 4  ;;  %s104_s18 = scalar_lea.sflag [#allocation3], %s103_s26  ;;  %s116_s23 = int_to_ptr.hbm [resolvable:$true] %s115_s23 }
  0x1c   : > { %s3645_s24 = smov 1024   ;;  %s3646_s17 = smov 512  }
  0x1d   : > { %s3647_s16 = smov 32   ;;  %p125_p2 = scmp.lt.s32.totalorder %s3643_s13, 5 }
  0x1e   : > { %3430 = dma.hbm_to_vmem [thread:$0]  (!%p3428_p0), %s116_s23, 131072, %s118_s3, %s104_s18, %s3645_s24, %s3646_s17, %s3647_s16  }
  0x1f   : > { %p126_p4 = pnand %p3414_p1, %p125_p2 }
  0x20   : > { %s3749_s28 = sand.u32 (!%p126_p4), 1, %s3619_s7  }
  0x21   : > { %129 = sbr.rel (%p126_p4) target bundleno = 581 (0x245), region = 24  ;;  %s3415_s20 = sshll.u32 (!%p126_p4), %s3749_s28, 13 }
  0x22   : > { %s132_s29 = scalar_lea.sflag (!%p126_p4), [#allocation3], %s3749_s28  ;;  %s3753_s30 = scalar_lea.vmem (!%p126_p4), [#allocation2], %s3415_s20 }
  0x26   : > { %3606 = dma.done.wait (%p3720_p8), %s132_s29, 131072  }
  0x27   : > { %3608 = vsyncadd (%p3720_p8), %s132_s29, 4294836224  ;;  %v157_v0 = vld [vmem:[%s3753_s30] sm:$0xff]  ;;  %v158_v1 = vld [vmem:[%s3753_s30 + $0x8] sm:$0xff]  ;;  %s3418_s16 = sshll.u32 %s3627_s9, 2  ;;  %s3419_s17 = sshll.u32 %s3631_s10, 3  ;;  %vm3280_vm1 = vcmask 1040384  }
  0x28   : > { %v159_v2 = vld [vmem:[%s3753_s30 + $0x10] sm:$0xff]  ;;  %v160_v3 = vld [vmem:[%s3753_s30 + $0x18] sm:$0xff]  ;;  %v161_v4 = vld [vmem:[%s3753_s30 + $0x20] sm:$0xff]  ;;  %s3312_s21 = sadd.s32 %s3419_s17, %s3418_s16  ;;  %s3416_s9 = sshll.u32 %s3749_s28, 3  ;;  %vm3292_vm2 = vcmask 1041408   ;;  %vm3294_vm3 = vcmask 1045508  }
  0x29   : > { %v162_v5 = vld [vmem:[%s3753_s30 + $0x28] sm:$0xff]  ;;  %v163_v6 = vld [vmem:[%s3753_s30 + $0x30] sm:$0xff]  ;;  %v164_v7 = vld [vmem:[%s3753_s30 + $0x38] sm:$0xff]  ;;  %v1181_v9 = vadd.f32 %v161_v4, %v157_v0  ;;  %s3420_s10 = sshll.u32 %s3312_s21, 1  ;;  %s154_s4 = scalar_lea.vmem [#allocation5], %s3416_s9  ;;  %vm3296_vm4 = vcmask 1043456  }
  0x2a   : > { %v165_v8 = vld [vmem:[%s3753_s30 + $0x40] sm:$0xff]  ;;  %v1442_v10 = vadd.f32 %v162_v5, %v158_v1  ;;  %v166_v11 = vld [vmem:[%s3753_s30 + $0x48] sm:$0xff]  ;;  %v167_v12 = vld [vmem:[%s3753_s30 + $0x50] sm:$0xff]  ;;  %v1703_v14 = vadd.f32 %v163_v6, %v159_v2  ;;  %v1964_v15 = vadd.f32 %v164_v7, %v160_v3  ;;  %s3314_s3 = scalar_lea.hbm %s4842_s1, %s3420_s10  ;;  %s3316_s5 = sshll.u32 %s154_s4, 4  ;;  %s3317_s5 = int_to_ptr.vmem [resolvable:$true] %s3316_s5 }
  0x2b   : > { %v168_v13 = vld [vmem:[%s3753_s30 + $0x58] sm:$0xff]  ;;  %v169_v16 = vld [vmem:[%s3753_s30 + $0x60] sm:$0xff]  ;;  %v170_v17 = vld [vmem:[%s3753_s30 + $0x68] sm:$0xff]  ;;  %v1182_v19 = vadd.f32 %v1181_v9, %v165_v8  ;;  %s3318_s14 = sshll.u32 %s3314_s3, 4  ;;  %s3301_s15 = scalar_lea.sflag [#allocation4], %s3749_s28  ;;  %s3319_s14 = int_to_ptr.hbm [resolvable:$true] %s3318_s14 }
  0x2c   : > { %v171_v18 = vld [vmem:[%s3753_s30 + $0x70] sm:$0xff]  ;;  %v1443_v20 = vadd.f32 %v1442_v10, %v166_v11  ;;  %v2237_v21 = vmax.f32 %v169_v16, %v165_v8  ;;  %v2498_v22 = vmax.f32 %v170_v17, %v166_v11  ;;  %v172_v24 = vld [vmem:[%s3753_s30 + $0x78] sm:$0xff]  ;;  %v173_v25 = vld [vmem:[%s3753_s30 + $0x80] sm:$0xff]  ;;  %v1704_v27 = vadd.f32 %v1703_v14, %v167_v12  ;;  %s3559_s19 = sshra.s32 %s3319_s14, 4  ;;  %s3565_s20 = scalar_lea.hbm %s4842_s1, 32  ;;  %s3560_s19 = int_to_ptr.hbm [resolvable:$true] %s3559_s19 }
  0x2d   : > { %v2759_v23 = vmax.f32 %v171_v18, %v167_v12  ;;  %v174_v26 = vld [vmem:[%s3753_s30 + $0x88] sm:$0xff]  ;;  %v3020_v28 = vmax.f32 %v172_v24, %v168_v13  ;;  %v175_v29 = vld [vmem:[%s3753_s30 + $0x90] sm:$0xff]  ;;  %v176_v30 = vld [vmem:[%s3753_s30 + $0x98] sm:$0xff]  ;;  %v1183_v32 = vadd.f32 %v1182_v19, %v169_v16  ;;  %v1965_v34 = vadd.f32 %v1964_v15, %v168_v13  ;;  %s3561_s23 = scalar_lea.hbm %s3560_s19, 8  ;;  %p3566_p7 = scmp.lt.s32.totalorder %s3560_s19, %s4842_s1 }
  0x2e   : > { %v177_v31 = vld [vmem:[%s3753_s30 + $0xa0] sm:$0xff]  ;;  %v1444_v33 = vadd.f32 %v1443_v20, %v170_v17  ;;  %v2238_v35 = vmax.f32 %v2237_v21, %v173_v25  ;;  %v2499_v36 = vmax.f32 %v2498_v22, %v174_v26  ;;  %v178_v38 = vld [vmem:[%s3753_s30 + $0xa8] sm:$0xff]  ;;  %v179_v39 = vld [vmem:[%s3753_s30 + $0xb0] sm:$0xff]  ;;  %v1705_v41 = vadd.f32 %v1704_v27, %v171_v18  ;;  %p3562_p3 = scmp.ne.s32.totalorder %s3560_s19, %s3561_s23  ;;  %p3567_p8 = scmp.lt.s32.totalorder %s3565_s20, %s3561_s23 }
  0x2f   : > { %v2760_v37 = vmax.f32 %v2759_v23, %v175_v29  ;;  %v180_v40 = vld [vmem:[%s3753_s30 + $0xb8] sm:$0xff]  ;;  %v3021_v42 = vmax.f32 %v3020_v28, %v176_v30  ;;  %v181_v43 = vld [vmem:[%s3753_s30 + $0xc0] sm:$0xff]  ;;  %v182_v44 = vld [vmem:[%s3753_s30 + $0xc8] sm:$0xff]  ;;  %v1184_v46 = vadd.f32 %v1183_v32, %v173_v25  ;;  %v1966_v48 = vadd.f32 %v1965_v34, %v172_v24 }
  0x30   : > { %v183_v45 = vld [vmem:[%s3753_s30 + $0xd0] sm:$0xff]  ;;  %v1445_v47 = vadd.f32 %v1444_v33, %v174_v26  ;;  %v2239_v49 = vmax.f32 %v2238_v35, %v177_v31  ;;  %v2500_v50 = vmax.f32 %v2499_v36, %v178_v38  ;;  %v184_v52 = vld [vmem:[%s3753_s30 + $0xd8] sm:$0xff]  ;;  %v1706_v53 = vadd.f32 %v1705_v41, %v175_v29  ;;  %v185_v55 = vld [vmem:[%s3753_s30 + $0xe0] sm:$0xff]  ;;  %p3563_p5 = pnand %p3562_p3, %p3724_p9  ;;  %p3568_p10 = por %p3567_p8, %p3566_p7 }
  0x31   : > { %v2761_v51 = vmax.f32 %v2760_v37, %v179_v39  ;;  %v3022_v54 = vmax.f32 %v3021_v42, %v180_v40  ;;  %v186_v56 = vld [vmem:[%s3753_s30 + $0xe8] sm:$0xff]  ;;  %v187_v57 = vld [vmem:[%s3753_s30 + $0xf0] sm:$0xff]  ;;  %v1185_v58 = vadd.f32 %v1184_v46, %v177_v31  ;;  %v1967_v60 = vadd.f32 %v1966_v48, %v176_v30  ;;  %v188_v0 = vld [vmem:[%s3753_s30 + $0xf8] sm:$0xff] }
  0x32   : > { %v1446_v59 = vadd.f32 %v1445_v47, %v178_v38  ;;  %v2240_v61 = vmax.f32 %v2239_v49, %v181_v43  ;;  %v2501_v62 = vmax.f32 %v2500_v50, %v182_v44  ;;  %v1707_v1 = vadd.f32 %v1706_v53, %v179_v39  ;;  %v189_v3 = vld [vmem:[%s3753_s30 + $0x100] sm:$0xff]  ;;  %v190_v4 = vld [vmem:[%s3753_s30 + $0x108] sm:$0xff]  ;;  %v191_v5 = vld [vmem:[%s3753_s30 + $0x110] sm:$0xff]  ;;  %p3564_p6 = pneg %p3563_p5 }
  0x33   : > { %v2762_v63 = vmax.f32 %v2761_v51, %v183_v45  ;;  %v3023_v2 = vmax.f32 %v3022_v54, %v184_v52  ;;  %v1186_v6 = vadd.f32 %v1185_v58, %v181_v43  ;;  %v1968_v8 = vadd.f32 %v1967_v60, %v180_v40  ;;  %v192_v12 = vld [vmem:[%s3753_s30 + $0x118] sm:$0xff]  ;;  %v193_v15 = vld [vmem:[%s3753_s30 + $0x120] sm:$0xff]  ;;  %v194_v16 = vld [vmem:[%s3753_s30 + $0x128] sm:$0xff] }
  0x34   : > { %v1447_v7 = vadd.f32 %v1446_v59, %v182_v44  ;;  %v2241_v9 = vmax.f32 %v2240_v61, %v185_v55  ;;  %v2502_v10 = vmax.f32 %v2501_v62, %v186_v56  ;;  %v1708_v13 = vadd.f32 %v1707_v1, %v183_v45  ;;  %v195_v17 = vld [vmem:[%s3753_s30 + $0x130] sm:$0xff]  ;;  %v196_v24 = vld [vmem:[%s3753_s30 + $0x138] sm:$0xff]  ;;  %v197_v27 = vld [vmem:[%s3753_s30 + $0x140] sm:$0xff]  ;;  %p3569_p11 = pnand %p3568_p10, %p3564_p6 }
  0x35   : > { %v2763_v11 = vmax.f32 %v2762_v63, %v187_v57  ;;  %v3024_v14 = vmax.f32 %v3023_v2, %v188_v0  ;;  %v1187_v18 = vadd.f32 %v1186_v6, %v185_v55  ;;  %v1969_v20 = vadd.f32 %v1968_v8, %v184_v52  ;;  %v198_v28 = vld [vmem:[%s3753_s30 + $0x148] sm:$0xff]  ;;  %v199_v29 = vld [vmem:[%s3753_s30 + $0x150] sm:$0xff]  ;;  %v200_v36 = vld [vmem:[%s3753_s30 + $0x158] sm:$0xff] }
  0x36   : > { %v1448_v19 = vadd.f32 %v1447_v7, %v186_v56  ;;  %v2242_v21 = vmax.f32 %v2241_v9, %v189_v3  ;;  %v2503_v22 = vmax.f32 %v2502_v10, %v190_v4  ;;  %v1709_v25 = vadd.f32 %v1708_v13, %v187_v57  ;;  %v201_v39 = vld [vmem:[%s3753_s30 + $0x160] sm:$0xff]  ;;  %v202_v40 = vld [vmem:[%s3753_s30 + $0x168] sm:$0xff]  ;;  %v203_v41 = vld [vmem:[%s3753_s30 + $0x170] sm:$0xff] }
  0x37   : > { %v2764_v23 = vmax.f32 %v2763_v11, %v191_v5  ;;  %v3025_v26 = vmax.f32 %v3024_v14, %v192_v12  ;;  %v1188_v30 = vadd.f32 %v1187_v18, %v189_v3  ;;  %v1970_v32 = vadd.f32 %v1969_v20, %v188_v0  ;;  %v204_v48 = vld [vmem:[%s3753_s30 + $0x178] sm:$0xff]  ;;  %v205_v51 = vld [vmem:[%s3753_s30 + $0x180] sm:$0xff]  ;;  %v206_v52 = vld [vmem:[%s3753_s30 + $0x188] sm:$0xff] }
  0x38   : > { %v1449_v31 = vadd.f32 %v1448_v19, %v190_v4  ;;  %v2243_v33 = vmax.f32 %v2242_v21, %v193_v15  ;;  %v2504_v34 = vmax.f32 %v2503_v22, %v194_v16  ;;  %v1710_v37 = vadd.f32 %v1709_v25, %v191_v5  ;;  %v207_v53 = vld [vmem:[%s3753_s30 + $0x190] sm:$0xff]  ;;  %v208_v60 = vld [vmem:[%s3753_s30 + $0x198] sm:$0xff]  ;;  %v209_v63 = vld [vmem:[%s3753_s30 + $0x1a0] sm:$0xff] }
  0x39   : > { %v2765_v35 = vmax.f32 %v2764_v23, %v195_v17  ;;  %v3026_v38 = vmax.f32 %v3025_v26, %v196_v24  ;;  %v1189_v42 = vadd.f32 %v1188_v30, %v193_v15  ;;  %v1971_v44 = vadd.f32 %v1970_v32, %v192_v12  ;;  %v210_v0 = vld [vmem:[%s3753_s30 + $0x1a8] sm:$0xff]  ;;  %v211_v1 = vld [vmem:[%s3753_s30 + $0x1b0] sm:$0xff]  ;;  %v212_v8 = vld [vmem:[%s3753_s30 + $0x1b8] sm:$0xff] }
  0x3a   : > { %v1450_v43 = vadd.f32 %v1449_v31, %v194_v16  ;;  %v2244_v45 = vmax.f32 %v2243_v33, %v197_v27  ;;  %v2505_v46 = vmax.f32 %v2504_v34, %v198_v28  ;;  %v1711_v49 = vadd.f32 %v1710_v37, %v195_v17  ;;  %v213_v11 = vld [vmem:[%s3753_s30 + $0x1c0] sm:$0xff]  ;;  %v214_v12 = vld [vmem:[%s3753_s30 + $0x1c8] sm:$0xff]  ;;  %v215_v13 = vld [vmem:[%s3753_s30 + $0x1d0] sm:$0xff] }
  0x3b   : > { %v2766_v47 = vmax.f32 %v2765_v35, %v199_v29  ;;  %v3027_v50 = vmax.f32 %v3026_v38, %v200_v36  ;;  %v1190_v54 = vadd.f32 %v1189_v42, %v197_v27  ;;  %v1972_v56 = vadd.f32 %v1971_v44, %v196_v24  ;;  %v216_v20 = vld [vmem:[%s3753_s30 + $0x1d8] sm:$0xff]  ;;  %v217_v23 = vld [vmem:[%s3753_s30 + $0x1e0] sm:$0xff]  ;;  %v218_v24 = vld [vmem:[%s3753_s30 + $0x1e8] sm:$0xff] }
  0x3c   : > { %v1451_v55 = vadd.f32 %v1450_v43, %v198_v28  ;;  %v2245_v57 = vmax.f32 %v2244_v45, %v201_v39  ;;  %v2506_v58 = vmax.f32 %v2505_v46, %v202_v40  ;;  %v1712_v61 = vadd.f32 %v1711_v49, %v199_v29  ;;  %v219_v25 = vld [vmem:[%s3753_s30 + $0x1f0] sm:$0xff]  ;;  %v220_v32 = vld [vmem:[%s3753_s30 + $0x1f8] sm:$0xff]  ;;  %v221_v35 = vld [vmem:[%s3753_s30 + $0x200] sm:$0xff] }
  0x3d   : > { %v2767_v59 = vmax.f32 %v2766_v47, %v203_v41  ;;  %v3028_v62 = vmax.f32 %v3027_v50, %v204_v48  ;;  %v1191_v2 = vadd.f32 %v1190_v54, %v201_v39  ;;  %v1973_v4 = vadd.f32 %v1972_v56, %v200_v36  ;;  %v222_v36 = vld [vmem:[%s3753_s30 + $0x208] sm:$0xff]  ;;  %v223_v37 = vld [vmem:[%s3753_s30 + $0x210] sm:$0xff]  ;;  %v224_v44 = vld [vmem:[%s3753_s30 + $0x218] sm:$0xff] }
  0x3e   : > { %v1452_v3 = vadd.f32 %v1451_v55, %v202_v40  ;;  %v2246_v5 = vmax.f32 %v2245_v57, %v205_v51  ;;  %v2507_v6 = vmax.f32 %v2506_v58, %v206_v52  ;;  %v1713_v9 = vadd.f32 %v1712_v61, %v203_v41  ;;  %v225_v47 = vld [vmem:[%s3753_s30 + $0x220] sm:$0xff]  ;;  %v227_v49 = vld [vmem:[%s3753_s30 + $0x230] sm:$0xff]  ;;  %v228_v56 = vld [vmem:[%s3753_s30 + $0x238] sm:$0xff] }
  0x3f   : > { %v2768_v7 = vmax.f32 %v2767_v59, %v207_v53  ;;  %v3029_v10 = vmax.f32 %v3028_v62, %v208_v60  ;;  %v1192_v14 = vadd.f32 %v1191_v2, %v205_v51  ;;  %v1974_v16 = vadd.f32 %v1973_v4, %v204_v48  ;;  %v226_v48 = vld [vmem:[%s3753_s30 + $0x228] sm:$0xff]  ;;  %v229_v59 = vld [vmem:[%s3753_s30 + $0x240] sm:$0xff]  ;;  %v231_v61 = vld [vmem:[%s3753_s30 + $0x250] sm:$0xff] }
  0x40   : > { %v1453_v15 = vadd.f32 %v1452_v3, %v206_v52  ;;  %v2247_v17 = vmax.f32 %v2246_v5, %v209_v63  ;;  %v2508_v18 = vmax.f32 %v2507_v6, %v210_v0  ;;  %v1714_v21 = vadd.f32 %v1713_v9, %v207_v53  ;;  %v232_v4 = vld [vmem:[%s3753_s30 + $0x258] sm:$0xff]  ;;  %v235_v9 = vld [vmem:[%s3753_s30 + $0x270] sm:$0xff] }
  0x41   : > { %v2769_v19 = vmax.f32 %v2768_v7, %v211_v1  ;;  %v3030_v22 = vmax.f32 %v3029_v10, %v212_v8  ;;  %v1193_v26 = vadd.f32 %v1192_v14, %v209_v63  ;;  %v1975_v28 = vadd.f32 %v1974_v16, %v208_v60  ;;  %v230_v60 = vld [vmem:[%s3753_s30 + $0x248] sm:$0xff]  ;;  %v233_v7 = vld [vmem:[%s3753_s30 + $0x260] sm:$0xff]  ;;  %v236_v16 = vld [vmem:[%s3753_s30 + $0x278] sm:$0xff] }
  0x42   : > { %v1454_v27 = vadd.f32 %v1453_v15, %v210_v0  ;;  %v2248_v29 = vmax.f32 %v2247_v17, %v213_v11  ;;  %v2509_v30 = vmax.f32 %v2508_v18, %v214_v12  ;;  %v1715_v33 = vadd.f32 %v1714_v21, %v211_v1  ;;  %v239_v21 = vld [vmem:[%s3753_s30 + $0x290] sm:$0xff] }
  0x43   : > { %v2770_v31 = vmax.f32 %v2769_v19, %v215_v13  ;;  %v3031_v34 = vmax.f32 %v3030_v22, %v216_v20  ;;  %v1194_v38 = vadd.f32 %v1193_v26, %v213_v11  ;;  %v1976_v40 = vadd.f32 %v1975_v28, %v212_v8  ;;  %v234_v8 = vld [vmem:[%s3753_s30 + $0x268] sm:$0xff]  ;;  %v237_v19 = vld [vmem:[%s3753_s30 + $0x280] sm:$0xff]  ;;  %v240_v28 = vld [vmem:[%s3753_s30 + $0x298] sm:$0xff] }
  0x44   : > { %v1455_v39 = vadd.f32 %v1454_v27, %v214_v12  ;;  %v2249_v41 = vmax.f32 %v2248_v29, %v217_v23  ;;  %v2510_v42 = vmax.f32 %v2509_v30, %v218_v24  ;;  %v1716_v45 = vadd.f32 %v1715_v33, %v215_v13  ;;  %v243_v33 = vld [vmem:[%s3753_s30 + $0x2b0] sm:$0xff] }
  0x45   : > { %v2771_v43 = vmax.f32 %v2770_v31, %v219_v25  ;;  %v3032_v46 = vmax.f32 %v3031_v34, %v220_v32  ;;  %v1195_v50 = vadd.f32 %v1194_v38, %v217_v23  ;;  %v1977_v52 = vadd.f32 %v1976_v40, %v216_v20  ;;  %v238_v20 = vld [vmem:[%s3753_s30 + $0x288] sm:$0xff]  ;;  %v241_v31 = vld [vmem:[%s3753_s30 + $0x2a0] sm:$0xff]  ;;  %v244_v40 = vld [vmem:[%s3753_s30 + $0x2b8] sm:$0xff] }
  0x46   : > { %v1456_v51 = vadd.f32 %v1455_v39, %v218_v24  ;;  %v2250_v53 = vmax.f32 %v2249_v41, %v221_v35  ;;  %v2511_v54 = vmax.f32 %v2510_v42, %v222_v36  ;;  %v1717_v57 = vadd.f32 %v1716_v45, %v219_v25  ;;  %v247_v45 = vld [vmem:[%s3753_s30 + $0x2d0] sm:$0xff] }
  0x47   : > { %v2772_v55 = vmax.f32 %v2771_v43, %v223_v37  ;;  %v3033_v58 = vmax.f32 %v3032_v46, %v224_v44  ;;  %v1196_v62 = vadd.f32 %v1195_v50, %v221_v35  ;;  %v1978_v0 = vadd.f32 %v1977_v52, %v220_v32  ;;  %v242_v32 = vld [vmem:[%s3753_s30 + $0x2a8] sm:$0xff]  ;;  %v245_v43 = vld [vmem:[%s3753_s30 + $0x2c0] sm:$0xff]  ;;  %v248_v52 = vld [vmem:[%s3753_s30 + $0x2d8] sm:$0xff] }
  0x48   : > { %v1457_v63 = vadd.f32 %v1456_v51, %v222_v36  ;;  %v2251_v1 = vmax.f32 %v2250_v53, %v225_v47  ;;  %v2512_v2 = vmax.f32 %v2511_v54, %v226_v48  ;;  %v1718_v5 = vadd.f32 %v1717_v57, %v223_v37  ;;  %v251_v57 = vld [vmem:[%s3753_s30 + $0x2f0] sm:$0xff] }
  0x49   : > { %v2773_v3 = vmax.f32 %v2772_v55, %v227_v49  ;;  %v3034_v6 = vmax.f32 %v3033_v58, %v228_v56  ;;  %v1197_v10 = vadd.f32 %v1196_v62, %v225_v47  ;;  %v1979_v12 = vadd.f32 %v1978_v0, %v224_v44  ;;  %v246_v44 = vld [vmem:[%s3753_s30 + $0x2c8] sm:$0xff]  ;;  %v249_v55 = vld [vmem:[%s3753_s30 + $0x2e0] sm:$0xff]  ;;  %v252_v0 = vld [vmem:[%s3753_s30 + $0x2f8] sm:$0xff] }
  0x4a   : > { %v1458_v11 = vadd.f32 %v1457_v63, %v226_v48  ;;  %v2252_v13 = vmax.f32 %v2251_v1, %v229_v59  ;;  %v2513_v14 = vmax.f32 %v2512_v2, %v230_v60  ;;  %v1719_v17 = vadd.f32 %v1718_v5, %v227_v49  ;;  %v255_v5 = vld [vmem:[%s3753_s30 + $0x310] sm:$0xff] }
  0x4b   : > { %v2774_v15 = vmax.f32 %v2773_v3, %v231_v61  ;;  %v3035_v18 = vmax.f32 %v3034_v6, %v232_v4  ;;  %v1198_v22 = vadd.f32 %v1197_v10, %v229_v59  ;;  %v1980_v24 = vadd.f32 %v1979_v12, %v228_v56  ;;  %v250_v56 = vld [vmem:[%s3753_s30 + $0x2e8] sm:$0xff]  ;;  %v253_v3 = vld [vmem:[%s3753_s30 + $0x300] sm:$0xff]  ;;  %v256_v12 = vld [vmem:[%s3753_s30 + $0x318] sm:$0xff] }
  0x4c   : > { %v1459_v23 = vadd.f32 %v1458_v11, %v230_v60  ;;  %v2253_v25 = vmax.f32 %v2252_v13, %v233_v7  ;;  %v2514_v26 = vmax.f32 %v2513_v14, %v234_v8  ;;  %v1720_v29 = vadd.f32 %v1719_v17, %v231_v61  ;;  %v259_v17 = vld [vmem:[%s3753_s30 + $0x330] sm:$0xff] }
  0x4d   : > { %v2775_v27 = vmax.f32 %v2774_v15, %v235_v9  ;;  %v3036_v30 = vmax.f32 %v3035_v18, %v236_v16  ;;  %v1199_v34 = vadd.f32 %v1198_v22, %v233_v7  ;;  %v1981_v36 = vadd.f32 %v1980_v24, %v232_v4  ;;  %v254_v4 = vld [vmem:[%s3753_s30 + $0x308] sm:$0xff]  ;;  %v257_v15 = vld [vmem:[%s3753_s30 + $0x320] sm:$0xff]  ;;  %v260_v24 = vld [vmem:[%s3753_s30 + $0x338] sm:$0xff] }
  0x4e   : > { %v1460_v35 = vadd.f32 %v1459_v23, %v234_v8  ;;  %v2254_v37 = vmax.f32 %v2253_v25, %v237_v19  ;;  %v2515_v38 = vmax.f32 %v2514_v26, %v238_v20  ;;  %v1721_v41 = vadd.f32 %v1720_v29, %v235_v9  ;;  %v263_v29 = vld [vmem:[%s3753_s30 + $0x350] sm:$0xff] }
  0x4f   : > { %v2776_v39 = vmax.f32 %v2775_v27, %v239_v21  ;;  %v3037_v42 = vmax.f32 %v3036_v30, %v240_v28  ;;  %v1200_v46 = vadd.f32 %v1199_v34, %v237_v19  ;;  %v1982_v48 = vadd.f32 %v1981_v36, %v236_v16  ;;  %v258_v16 = vld [vmem:[%s3753_s30 + $0x328] sm:$0xff]  ;;  %v261_v27 = vld [vmem:[%s3753_s30 + $0x340] sm:$0xff]  ;;  %v264_v36 = vld [vmem:[%s3753_s30 + $0x358] sm:$0xff] }
  0x50   : > { %v1461_v47 = vadd.f32 %v1460_v35, %v238_v20  ;;  %v2255_v49 = vmax.f32 %v2254_v37, %v241_v31  ;;  %v2516_v50 = vmax.f32 %v2515_v38, %v242_v32  ;;  %v1722_v53 = vadd.f32 %v1721_v41, %v239_v21  ;;  %v267_v41 = vld [vmem:[%s3753_s30 + $0x370] sm:$0xff] }
  0x51   : > { %v2777_v51 = vmax.f32 %v2776_v39, %v243_v33  ;;  %v3038_v54 = vmax.f32 %v3037_v42, %v244_v40  ;;  %v1201_v58 = vadd.f32 %v1200_v46, %v241_v31  ;;  %v1983_v60 = vadd.f32 %v1982_v48, %v240_v28  ;;  %v262_v28 = vld [vmem:[%s3753_s30 + $0x348] sm:$0xff]  ;;  %v265_v39 = vld [vmem:[%s3753_s30 + $0x360] sm:$0xff]  ;;  %v268_v48 = vld [vmem:[%s3753_s30 + $0x378] sm:$0xff] }
  0x52   : > { %v1462_v59 = vadd.f32 %v1461_v47, %v242_v32  ;;  %v2256_v61 = vmax.f32 %v2255_v49, %v245_v43  ;;  %v2517_v62 = vmax.f32 %v2516_v50, %v246_v44  ;;  %v1723_v1 = vadd.f32 %v1722_v53, %v243_v33  ;;  %v271_v53 = vld [vmem:[%s3753_s30 + $0x390] sm:$0xff] }
  0x53   : > { %v2778_v63 = vmax.f32 %v2777_v51, %v247_v45  ;;  %v3039_v2 = vmax.f32 %v3038_v54, %v248_v52  ;;  %v1202_v6 = vadd.f32 %v1201_v58, %v245_v43  ;;  %v1984_v8 = vadd.f32 %v1983_v60, %v244_v40  ;;  %v266_v40 = vld [vmem:[%s3753_s30 + $0x368] sm:$0xff]  ;;  %v269_v51 = vld [vmem:[%s3753_s30 + $0x380] sm:$0xff]  ;;  %v272_v60 = vld [vmem:[%s3753_s30 + $0x398] sm:$0xff] }
  0x54   : > { %v1463_v7 = vadd.f32 %v1462_v59, %v246_v44  ;;  %v2257_v9 = vmax.f32 %v2256_v61, %v249_v55  ;;  %v2518_v10 = vmax.f32 %v2517_v62, %v250_v56  ;;  %v1724_v13 = vadd.f32 %v1723_v1, %v247_v45  ;;  %v275_v1 = vld [vmem:[%s3753_s30 + $0x3b0] sm:$0xff] }
  0x55   : > { %v2779_v11 = vmax.f32 %v2778_v63, %v251_v57  ;;  %v3040_v14 = vmax.f32 %v3039_v2, %v252_v0  ;;  %v1203_v18 = vadd.f32 %v1202_v6, %v249_v55  ;;  %v1985_v20 = vadd.f32 %v1984_v8, %v248_v52  ;;  %v270_v52 = vld [vmem:[%s3753_s30 + $0x388] sm:$0xff]  ;;  %v273_v63 = vld [vmem:[%s3753_s30 + $0x3a0] sm:$0xff]  ;;  %v276_v8 = vld [vmem:[%s3753_s30 + $0x3b8] sm:$0xff] }
  0x56   : > { %v1464_v19 = vadd.f32 %v1463_v7, %v250_v56  ;;  %v2258_v21 = vmax.f32 %v2257_v9, %v253_v3  ;;  %v2519_v22 = vmax.f32 %v2518_v10, %v254_v4  ;;  %v1725_v25 = vadd.f32 %v1724_v13, %v251_v57  ;;  %v279_v13 = vld [vmem:[%s3753_s30 + $0x3d0] sm:$0xff] }
  0x57   : > { %v2780_v23 = vmax.f32 %v2779_v11, %v255_v5  ;;  %v3041_v26 = vmax.f32 %v3040_v14, %v256_v12  ;;  %v1204_v30 = vadd.f32 %v1203_v18, %v253_v3  ;;  %v1986_v32 = vadd.f32 %v1985_v20, %v252_v0  ;;  %v274_v0 = vld [vmem:[%s3753_s30 + $0x3a8] sm:$0xff]  ;;  %v277_v11 = vld [vmem:[%s3753_s30 + $0x3c0] sm:$0xff]  ;;  %v280_v20 = vld [vmem:[%s3753_s30 + $0x3d8] sm:$0xff] }
  0x58   : > { %v1465_v31 = vadd.f32 %v1464_v19, %v254_v4  ;;  %v2259_v33 = vmax.f32 %v2258_v21, %v257_v15  ;;  %v2520_v34 = vmax.f32 %v2519_v22, %v258_v16  ;;  %v1726_v37 = vadd.f32 %v1725_v25, %v255_v5  ;;  %v283_v25 = vld [vmem:[%s3753_s30 + $0x3f0] sm:$0xff] }
  0x59   : > { %v2781_v35 = vmax.f32 %v2780_v23, %v259_v17  ;;  %v3042_v38 = vmax.f32 %v3041_v26, %v260_v24  ;;  %v1205_v42 = vadd.f32 %v1204_v30, %v257_v15  ;;  %v1987_v44 = vadd.f32 %v1986_v32, %v256_v12  ;;  %v278_v12 = vld [vmem:[%s3753_s30 + $0x3c8] sm:$0xff]  ;;  %v281_v23 = vld [vmem:[%s3753_s30 + $0x3e0] sm:$0xff]  ;;  %v284_v32 = vld [vmem:[%s3753_s30 + $0x3f8] sm:$0xff] }
  0x5a   : > { %v1466_v43 = vadd.f32 %v1465_v31, %v258_v16  ;;  %v2260_v45 = vmax.f32 %v2259_v33, %v261_v27  ;;  %v2521_v46 = vmax.f32 %v2520_v34, %v262_v28  ;;  %v1727_v49 = vadd.f32 %v1726_v37, %v259_v17  ;;  %v287_v37 = vld [vmem:[%s3753_s30 + $0x410] sm:$0xff] }
  0x5b   : > { %v2782_v47 = vmax.f32 %v2781_v35, %v263_v29  ;;  %v3043_v50 = vmax.f32 %v3042_v38, %v264_v36  ;;  %v1206_v54 = vadd.f32 %v1205_v42, %v261_v27  ;;  %v1988_v56 = vadd.f32 %v1987_v44, %v260_v24  ;;  %v282_v24 = vld [vmem:[%s3753_s30 + $0x3e8] sm:$0xff]  ;;  %v285_v35 = vld [vmem:[%s3753_s30 + $0x400] sm:$0xff]  ;;  %v288_v44 = vld [vmem:[%s3753_s30 + $0x418] sm:$0xff] }
  0x5c   : > { %v1467_v55 = vadd.f32 %v1466_v43, %v262_v28  ;;  %v2261_v57 = vmax.f32 %v2260_v45, %v265_v39  ;;  %v2522_v58 = vmax.f32 %v2521_v46, %v266_v40  ;;  %v1728_v61 = vadd.f32 %v1727_v49, %v263_v29  ;;  %v291_v49 = vld [vmem:[%s3753_s30 + $0x430] sm:$0xff] }
  0x5d   : > { %v2783_v59 = vmax.f32 %v2782_v47, %v267_v41  ;;  %v3044_v62 = vmax.f32 %v3043_v50, %v268_v48  ;;  %v1207_v2 = vadd.f32 %v1206_v54, %v265_v39  ;;  %v1989_v4 = vadd.f32 %v1988_v56, %v264_v36  ;;  %v286_v36 = vld [vmem:[%s3753_s30 + $0x408] sm:$0xff]  ;;  %v289_v47 = vld [vmem:[%s3753_s30 + $0x420] sm:$0xff]  ;;  %v292_v56 = vld [vmem:[%s3753_s30 + $0x438] sm:$0xff] }
  0x5e   : > { %v1468_v3 = vadd.f32 %v1467_v55, %v266_v40  ;;  %v2262_v5 = vmax.f32 %v2261_v57, %v269_v51  ;;  %v2523_v6 = vmax.f32 %v2522_v58, %v270_v52  ;;  %v1729_v9 = vadd.f32 %v1728_v61, %v267_v41  ;;  %v295_v61 = vld [vmem:[%s3753_s30 + $0x450] sm:$0xff] }
  0x5f   : > { %v2784_v7 = vmax.f32 %v2783_v59, %v271_v53  ;;  %v3045_v10 = vmax.f32 %v3044_v62, %v272_v60  ;;  %v1208_v14 = vadd.f32 %v1207_v2, %v269_v51  ;;  %v1990_v16 = vadd.f32 %v1989_v4, %v268_v48  ;;  %v290_v48 = vld [vmem:[%s3753_s30 + $0x428] sm:$0xff]  ;;  %v293_v59 = vld [vmem:[%s3753_s30 + $0x440] sm:$0xff]  ;;  %v296_v4 = vld [vmem:[%s3753_s30 + $0x458] sm:$0xff] }
  0x60   : > { %v1469_v15 = vadd.f32 %v1468_v3, %v270_v52  ;;  %v2263_v17 = vmax.f32 %v2262_v5, %v273_v63  ;;  %v2524_v18 = vmax.f32 %v2523_v6, %v274_v0  ;;  %v1730_v21 = vadd.f32 %v1729_v9, %v271_v53  ;;  %v299_v9 = vld [vmem:[%s3753_s30 + $0x470] sm:$0xff] }
  0x61   : > { %v2785_v19 = vmax.f32 %v2784_v7, %v275_v1  ;;  %v3046_v22 = vmax.f32 %v3045_v10, %v276_v8  ;;  %v1209_v26 = vadd.f32 %v1208_v14, %v273_v63  ;;  %v1991_v28 = vadd.f32 %v1990_v16, %v272_v60  ;;  %v294_v60 = vld [vmem:[%s3753_s30 + $0x448] sm:$0xff]  ;;  %v297_v7 = vld [vmem:[%s3753_s30 + $0x460] sm:$0xff]  ;;  %v300_v16 = vld [vmem:[%s3753_s30 + $0x478] sm:$0xff] }
  0x62   : > { %v1470_v27 = vadd.f32 %v1469_v15, %v274_v0  ;;  %v2264_v29 = vmax.f32 %v2263_v17, %v277_v11  ;;  %v2525_v30 = vmax.f32 %v2524_v18, %v278_v12  ;;  %v1731_v33 = vadd.f32 %v1730_v21, %v275_v1  ;;  %v303_v21 = vld [vmem:[%s3753_s30 + $0x490] sm:$0xff] }
  0x63   : > { %v2786_v31 = vmax.f32 %v2785_v19, %v279_v13  ;;  %v3047_v34 = vmax.f32 %v3046_v22, %v280_v20  ;;  %v1210_v38 = vadd.f32 %v1209_v26, %v277_v11  ;;  %v1992_v40 = vadd.f32 %v1991_v28, %v276_v8  ;;  %v298_v8 = vld [vmem:[%s3753_s30 + $0x468] sm:$0xff]  ;;  %v301_v19 = vld [vmem:[%s3753_s30 + $0x480] sm:$0xff]  ;;  %v304_v28 = vld [vmem:[%s3753_s30 + $0x498] sm:$0xff] }
  0x64   : > { %v1471_v39 = vadd.f32 %v1470_v27, %v278_v12  ;;  %v2265_v41 = vmax.f32 %v2264_v29, %v281_v23  ;;  %v2526_v42 = vmax.f32 %v2525_v30, %v282_v24  ;;  %v1732_v45 = vadd.f32 %v1731_v33, %v279_v13  ;;  %v307_v33 = vld [vmem:[%s3753_s30 + $0x4b0] sm:$0xff] }
  0x65   : > { %v2787_v43 = vmax.f32 %v2786_v31, %v283_v25  ;;  %v3048_v46 = vmax.f32 %v3047_v34, %v284_v32  ;;  %v1211_v50 = vadd.f32 %v1210_v38, %v281_v23  ;;  %v1993_v52 = vadd.f32 %v1992_v40, %v280_v20  ;;  %v302_v20 = vld [vmem:[%s3753_s30 + $0x488] sm:$0xff]  ;;  %v305_v31 = vld [vmem:[%s3753_s30 + $0x4a0] sm:$0xff]  ;;  %v308_v40 = vld [vmem:[%s3753_s30 + $0x4b8] sm:$0xff] }
  0x66   : > { %v1472_v51 = vadd.f32 %v1471_v39, %v282_v24  ;;  %v2266_v53 = vmax.f32 %v2265_v41, %v285_v35  ;;  %v2527_v54 = vmax.f32 %v2526_v42, %v286_v36  ;;  %v1733_v57 = vadd.f32 %v1732_v45, %v283_v25  ;;  %v311_v45 = vld [vmem:[%s3753_s30 + $0x4d0] sm:$0xff] }
  0x67   : > { %v2788_v55 = vmax.f32 %v2787_v43, %v287_v37  ;;  %v3049_v58 = vmax.f32 %v3048_v46, %v288_v44  ;;  %v1212_v62 = vadd.f32 %v1211_v50, %v285_v35  ;;  %v1994_v0 = vadd.f32 %v1993_v52, %v284_v32  ;;  %v306_v32 = vld [vmem:[%s3753_s30 + $0x4a8] sm:$0xff]  ;;  %v309_v43 = vld [vmem:[%s3753_s30 + $0x4c0] sm:$0xff]  ;;  %v312_v52 = vld [vmem:[%s3753_s30 + $0x4d8] sm:$0xff] }
  0x68   : > { %v1473_v63 = vadd.f32 %v1472_v51, %v286_v36  ;;  %v2267_v1 = vmax.f32 %v2266_v53, %v289_v47  ;;  %v2528_v2 = vmax.f32 %v2527_v54, %v290_v48  ;;  %v1734_v5 = vadd.f32 %v1733_v57, %v287_v37  ;;  %v315_v57 = vld [vmem:[%s3753_s30 + $0x4f0] sm:$0xff] }
  0x69   : > { %v2789_v3 = vmax.f32 %v2788_v55, %v291_v49  ;;  %v3050_v6 = vmax.f32 %v3049_v58, %v292_v56  ;;  %v1213_v10 = vadd.f32 %v1212_v62, %v289_v47  ;;  %v1995_v12 = vadd.f32 %v1994_v0, %v288_v44  ;;  %v310_v44 = vld [vmem:[%s3753_s30 + $0x4c8] sm:$0xff]  ;;  %v313_v55 = vld [vmem:[%s3753_s30 + $0x4e0] sm:$0xff]  ;;  %v316_v0 = vld [vmem:[%s3753_s30 + $0x4f8] sm:$0xff] }
  0x6a   : > { %v1474_v11 = vadd.f32 %v1473_v63, %v290_v48  ;;  %v2268_v13 = vmax.f32 %v2267_v1, %v293_v59  ;;  %v2529_v14 = vmax.f32 %v2528_v2, %v294_v60  ;;  %v1735_v17 = vadd.f32 %v1734_v5, %v291_v49  ;;  %v319_v5 = vld [vmem:[%s3753_s30 + $0x510] sm:$0xff] }
  0x6b   : > { %v2790_v15 = vmax.f32 %v2789_v3, %v295_v61  ;;  %v3051_v18 = vmax.f32 %v3050_v6, %v296_v4  ;;  %v1214_v22 = vadd.f32 %v1213_v10, %v293_v59  ;;  %v1996_v24 = vadd.f32 %v1995_v12, %v292_v56  ;;  %v314_v56 = vld [vmem:[%s3753_s30 + $0x4e8] sm:$0xff]  ;;  %v317_v3 = vld [vmem:[%s3753_s30 + $0x500] sm:$0xff]  ;;  %v320_v12 = vld [vmem:[%s3753_s30 + $0x518] sm:$0xff] }
  0x6c   : > { %v1475_v23 = vadd.f32 %v1474_v11, %v294_v60  ;;  %v2269_v25 = vmax.f32 %v2268_v13, %v297_v7  ;;  %v2530_v26 = vmax.f32 %v2529_v14, %v298_v8  ;;  %v1736_v29 = vadd.f32 %v1735_v17, %v295_v61  ;;  %v323_v17 = vld [vmem:[%s3753_s30 + $0x530] sm:$0xff] }
  0x6d   : > { %v2791_v27 = vmax.f32 %v2790_v15, %v299_v9  ;;  %v3052_v30 = vmax.f32 %v3051_v18, %v300_v16  ;;  %v1215_v34 = vadd.f32 %v1214_v22, %v297_v7  ;;  %v1997_v36 = vadd.f32 %v1996_v24, %v296_v4  ;;  %v318_v4 = vld [vmem:[%s3753_s30 + $0x508] sm:$0xff]  ;;  %v321_v15 = vld [vmem:[%s3753_s30 + $0x520] sm:$0xff]  ;;  %v324_v24 = vld [vmem:[%s3753_s30 + $0x538] sm:$0xff] }
  0x6e   : > { %v1476_v35 = vadd.f32 %v1475_v23, %v298_v8  ;;  %v2270_v37 = vmax.f32 %v2269_v25, %v301_v19  ;;  %v2531_v38 = vmax.f32 %v2530_v26, %v302_v20  ;;  %v1737_v41 = vadd.f32 %v1736_v29, %v299_v9  ;;  %v327_v29 = vld [vmem:[%s3753_s30 + $0x550] sm:$0xff] }
  0x6f   : > { %v2792_v39 = vmax.f32 %v2791_v27, %v303_v21  ;;  %v3053_v42 = vmax.f32 %v3052_v30, %v304_v28  ;;  %v1216_v46 = vadd.f32 %v1215_v34, %v301_v19  ;;  %v1998_v48 = vadd.f32 %v1997_v36, %v300_v16  ;;  %v322_v16 = vld [vmem:[%s3753_s30 + $0x528] sm:$0xff]  ;;  %v325_v27 = vld [vmem:[%s3753_s30 + $0x540] sm:$0xff]  ;;  %v328_v36 = vld [vmem:[%s3753_s30 + $0x558] sm:$0xff] }
  0x70   : > { %v1477_v47 = vadd.f32 %v1476_v35, %v302_v20  ;;  %v2271_v49 = vmax.f32 %v2270_v37, %v305_v31  ;;  %v2532_v50 = vmax.f32 %v2531_v38, %v306_v32  ;;  %v1738_v53 = vadd.f32 %v1737_v41, %v303_v21  ;;  %v331_v41 = vld [vmem:[%s3753_s30 + $0x570] sm:$0xff] }
  0x71   : > { %v2793_v51 = vmax.f32 %v2792_v39, %v307_v33  ;;  %v3054_v54 = vmax.f32 %v3053_v42, %v308_v40  ;;  %v1217_v58 = vadd.f32 %v1216_v46, %v305_v31  ;;  %v1999_v60 = vadd.f32 %v1998_v48, %v304_v28  ;;  %v326_v28 = vld [vmem:[%s3753_s30 + $0x548] sm:$0xff]  ;;  %v329_v39 = vld [vmem:[%s3753_s30 + $0x560] sm:$0xff]  ;;  %v332_v48 = vld [vmem:[%s3753_s30 + $0x578] sm:$0xff] }
  0x72   : > { %v1478_v59 = vadd.f32 %v1477_v47, %v306_v32  ;;  %v2272_v61 = vmax.f32 %v2271_v49, %v309_v43  ;;  %v2533_v62 = vmax.f32 %v2532_v50, %v310_v44  ;;  %v1739_v1 = vadd.f32 %v1738_v53, %v307_v33  ;;  %v335_v53 = vld [vmem:[%s3753_s30 + $0x590] sm:$0xff] }
  0x73   : > { %v2794_v63 = vmax.f32 %v2793_v51, %v311_v45  ;;  %v3055_v2 = vmax.f32 %v3054_v54, %v312_v52  ;;  %v1218_v6 = vadd.f32 %v1217_v58, %v309_v43  ;;  %v2000_v8 = vadd.f32 %v1999_v60, %v308_v40  ;;  %v330_v40 = vld [vmem:[%s3753_s30 + $0x568] sm:$0xff]  ;;  %v333_v51 = vld [vmem:[%s3753_s30 + $0x580] sm:$0xff]  ;;  %v336_v60 = vld [vmem:[%s3753_s30 + $0x598] sm:$0xff] }
  0x74   : > { %v1479_v7 = vadd.f32 %v1478_v59, %v310_v44  ;;  %v2273_v9 = vmax.f32 %v2272_v61, %v313_v55  ;;  %v2534_v10 = vmax.f32 %v2533_v62, %v314_v56  ;;  %v1740_v13 = vadd.f32 %v1739_v1, %v311_v45  ;;  %v339_v1 = vld [vmem:[%s3753_s30 + $0x5b0] sm:$0xff] }
  0x75   : > { %v2795_v11 = vmax.f32 %v2794_v63, %v315_v57  ;;  %v3056_v14 = vmax.f32 %v3055_v2, %v316_v0  ;;  %v1219_v18 = vadd.f32 %v1218_v6, %v313_v55  ;;  %v2001_v20 = vadd.f32 %v2000_v8, %v312_v52  ;;  %v334_v52 = vld [vmem:[%s3753_s30 + $0x588] sm:$0xff]  ;;  %v337_v63 = vld [vmem:[%s3753_s30 + $0x5a0] sm:$0xff]  ;;  %v340_v8 = vld [vmem:[%s3753_s30 + $0x5b8] sm:$0xff] }
  0x76   : > { %v1480_v19 = vadd.f32 %v1479_v7, %v314_v56  ;;  %v2274_v21 = vmax.f32 %v2273_v9, %v317_v3  ;;  %v2535_v22 = vmax.f32 %v2534_v10, %v318_v4  ;;  %v1741_v25 = vadd.f32 %v1740_v13, %v315_v57  ;;  %v343_v13 = vld [vmem:[%s3753_s30 + $0x5d0] sm:$0xff] }
  0x77   : > { %v2796_v23 = vmax.f32 %v2795_v11, %v319_v5  ;;  %v3057_v26 = vmax.f32 %v3056_v14, %v320_v12  ;;  %v1220_v30 = vadd.f32 %v1219_v18, %v317_v3  ;;  %v2002_v32 = vadd.f32 %v2001_v20, %v316_v0  ;;  %v338_v0 = vld [vmem:[%s3753_s30 + $0x5a8] sm:$0xff]  ;;  %v341_v11 = vld [vmem:[%s3753_s30 + $0x5c0] sm:$0xff]  ;;  %v344_v20 = vld [vmem:[%s3753_s30 + $0x5d8] sm:$0xff] }
  0x78   : > { %v1481_v31 = vadd.f32 %v1480_v19, %v318_v4  ;;  %v2275_v33 = vmax.f32 %v2274_v21, %v321_v15  ;;  %v2536_v34 = vmax.f32 %v2535_v22, %v322_v16  ;;  %v1742_v37 = vadd.f32 %v1741_v25, %v319_v5  ;;  %v347_v25 = vld [vmem:[%s3753_s30 + $0x5f0] sm:$0xff] }
  0x79   : > { %v2797_v35 = vmax.f32 %v2796_v23, %v323_v17  ;;  %v3058_v38 = vmax.f32 %v3057_v26, %v324_v24  ;;  %v1221_v42 = vadd.f32 %v1220_v30, %v321_v15  ;;  %v2003_v44 = vadd.f32 %v2002_v32, %v320_v12  ;;  %v342_v12 = vld [vmem:[%s3753_s30 + $0x5c8] sm:$0xff]  ;;  %v345_v23 = vld [vmem:[%s3753_s30 + $0x5e0] sm:$0xff]  ;;  %v348_v32 = vld [vmem:[%s3753_s30 + $0x5f8] sm:$0xff] }
  0x7a   : > { %v1482_v43 = vadd.f32 %v1481_v31, %v322_v16  ;;  %v2276_v45 = vmax.f32 %v2275_v33, %v325_v27  ;;  %v2537_v46 = vmax.f32 %v2536_v34, %v326_v28  ;;  %v1743_v49 = vadd.f32 %v1742_v37, %v323_v17  ;;  %v351_v37 = vld [vmem:[%s3753_s30 + $0x610] sm:$0xff] }
  0x7b   : > { %v2798_v47 = vmax.f32 %v2797_v35, %v327_v29  ;;  %v3059_v50 = vmax.f32 %v3058_v38, %v328_v36  ;;  %v1222_v54 = vadd.f32 %v1221_v42, %v325_v27  ;;  %v2004_v56 = vadd.f32 %v2003_v44, %v324_v24  ;;  %v346_v24 = vld [vmem:[%s3753_s30 + $0x5e8] sm:$0xff]  ;;  %v349_v35 = vld [vmem:[%s3753_s30 + $0x600] sm:$0xff]  ;;  %v352_v44 = vld [vmem:[%s3753_s30 + $0x618] sm:$0xff] }
  0x7c   : > { %v1483_v55 = vadd.f32 %v1482_v43, %v326_v28  ;;  %v2277_v57 = vmax.f32 %v2276_v45, %v329_v39  ;;  %v2538_v58 = vmax.f32 %v2537_v46, %v330_v40  ;;  %v1744_v61 = vadd.f32 %v1743_v49, %v327_v29  ;;  %v355_v49 = vld [vmem:[%s3753_s30 + $0x630] sm:$0xff] }
  0x7d   : > { %v2799_v59 = vmax.f32 %v2798_v47, %v331_v41  ;;  %v3060_v62 = vmax.f32 %v3059_v50, %v332_v48  ;;  %v1223_v2 = vadd.f32 %v1222_v54, %v329_v39  ;;  %v2005_v4 = vadd.f32 %v2004_v56, %v328_v36  ;;  %v350_v36 = vld [vmem:[%s3753_s30 + $0x608] sm:$0xff]  ;;  %v353_v47 = vld [vmem:[%s3753_s30 + $0x620] sm:$0xff]  ;;  %v356_v56 = vld [vmem:[%s3753_s30 + $0x638] sm:$0xff] }
  0x7e   : > { %v1484_v3 = vadd.f32 %v1483_v55, %v330_v40  ;;  %v2278_v5 = vmax.f32 %v2277_v57, %v333_v51  ;;  %v2539_v6 = vmax.f32 %v2538_v58, %v334_v52  ;;  %v1745_v9 = vadd.f32 %v1744_v61, %v331_v41  ;;  %v359_v61 = vld [vmem:[%s3753_s30 + $0x650] sm:$0xff] }
  0x7f   : > { %v2800_v7 = vmax.f32 %v2799_v59, %v335_v53  ;;  %v3061_v10 = vmax.f32 %v3060_v62, %v336_v60  ;;  %v1224_v14 = vadd.f32 %v1223_v2, %v333_v51  ;;  %v2006_v16 = vadd.f32 %v2005_v4, %v332_v48  ;;  %v354_v48 = vld [vmem:[%s3753_s30 + $0x628] sm:$0xff]  ;;  %v357_v59 = vld [vmem:[%s3753_s30 + $0x640] sm:$0xff]  ;;  %v360_v4 = vld [vmem:[%s3753_s30 + $0x658] sm:$0xff] }
  0x80   : > { %v1485_v15 = vadd.f32 %v1484_v3, %v334_v52  ;;  %v2279_v17 = vmax.f32 %v2278_v5, %v337_v63  ;;  %v2540_v18 = vmax.f32 %v2539_v6, %v338_v0  ;;  %v1746_v21 = vadd.f32 %v1745_v9, %v335_v53  ;;  %v363_v9 = vld [vmem:[%s3753_s30 + $0x670] sm:$0xff] }
  0x81   : > { %v2801_v19 = vmax.f32 %v2800_v7, %v339_v1  ;;  %v3062_v22 = vmax.f32 %v3061_v10, %v340_v8  ;;  %v1225_v26 = vadd.f32 %v1224_v14, %v337_v63  ;;  %v2007_v28 = vadd.f32 %v2006_v16, %v336_v60  ;;  %v358_v60 = vld [vmem:[%s3753_s30 + $0x648] sm:$0xff]  ;;  %v361_v7 = vld [vmem:[%s3753_s30 + $0x660] sm:$0xff]  ;;  %v364_v16 = vld [vmem:[%s3753_s30 + $0x678] sm:$0xff] }
  0x82   : > { %v1486_v27 = vadd.f32 %v1485_v15, %v338_v0  ;;  %v2280_v29 = vmax.f32 %v2279_v17, %v341_v11  ;;  %v2541_v30 = vmax.f32 %v2540_v18, %v342_v12  ;;  %v1747_v33 = vadd.f32 %v1746_v21, %v339_v1  ;;  %v367_v21 = vld [vmem:[%s3753_s30 + $0x690] sm:$0xff] }
  0x83   : > { %v2802_v31 = vmax.f32 %v2801_v19, %v343_v13  ;;  %v3063_v34 = vmax.f32 %v3062_v22, %v344_v20  ;;  %v1226_v38 = vadd.f32 %v1225_v26, %v341_v11  ;;  %v2008_v40 = vadd.f32 %v2007_v28, %v340_v8  ;;  %v362_v8 = vld [vmem:[%s3753_s30 + $0x668] sm:$0xff]  ;;  %v365_v19 = vld [vmem:[%s3753_s30 + $0x680] sm:$0xff]  ;;  %v368_v28 = vld [vmem:[%s3753_s30 + $0x698] sm:$0xff] }
  0x84   : > { %v1487_v39 = vadd.f32 %v1486_v27, %v342_v12  ;;  %v2281_v41 = vmax.f32 %v2280_v29, %v345_v23  ;;  %v2542_v42 = vmax.f32 %v2541_v30, %v346_v24  ;;  %v1748_v45 = vadd.f32 %v1747_v33, %v343_v13  ;;  %v371_v33 = vld [vmem:[%s3753_s30 + $0x6b0] sm:$0xff] }
  0x85   : > { %v2803_v43 = vmax.f32 %v2802_v31, %v347_v25  ;;  %v3064_v46 = vmax.f32 %v3063_v34, %v348_v32  ;;  %v1227_v50 = vadd.f32 %v1226_v38, %v345_v23  ;;  %v2009_v52 = vadd.f32 %v2008_v40, %v344_v20  ;;  %v366_v20 = vld [vmem:[%s3753_s30 + $0x688] sm:$0xff]  ;;  %v369_v31 = vld [vmem:[%s3753_s30 + $0x6a0] sm:$0xff]  ;;  %v372_v40 = vld [vmem:[%s3753_s30 + $0x6b8] sm:$0xff] }
  0x86   : > { %v1488_v51 = vadd.f32 %v1487_v39, %v346_v24  ;;  %v2282_v53 = vmax.f32 %v2281_v41, %v349_v35  ;;  %v2543_v54 = vmax.f32 %v2542_v42, %v350_v36  ;;  %v1749_v57 = vadd.f32 %v1748_v45, %v347_v25  ;;  %v375_v45 = vld [vmem:[%s3753_s30 + $0x6d0] sm:$0xff] }
  0x87   : > { %v2804_v55 = vmax.f32 %v2803_v43, %v351_v37  ;;  %v3065_v58 = vmax.f32 %v3064_v46, %v352_v44  ;;  %v1228_v62 = vadd.f32 %v1227_v50, %v349_v35  ;;  %v2010_v0 = vadd.f32 %v2009_v52, %v348_v32  ;;  %v370_v32 = vld [vmem:[%s3753_s30 + $0x6a8] sm:$0xff]  ;;  %v373_v43 = vld [vmem:[%s3753_s30 + $0x6c0] sm:$0xff]  ;;  %v376_v52 = vld [vmem:[%s3753_s30 + $0x6d8] sm:$0xff] }
  0x88   : > { %v1489_v63 = vadd.f32 %v1488_v51, %v350_v36  ;;  %v2283_v1 = vmax.f32 %v2282_v53, %v353_v47  ;;  %v2544_v2 = vmax.f32 %v2543_v54, %v354_v48  ;;  %v1750_v5 = vadd.f32 %v1749_v57, %v351_v37  ;;  %v379_v57 = vld [vmem:[%s3753_s30 + $0x6f0] sm:$0xff] }
  0x89   : > { %v2805_v3 = vmax.f32 %v2804_v55, %v355_v49  ;;  %v3066_v6 = vmax.f32 %v3065_v58, %v356_v56  ;;  %v1229_v10 = vadd.f32 %v1228_v62, %v353_v47  ;;  %v2011_v12 = vadd.f32 %v2010_v0, %v352_v44  ;;  %v374_v44 = vld [vmem:[%s3753_s30 + $0x6c8] sm:$0xff]  ;;  %v377_v55 = vld [vmem:[%s3753_s30 + $0x6e0] sm:$0xff]  ;;  %v380_v0 = vld [vmem:[%s3753_s30 + $0x6f8] sm:$0xff] }
  0x8a   : > { %v1490_v11 = vadd.f32 %v1489_v63, %v354_v48  ;;  %v2284_v13 = vmax.f32 %v2283_v1, %v357_v59  ;;  %v2545_v14 = vmax.f32 %v2544_v2, %v358_v60  ;;  %v1751_v17 = vadd.f32 %v1750_v5, %v355_v49  ;;  %v383_v5 = vld [vmem:[%s3753_s30 + $0x710] sm:$0xff] }
  0x8b   : > { %v2806_v15 = vmax.f32 %v2805_v3, %v359_v61  ;;  %v3067_v18 = vmax.f32 %v3066_v6, %v360_v4  ;;  %v1230_v22 = vadd.f32 %v1229_v10, %v357_v59  ;;  %v2012_v24 = vadd.f32 %v2011_v12, %v356_v56  ;;  %v378_v56 = vld [vmem:[%s3753_s30 + $0x6e8] sm:$0xff]  ;;  %v381_v3 = vld [vmem:[%s3753_s30 + $0x700] sm:$0xff]  ;;  %v384_v12 = vld [vmem:[%s3753_s30 + $0x718] sm:$0xff] }
  0x8c   : > { %v1491_v23 = vadd.f32 %v1490_v11, %v358_v60  ;;  %v2285_v25 = vmax.f32 %v2284_v13, %v361_v7  ;;  %v2546_v26 = vmax.f32 %v2545_v14, %v362_v8  ;;  %v1752_v29 = vadd.f32 %v1751_v17, %v359_v61  ;;  %v387_v17 = vld [vmem:[%s3753_s30 + $0x730] sm:$0xff] }
  0x8d   : > { %v2807_v27 = vmax.f32 %v2806_v15, %v363_v9  ;;  %v3068_v30 = vmax.f32 %v3067_v18, %v364_v16  ;;  %v1231_v34 = vadd.f32 %v1230_v22, %v361_v7  ;;  %v2013_v36 = vadd.f32 %v2012_v24, %v360_v4  ;;  %v382_v4 = vld [vmem:[%s3753_s30 + $0x708] sm:$0xff]  ;;  %v385_v15 = vld [vmem:[%s3753_s30 + $0x720] sm:$0xff]  ;;  %v388_v24 = vld [vmem:[%s3753_s30 + $0x738] sm:$0xff] }
  0x8e   : > { %v1492_v35 = vadd.f32 %v1491_v23, %v362_v8  ;;  %v2286_v37 = vmax.f32 %v2285_v25, %v365_v19  ;;  %v2547_v38 = vmax.f32 %v2546_v26, %v366_v20  ;;  %v1753_v41 = vadd.f32 %v1752_v29, %v363_v9  ;;  %v391_v29 = vld [vmem:[%s3753_s30 + $0x750] sm:$0xff] }
  0x8f   : > { %v2808_v39 = vmax.f32 %v2807_v27, %v367_v21  ;;  %v3069_v42 = vmax.f32 %v3068_v30, %v368_v28  ;;  %v1232_v46 = vadd.f32 %v1231_v34, %v365_v19  ;;  %v2014_v48 = vadd.f32 %v2013_v36, %v364_v16  ;;  %v386_v16 = vld [vmem:[%s3753_s30 + $0x728] sm:$0xff]  ;;  %v389_v27 = vld [vmem:[%s3753_s30 + $0x740] sm:$0xff]  ;;  %v392_v36 = vld [vmem:[%s3753_s30 + $0x758] sm:$0xff] }
  0x90   : > { %v1493_v47 = vadd.f32 %v1492_v35, %v366_v20  ;;  %v2287_v49 = vmax.f32 %v2286_v37, %v369_v31  ;;  %v2548_v50 = vmax.f32 %v2547_v38, %v370_v32  ;;  %v1754_v53 = vadd.f32 %v1753_v41, %v367_v21  ;;  %v395_v41 = vld [vmem:[%s3753_s30 + $0x770] sm:$0xff] }
  0x91   : > { %v2809_v51 = vmax.f32 %v2808_v39, %v371_v33  ;;  %v3070_v54 = vmax.f32 %v3069_v42, %v372_v40  ;;  %v1233_v58 = vadd.f32 %v1232_v46, %v369_v31  ;;  %v2015_v60 = vadd.f32 %v2014_v48, %v368_v28  ;;  %v390_v28 = vld [vmem:[%s3753_s30 + $0x748] sm:$0xff]  ;;  %v393_v39 = vld [vmem:[%s3753_s30 + $0x760] sm:$0xff]  ;;  %v396_v48 = vld [vmem:[%s3753_s30 + $0x778] sm:$0xff] }
  0x92   : > { %v1494_v59 = vadd.f32 %v1493_v47, %v370_v32  ;;  %v2288_v61 = vmax.f32 %v2287_v49, %v373_v43  ;;  %v2549_v62 = vmax.f32 %v2548_v50, %v374_v44  ;;  %v1755_v1 = vadd.f32 %v1754_v53, %v371_v33  ;;  %v399_v53 = vld [vmem:[%s3753_s30 + $0x790] sm:$0xff] }
  0x93   : > { %v2810_v63 = vmax.f32 %v2809_v51, %v375_v45  ;;  %v3071_v2 = vmax.f32 %v3070_v54, %v376_v52  ;;  %v1234_v6 = vadd.f32 %v1233_v58, %v373_v43  ;;  %v2016_v8 = vadd.f32 %v2015_v60, %v372_v40  ;;  %v394_v40 = vld [vmem:[%s3753_s30 + $0x768] sm:$0xff]  ;;  %v397_v51 = vld [vmem:[%s3753_s30 + $0x780] sm:$0xff]  ;;  %v400_v60 = vld [vmem:[%s3753_s30 + $0x798] sm:$0xff] }
  0x94   : > { %v1495_v7 = vadd.f32 %v1494_v59, %v374_v44  ;;  %v2289_v9 = vmax.f32 %v2288_v61, %v377_v55  ;;  %v2550_v10 = vmax.f32 %v2549_v62, %v378_v56  ;;  %v1756_v13 = vadd.f32 %v1755_v1, %v375_v45  ;;  %v403_v1 = vld [vmem:[%s3753_s30 + $0x7b0] sm:$0xff] }
  0x95   : > { %v2811_v11 = vmax.f32 %v2810_v63, %v379_v57  ;;  %v3072_v14 = vmax.f32 %v3071_v2, %v380_v0  ;;  %v1235_v18 = vadd.f32 %v1234_v6, %v377_v55  ;;  %v2017_v20 = vadd.f32 %v2016_v8, %v376_v52  ;;  %v398_v52 = vld [vmem:[%s3753_s30 + $0x788] sm:$0xff]  ;;  %v401_v63 = vld [vmem:[%s3753_s30 + $0x7a0] sm:$0xff]  ;;  %v404_v8 = vld [vmem:[%s3753_s30 + $0x7b8] sm:$0xff] }
  0x96   : > { %v1496_v19 = vadd.f32 %v1495_v7, %v378_v56  ;;  %v2290_v21 = vmax.f32 %v2289_v9, %v381_v3  ;;  %v2551_v22 = vmax.f32 %v2550_v10, %v382_v4  ;;  %v1757_v25 = vadd.f32 %v1756_v13, %v379_v57  ;;  %v407_v13 = vld [vmem:[%s3753_s30 + $0x7d0] sm:$0xff] }
  0x97   : > { %v2812_v23 = vmax.f32 %v2811_v11, %v383_v5  ;;  %v3073_v26 = vmax.f32 %v3072_v14, %v384_v12  ;;  %v1236_v30 = vadd.f32 %v1235_v18, %v381_v3  ;;  %v2018_v32 = vadd.f32 %v2017_v20, %v380_v0  ;;  %v402_v0 = vld [vmem:[%s3753_s30 + $0x7a8] sm:$0xff]  ;;  %v405_v11 = vld [vmem:[%s3753_s30 + $0x7c0] sm:$0xff]  ;;  %v408_v20 = vld [vmem:[%s3753_s30 + $0x7d8] sm:$0xff] }
  0x98   : > { %v1497_v31 = vadd.f32 %v1496_v19, %v382_v4  ;;  %v2291_v33 = vmax.f32 %v2290_v21, %v385_v15  ;;  %v2552_v34 = vmax.f32 %v2551_v22, %v386_v16  ;;  %v1758_v37 = vadd.f32 %v1757_v25, %v383_v5  ;;  %v411_v25 = vld [vmem:[%s3753_s30 + $0x7f0] sm:$0xff] }
  0x99   : > { %v2813_v35 = vmax.f32 %v2812_v23, %v387_v17  ;;  %v3074_v38 = vmax.f32 %v3073_v26, %v388_v24  ;;  %v1237_v42 = vadd.f32 %v1236_v30, %v385_v15  ;;  %v2019_v44 = vadd.f32 %v2018_v32, %v384_v12  ;;  %v406_v12 = vld [vmem:[%s3753_s30 + $0x7c8] sm:$0xff]  ;;  %v409_v23 = vld [vmem:[%s3753_s30 + $0x7e0] sm:$0xff]  ;;  %v412_v32 = vld [vmem:[%s3753_s30 + $0x7f8] sm:$0xff] }
  0x9a   : > { %v1498_v43 = vadd.f32 %v1497_v31, %v386_v16  ;;  %v2292_v45 = vmax.f32 %v2291_v33, %v389_v27  ;;  %v2553_v46 = vmax.f32 %v2552_v34, %v390_v28  ;;  %v1759_v49 = vadd.f32 %v1758_v37, %v387_v17  ;;  %v415_v37 = vld [vmem:[%s3753_s30 + $0x810] sm:$0xff] }
  0x9b   : > { %v2814_v47 = vmax.f32 %v2813_v35, %v391_v29  ;;  %v3075_v50 = vmax.f32 %v3074_v38, %v392_v36  ;;  %v1238_v54 = vadd.f32 %v1237_v42, %v389_v27  ;;  %v2020_v56 = vadd.f32 %v2019_v44, %v388_v24  ;;  %v410_v24 = vld [vmem:[%s3753_s30 + $0x7e8] sm:$0xff]  ;;  %v413_v35 = vld [vmem:[%s3753_s30 + $0x800] sm:$0xff]  ;;  %v416_v44 = vld [vmem:[%s3753_s30 + $0x818] sm:$0xff] }
  0x9c   : > { %v1499_v55 = vadd.f32 %v1498_v43, %v390_v28  ;;  %v2293_v57 = vmax.f32 %v2292_v45, %v393_v39  ;;  %v2554_v58 = vmax.f32 %v2553_v46, %v394_v40  ;;  %v1760_v61 = vadd.f32 %v1759_v49, %v391_v29  ;;  %v419_v49 = vld [vmem:[%s3753_s30 + $0x830] sm:$0xff] }
  0x9d   : > { %v2815_v59 = vmax.f32 %v2814_v47, %v395_v41  ;;  %v3076_v62 = vmax.f32 %v3075_v50, %v396_v48  ;;  %v1239_v2 = vadd.f32 %v1238_v54, %v393_v39  ;;  %v2021_v4 = vadd.f32 %v2020_v56, %v392_v36  ;;  %v414_v36 = vld [vmem:[%s3753_s30 + $0x808] sm:$0xff]  ;;  %v417_v47 = vld [vmem:[%s3753_s30 + $0x820] sm:$0xff]  ;;  %v420_v56 = vld [vmem:[%s3753_s30 + $0x838] sm:$0xff] }
  0x9e   : > { %v1500_v3 = vadd.f32 %v1499_v55, %v394_v40  ;;  %v2294_v5 = vmax.f32 %v2293_v57, %v397_v51  ;;  %v2555_v6 = vmax.f32 %v2554_v58, %v398_v52  ;;  %v1761_v9 = vadd.f32 %v1760_v61, %v395_v41  ;;  %v423_v61 = vld [vmem:[%s3753_s30 + $0x850] sm:$0xff] }
  0x9f   : > { %v2816_v7 = vmax.f32 %v2815_v59, %v399_v53  ;;  %v3077_v10 = vmax.f32 %v3076_v62, %v400_v60  ;;  %v1240_v14 = vadd.f32 %v1239_v2, %v397_v51  ;;  %v2022_v16 = vadd.f32 %v2021_v4, %v396_v48  ;;  %v418_v48 = vld [vmem:[%s3753_s30 + $0x828] sm:$0xff]  ;;  %v421_v59 = vld [vmem:[%s3753_s30 + $0x840] sm:$0xff]  ;;  %v424_v4 = vld [vmem:[%s3753_s30 + $0x858] sm:$0xff] }
  0xa0   : > { %v1501_v15 = vadd.f32 %v1500_v3, %v398_v52  ;;  %v2295_v17 = vmax.f32 %v2294_v5, %v401_v63  ;;  %v2556_v18 = vmax.f32 %v2555_v6, %v402_v0  ;;  %v1762_v21 = vadd.f32 %v1761_v9, %v399_v53  ;;  %v427_v9 = vld [vmem:[%s3753_s30 + $0x870] sm:$0xff] }
  0xa1   : > { %v2817_v19 = vmax.f32 %v2816_v7, %v403_v1  ;;  %v3078_v22 = vmax.f32 %v3077_v10, %v404_v8  ;;  %v1241_v26 = vadd.f32 %v1240_v14, %v401_v63  ;;  %v2023_v28 = vadd.f32 %v2022_v16, %v400_v60  ;;  %v422_v60 = vld [vmem:[%s3753_s30 + $0x848] sm:$0xff]  ;;  %v425_v7 = vld [vmem:[%s3753_s30 + $0x860] sm:$0xff]  ;;  %v428_v16 = vld [vmem:[%s3753_s30 + $0x878] sm:$0xff] }
  0xa2   : > { %v1502_v27 = vadd.f32 %v1501_v15, %v402_v0  ;;  %v2296_v29 = vmax.f32 %v2295_v17, %v405_v11  ;;  %v2557_v30 = vmax.f32 %v2556_v18, %v406_v12  ;;  %v1763_v33 = vadd.f32 %v1762_v21, %v403_v1  ;;  %v431_v21 = vld [vmem:[%s3753_s30 + $0x890] sm:$0xff] }
  0xa3   : > { %v2818_v31 = vmax.f32 %v2817_v19, %v407_v13  ;;  %v3079_v34 = vmax.f32 %v3078_v22, %v408_v20  ;;  %v1242_v38 = vadd.f32 %v1241_v26, %v405_v11  ;;  %v2024_v40 = vadd.f32 %v2023_v28, %v404_v8  ;;  %v426_v8 = vld [vmem:[%s3753_s30 + $0x868] sm:$0xff]  ;;  %v429_v19 = vld [vmem:[%s3753_s30 + $0x880] sm:$0xff]  ;;  %v432_v28 = vld [vmem:[%s3753_s30 + $0x898] sm:$0xff] }
  0xa4   : > { %v1503_v39 = vadd.f32 %v1502_v27, %v406_v12  ;;  %v2297_v41 = vmax.f32 %v2296_v29, %v409_v23  ;;  %v2558_v42 = vmax.f32 %v2557_v30, %v410_v24  ;;  %v1764_v45 = vadd.f32 %v1763_v33, %v407_v13  ;;  %v435_v33 = vld [vmem:[%s3753_s30 + $0x8b0] sm:$0xff] }
  0xa5   : > { %v2819_v43 = vmax.f32 %v2818_v31, %v411_v25  ;;  %v3080_v46 = vmax.f32 %v3079_v34, %v412_v32  ;;  %v1243_v50 = vadd.f32 %v1242_v38, %v409_v23  ;;  %v2025_v52 = vadd.f32 %v2024_v40, %v408_v20  ;;  %v430_v20 = vld [vmem:[%s3753_s30 + $0x888] sm:$0xff]  ;;  %v433_v31 = vld [vmem:[%s3753_s30 + $0x8a0] sm:$0xff]  ;;  %v436_v40 = vld [vmem:[%s3753_s30 + $0x8b8] sm:$0xff] }
  0xa6   : > { %v1504_v51 = vadd.f32 %v1503_v39, %v410_v24  ;;  %v2298_v53 = vmax.f32 %v2297_v41, %v413_v35  ;;  %v2559_v54 = vmax.f32 %v2558_v42, %v414_v36  ;;  %v1765_v57 = vadd.f32 %v1764_v45, %v411_v25  ;;  %v439_v45 = vld [vmem:[%s3753_s30 + $0x8d0] sm:$0xff] }
  0xa7   : > { %v2820_v55 = vmax.f32 %v2819_v43, %v415_v37  ;;  %v3081_v58 = vmax.f32 %v3080_v46, %v416_v44  ;;  %v1244_v62 = vadd.f32 %v1243_v50, %v413_v35  ;;  %v2026_v0 = vadd.f32 %v2025_v52, %v412_v32  ;;  %v434_v32 = vld [vmem:[%s3753_s30 + $0x8a8] sm:$0xff]  ;;  %v437_v43 = vld [vmem:[%s3753_s30 + $0x8c0] sm:$0xff]  ;;  %v440_v52 = vld [vmem:[%s3753_s30 + $0x8d8] sm:$0xff] }
  0xa8   : > { %v1505_v63 = vadd.f32 %v1504_v51, %v414_v36  ;;  %v2299_v1 = vmax.f32 %v2298_v53, %v417_v47  ;;  %v2560_v2 = vmax.f32 %v2559_v54, %v418_v48  ;;  %v1766_v5 = vadd.f32 %v1765_v57, %v415_v37  ;;  %v443_v57 = vld [vmem:[%s3753_s30 + $0x8f0] sm:$0xff] }
  0xa9   : > { %v2821_v3 = vmax.f32 %v2820_v55, %v419_v49  ;;  %v3082_v6 = vmax.f32 %v3081_v58, %v420_v56  ;;  %v1245_v10 = vadd.f32 %v1244_v62, %v417_v47  ;;  %v2027_v12 = vadd.f32 %v2026_v0, %v416_v44  ;;  %v438_v44 = vld [vmem:[%s3753_s30 + $0x8c8] sm:$0xff]  ;;  %v441_v55 = vld [vmem:[%s3753_s30 + $0x8e0] sm:$0xff]  ;;  %v444_v0 = vld [vmem:[%s3753_s30 + $0x8f8] sm:$0xff] }
  0xaa   : > { %v1506_v11 = vadd.f32 %v1505_v63, %v418_v48  ;;  %v2300_v13 = vmax.f32 %v2299_v1, %v421_v59  ;;  %v2561_v14 = vmax.f32 %v2560_v2, %v422_v60  ;;  %v1767_v17 = vadd.f32 %v1766_v5, %v419_v49  ;;  %v447_v5 = vld [vmem:[%s3753_s30 + $0x910] sm:$0xff] }
  0xab   : > { %v2822_v15 = vmax.f32 %v2821_v3, %v423_v61  ;;  %v3083_v18 = vmax.f32 %v3082_v6, %v424_v4  ;;  %v1246_v22 = vadd.f32 %v1245_v10, %v421_v59  ;;  %v2028_v24 = vadd.f32 %v2027_v12, %v420_v56  ;;  %v442_v56 = vld [vmem:[%s3753_s30 + $0x8e8] sm:$0xff]  ;;  %v445_v3 = vld [vmem:[%s3753_s30 + $0x900] sm:$0xff]  ;;  %v448_v12 = vld [vmem:[%s3753_s30 + $0x918] sm:$0xff] }
  0xac   : > { %v1507_v23 = vadd.f32 %v1506_v11, %v422_v60  ;;  %v2301_v25 = vmax.f32 %v2300_v13, %v425_v7  ;;  %v2562_v26 = vmax.f32 %v2561_v14, %v426_v8  ;;  %v1768_v29 = vadd.f32 %v1767_v17, %v423_v61  ;;  %v451_v17 = vld [vmem:[%s3753_s30 + $0x930] sm:$0xff] }
  0xad   : > { %v2823_v27 = vmax.f32 %v2822_v15, %v427_v9  ;;  %v3084_v30 = vmax.f32 %v3083_v18, %v428_v16  ;;  %v1247_v34 = vadd.f32 %v1246_v22, %v425_v7  ;;  %v2029_v36 = vadd.f32 %v2028_v24, %v424_v4  ;;  %v446_v4 = vld [vmem:[%s3753_s30 + $0x908] sm:$0xff]  ;;  %v449_v15 = vld [vmem:[%s3753_s30 + $0x920] sm:$0xff]  ;;  %v452_v24 = vld [vmem:[%s3753_s30 + $0x938] sm:$0xff] }
  0xae   : > { %v1508_v35 = vadd.f32 %v1507_v23, %v426_v8  ;;  %v2302_v37 = vmax.f32 %v2301_v25, %v429_v19  ;;  %v2563_v38 = vmax.f32 %v2562_v26, %v430_v20  ;;  %v1769_v41 = vadd.f32 %v1768_v29, %v427_v9  ;;  %v455_v29 = vld [vmem:[%s3753_s30 + $0x950] sm:$0xff] }
  0xaf   : > { %v2824_v39 = vmax.f32 %v2823_v27, %v431_v21  ;;  %v3085_v42 = vmax.f32 %v3084_v30, %v432_v28  ;;  %v1248_v46 = vadd.f32 %v1247_v34, %v429_v19  ;;  %v2030_v48 = vadd.f32 %v2029_v36, %v428_v16  ;;  %v450_v16 = vld [vmem:[%s3753_s30 + $0x928] sm:$0xff]  ;;  %v453_v27 = vld [vmem:[%s3753_s30 + $0x940] sm:$0xff]  ;;  %v456_v36 = vld [vmem:[%s3753_s30 + $0x958] sm:$0xff] }
  0xb0   : > { %v1509_v47 = vadd.f32 %v1508_v35, %v430_v20  ;;  %v2303_v49 = vmax.f32 %v2302_v37, %v433_v31  ;;  %v2564_v50 = vmax.f32 %v2563_v38, %v434_v32  ;;  %v1770_v53 = vadd.f32 %v1769_v41, %v431_v21  ;;  %v459_v41 = vld [vmem:[%s3753_s30 + $0x970] sm:$0xff] }
  0xb1   : > { %v2825_v51 = vmax.f32 %v2824_v39, %v435_v33  ;;  %v3086_v54 = vmax.f32 %v3085_v42, %v436_v40  ;;  %v1249_v58 = vadd.f32 %v1248_v46, %v433_v31  ;;  %v2031_v60 = vadd.f32 %v2030_v48, %v432_v28  ;;  %v454_v28 = vld [vmem:[%s3753_s30 + $0x948] sm:$0xff]  ;;  %v457_v39 = vld [vmem:[%s3753_s30 + $0x960] sm:$0xff]  ;;  %v460_v48 = vld [vmem:[%s3753_s30 + $0x978] sm:$0xff] }
  0xb2   : > { %v1510_v59 = vadd.f32 %v1509_v47, %v434_v32  ;;  %v2304_v61 = vmax.f32 %v2303_v49, %v437_v43  ;;  %v2565_v62 = vmax.f32 %v2564_v50, %v438_v44  ;;  %v1771_v1 = vadd.f32 %v1770_v53, %v435_v33  ;;  %v463_v53 = vld [vmem:[%s3753_s30 + $0x990] sm:$0xff] }
  0xb3   : > { %v2826_v63 = vmax.f32 %v2825_v51, %v439_v45  ;;  %v3087_v2 = vmax.f32 %v3086_v54, %v440_v52  ;;  %v1250_v6 = vadd.f32 %v1249_v58, %v437_v43  ;;  %v2032_v8 = vadd.f32 %v2031_v60, %v436_v40  ;;  %v458_v40 = vld [vmem:[%s3753_s30 + $0x968] sm:$0xff]  ;;  %v461_v51 = vld [vmem:[%s3753_s30 + $0x980] sm:$0xff]  ;;  %v464_v60 = vld [vmem:[%s3753_s30 + $0x998] sm:$0xff] }
  0xb4   : > { %v1511_v7 = vadd.f32 %v1510_v59, %v438_v44  ;;  %v2305_v9 = vmax.f32 %v2304_v61, %v441_v55  ;;  %v2566_v10 = vmax.f32 %v2565_v62, %v442_v56  ;;  %v1772_v13 = vadd.f32 %v1771_v1, %v439_v45  ;;  %v467_v1 = vld [vmem:[%s3753_s30 + $0x9b0] sm:$0xff] }
  0xb5   : > { %v2827_v11 = vmax.f32 %v2826_v63, %v443_v57  ;;  %v3088_v14 = vmax.f32 %v3087_v2, %v444_v0  ;;  %v1251_v18 = vadd.f32 %v1250_v6, %v441_v55  ;;  %v2033_v20 = vadd.f32 %v2032_v8, %v440_v52  ;;  %v462_v52 = vld [vmem:[%s3753_s30 + $0x988] sm:$0xff]  ;;  %v465_v63 = vld [vmem:[%s3753_s30 + $0x9a0] sm:$0xff]  ;;  %v468_v8 = vld [vmem:[%s3753_s30 + $0x9b8] sm:$0xff] }
  0xb6   : > { %v1512_v19 = vadd.f32 %v1511_v7, %v442_v56  ;;  %v2306_v21 = vmax.f32 %v2305_v9, %v445_v3  ;;  %v2567_v22 = vmax.f32 %v2566_v10, %v446_v4  ;;  %v1773_v25 = vadd.f32 %v1772_v13, %v443_v57  ;;  %v471_v13 = vld [vmem:[%s3753_s30 + $0x9d0] sm:$0xff] }
  0xb7   : > { %v2828_v23 = vmax.f32 %v2827_v11, %v447_v5  ;;  %v3089_v26 = vmax.f32 %v3088_v14, %v448_v12  ;;  %v1252_v30 = vadd.f32 %v1251_v18, %v445_v3  ;;  %v2034_v32 = vadd.f32 %v2033_v20, %v444_v0  ;;  %v466_v0 = vld [vmem:[%s3753_s30 + $0x9a8] sm:$0xff]  ;;  %v469_v11 = vld [vmem:[%s3753_s30 + $0x9c0] sm:$0xff]  ;;  %v472_v20 = vld [vmem:[%s3753_s30 + $0x9d8] sm:$0xff] }
  0xb8   : > { %v1513_v31 = vadd.f32 %v1512_v19, %v446_v4  ;;  %v2307_v33 = vmax.f32 %v2306_v21, %v449_v15  ;;  %v2568_v34 = vmax.f32 %v2567_v22, %v450_v16  ;;  %v1774_v37 = vadd.f32 %v1773_v25, %v447_v5  ;;  %v475_v25 = vld [vmem:[%s3753_s30 + $0x9f0] sm:$0xff] }
  0xb9   : > { %v2829_v35 = vmax.f32 %v2828_v23, %v451_v17  ;;  %v3090_v38 = vmax.f32 %v3089_v26, %v452_v24  ;;  %v1253_v42 = vadd.f32 %v1252_v30, %v449_v15  ;;  %v2035_v44 = vadd.f32 %v2034_v32, %v448_v12  ;;  %v470_v12 = vld [vmem:[%s3753_s30 + $0x9c8] sm:$0xff]  ;;  %v473_v23 = vld [vmem:[%s3753_s30 + $0x9e0] sm:$0xff]  ;;  %v476_v32 = vld [vmem:[%s3753_s30 + $0x9f8] sm:$0xff] }
  0xba   : > { %v1514_v43 = vadd.f32 %v1513_v31, %v450_v16  ;;  %v2308_v45 = vmax.f32 %v2307_v33, %v453_v27  ;;  %v2569_v46 = vmax.f32 %v2568_v34, %v454_v28  ;;  %v1775_v49 = vadd.f32 %v1774_v37, %v451_v17  ;;  %v479_v37 = vld [vmem:[%s3753_s30 + $0xa10] sm:$0xff] }
  0xbb   : > { %v2830_v47 = vmax.f32 %v2829_v35, %v455_v29  ;;  %v3091_v50 = vmax.f32 %v3090_v38, %v456_v36  ;;  %v1254_v54 = vadd.f32 %v1253_v42, %v453_v27  ;;  %v2036_v56 = vadd.f32 %v2035_v44, %v452_v24  ;;  %v474_v24 = vld [vmem:[%s3753_s30 + $0x9e8] sm:$0xff]  ;;  %v477_v35 = vld [vmem:[%s3753_s30 + $0xa00] sm:$0xff]  ;;  %v480_v44 = vld [vmem:[%s3753_s30 + $0xa18] sm:$0xff] }
  0xbc   : > { %v1515_v55 = vadd.f32 %v1514_v43, %v454_v28  ;;  %v2309_v57 = vmax.f32 %v2308_v45, %v457_v39  ;;  %v2570_v58 = vmax.f32 %v2569_v46, %v458_v40  ;;  %v1776_v61 = vadd.f32 %v1775_v49, %v455_v29  ;;  %v483_v49 = vld [vmem:[%s3753_s30 + $0xa30] sm:$0xff] }
  0xbd   : > { %v2831_v59 = vmax.f32 %v2830_v47, %v459_v41  ;;  %v3092_v62 = vmax.f32 %v3091_v50, %v460_v48  ;;  %v1255_v2 = vadd.f32 %v1254_v54, %v457_v39  ;;  %v2037_v4 = vadd.f32 %v2036_v56, %v456_v36  ;;  %v478_v36 = vld [vmem:[%s3753_s30 + $0xa08] sm:$0xff]  ;;  %v481_v47 = vld [vmem:[%s3753_s30 + $0xa20] sm:$0xff]  ;;  %v484_v56 = vld [vmem:[%s3753_s30 + $0xa38] sm:$0xff] }
  0xbe   : > { %v1516_v3 = vadd.f32 %v1515_v55, %v458_v40  ;;  %v2310_v5 = vmax.f32 %v2309_v57, %v461_v51  ;;  %v2571_v6 = vmax.f32 %v2570_v58, %v462_v52  ;;  %v1777_v9 = vadd.f32 %v1776_v61, %v459_v41  ;;  %v487_v61 = vld [vmem:[%s3753_s30 + $0xa50] sm:$0xff] }
  0xbf   : > { %v2832_v7 = vmax.f32 %v2831_v59, %v463_v53  ;;  %v3093_v10 = vmax.f32 %v3092_v62, %v464_v60  ;;  %v1256_v14 = vadd.f32 %v1255_v2, %v461_v51  ;;  %v2038_v16 = vadd.f32 %v2037_v4, %v460_v48  ;;  %v482_v48 = vld [vmem:[%s3753_s30 + $0xa28] sm:$0xff]  ;;  %v485_v59 = vld [vmem:[%s3753_s30 + $0xa40] sm:$0xff]  ;;  %v488_v4 = vld [vmem:[%s3753_s30 + $0xa58] sm:$0xff] }
  0xc0   : > { %v1517_v15 = vadd.f32 %v1516_v3, %v462_v52  ;;  %v2311_v17 = vmax.f32 %v2310_v5, %v465_v63  ;;  %v2572_v18 = vmax.f32 %v2571_v6, %v466_v0  ;;  %v1778_v21 = vadd.f32 %v1777_v9, %v463_v53  ;;  %v491_v9 = vld [vmem:[%s3753_s30 + $0xa70] sm:$0xff] }
  0xc1   : > { %v2833_v19 = vmax.f32 %v2832_v7, %v467_v1  ;;  %v3094_v22 = vmax.f32 %v3093_v10, %v468_v8  ;;  %v1257_v26 = vadd.f32 %v1256_v14, %v465_v63  ;;  %v2039_v28 = vadd.f32 %v2038_v16, %v464_v60  ;;  %v486_v60 = vld [vmem:[%s3753_s30 + $0xa48] sm:$0xff]  ;;  %v489_v7 = vld [vmem:[%s3753_s30 + $0xa60] sm:$0xff]  ;;  %v492_v16 = vld [vmem:[%s3753_s30 + $0xa78] sm:$0xff] }
  0xc2   : > { %v1518_v27 = vadd.f32 %v1517_v15, %v466_v0  ;;  %v2312_v29 = vmax.f32 %v2311_v17, %v469_v11  ;;  %v2573_v30 = vmax.f32 %v2572_v18, %v470_v12  ;;  %v1779_v33 = vadd.f32 %v1778_v21, %v467_v1  ;;  %v495_v21 = vld [vmem:[%s3753_s30 + $0xa90] sm:$0xff] }
  0xc3   : > { %v2834_v31 = vmax.f32 %v2833_v19, %v471_v13  ;;  %v3095_v34 = vmax.f32 %v3094_v22, %v472_v20  ;;  %v1258_v38 = vadd.f32 %v1257_v26, %v469_v11  ;;  %v2040_v40 = vadd.f32 %v2039_v28, %v468_v8  ;;  %v490_v8 = vld [vmem:[%s3753_s30 + $0xa68] sm:$0xff]  ;;  %v493_v19 = vld [vmem:[%s3753_s30 + $0xa80] sm:$0xff]  ;;  %v496_v28 = vld [vmem:[%s3753_s30 + $0xa98] sm:$0xff] }
  0xc4   : > { %v1519_v39 = vadd.f32 %v1518_v27, %v470_v12  ;;  %v2313_v41 = vmax.f32 %v2312_v29, %v473_v23  ;;  %v2574_v42 = vmax.f32 %v2573_v30, %v474_v24  ;;  %v1780_v45 = vadd.f32 %v1779_v33, %v471_v13  ;;  %v499_v33 = vld [vmem:[%s3753_s30 + $0xab0] sm:$0xff] }
  0xc5   : > { %v2835_v43 = vmax.f32 %v2834_v31, %v475_v25  ;;  %v3096_v46 = vmax.f32 %v3095_v34, %v476_v32  ;;  %v1259_v50 = vadd.f32 %v1258_v38, %v473_v23  ;;  %v2041_v52 = vadd.f32 %v2040_v40, %v472_v20  ;;  %v494_v20 = vld [vmem:[%s3753_s30 + $0xa88] sm:$0xff]  ;;  %v497_v31 = vld [vmem:[%s3753_s30 + $0xaa0] sm:$0xff]  ;;  %v500_v40 = vld [vmem:[%s3753_s30 + $0xab8] sm:$0xff] }
  0xc6   : > { %v1520_v51 = vadd.f32 %v1519_v39, %v474_v24  ;;  %v2314_v53 = vmax.f32 %v2313_v41, %v477_v35  ;;  %v2575_v54 = vmax.f32 %v2574_v42, %v478_v36  ;;  %v1781_v57 = vadd.f32 %v1780_v45, %v475_v25  ;;  %v503_v45 = vld [vmem:[%s3753_s30 + $0xad0] sm:$0xff] }
  0xc7   : > { %v2836_v55 = vmax.f32 %v2835_v43, %v479_v37  ;;  %v3097_v58 = vmax.f32 %v3096_v46, %v480_v44  ;;  %v1260_v62 = vadd.f32 %v1259_v50, %v477_v35  ;;  %v2042_v0 = vadd.f32 %v2041_v52, %v476_v32  ;;  %v498_v32 = vld [vmem:[%s3753_s30 + $0xaa8] sm:$0xff]  ;;  %v501_v43 = vld [vmem:[%s3753_s30 + $0xac0] sm:$0xff]  ;;  %v504_v52 = vld [vmem:[%s3753_s30 + $0xad8] sm:$0xff] }
  0xc8   : > { %v1521_v63 = vadd.f32 %v1520_v51, %v478_v36  ;;  %v2315_v1 = vmax.f32 %v2314_v53, %v481_v47  ;;  %v2576_v2 = vmax.f32 %v2575_v54, %v482_v48  ;;  %v1782_v5 = vadd.f32 %v1781_v57, %v479_v37  ;;  %v507_v57 = vld [vmem:[%s3753_s30 + $0xaf0] sm:$0xff] }
  0xc9   : > { %v2837_v3 = vmax.f32 %v2836_v55, %v483_v49  ;;  %v3098_v6 = vmax.f32 %v3097_v58, %v484_v56  ;;  %v1261_v10 = vadd.f32 %v1260_v62, %v481_v47  ;;  %v2043_v12 = vadd.f32 %v2042_v0, %v480_v44  ;;  %v502_v44 = vld [vmem:[%s3753_s30 + $0xac8] sm:$0xff]  ;;  %v505_v55 = vld [vmem:[%s3753_s30 + $0xae0] sm:$0xff]  ;;  %v508_v0 = vld [vmem:[%s3753_s30 + $0xaf8] sm:$0xff] }
  0xca   : > { %v1522_v11 = vadd.f32 %v1521_v63, %v482_v48  ;;  %v2316_v13 = vmax.f32 %v2315_v1, %v485_v59  ;;  %v2577_v14 = vmax.f32 %v2576_v2, %v486_v60  ;;  %v1783_v17 = vadd.f32 %v1782_v5, %v483_v49  ;;  %v511_v5 = vld [vmem:[%s3753_s30 + $0xb10] sm:$0xff] }
  0xcb   : > { %v2838_v15 = vmax.f32 %v2837_v3, %v487_v61  ;;  %v3099_v18 = vmax.f32 %v3098_v6, %v488_v4  ;;  %v1262_v22 = vadd.f32 %v1261_v10, %v485_v59  ;;  %v2044_v24 = vadd.f32 %v2043_v12, %v484_v56  ;;  %v506_v56 = vld [vmem:[%s3753_s30 + $0xae8] sm:$0xff]  ;;  %v509_v3 = vld [vmem:[%s3753_s30 + $0xb00] sm:$0xff]  ;;  %v512_v12 = vld [vmem:[%s3753_s30 + $0xb18] sm:$0xff] }
  0xcc   : > { %v1523_v23 = vadd.f32 %v1522_v11, %v486_v60  ;;  %v2317_v25 = vmax.f32 %v2316_v13, %v489_v7  ;;  %v2578_v26 = vmax.f32 %v2577_v14, %v490_v8  ;;  %v1784_v29 = vadd.f32 %v1783_v17, %v487_v61  ;;  %v515_v17 = vld [vmem:[%s3753_s30 + $0xb30] sm:$0xff] }
  0xcd   : > { %v2839_v27 = vmax.f32 %v2838_v15, %v491_v9  ;;  %v3100_v30 = vmax.f32 %v3099_v18, %v492_v16  ;;  %v1263_v34 = vadd.f32 %v1262_v22, %v489_v7  ;;  %v2045_v36 = vadd.f32 %v2044_v24, %v488_v4  ;;  %v510_v4 = vld [vmem:[%s3753_s30 + $0xb08] sm:$0xff]  ;;  %v513_v15 = vld [vmem:[%s3753_s30 + $0xb20] sm:$0xff]  ;;  %v516_v24 = vld [vmem:[%s3753_s30 + $0xb38] sm:$0xff] }
  0xce   : > { %v1524_v35 = vadd.f32 %v1523_v23, %v490_v8  ;;  %v2318_v37 = vmax.f32 %v2317_v25, %v493_v19  ;;  %v2579_v38 = vmax.f32 %v2578_v26, %v494_v20  ;;  %v1785_v41 = vadd.f32 %v1784_v29, %v491_v9  ;;  %v519_v29 = vld [vmem:[%s3753_s30 + $0xb50] sm:$0xff] }
  0xcf   : > { %v2840_v39 = vmax.f32 %v2839_v27, %v495_v21  ;;  %v3101_v42 = vmax.f32 %v3100_v30, %v496_v28  ;;  %v1264_v46 = vadd.f32 %v1263_v34, %v493_v19  ;;  %v2046_v48 = vadd.f32 %v2045_v36, %v492_v16  ;;  %v514_v16 = vld [vmem:[%s3753_s30 + $0xb28] sm:$0xff]  ;;  %v517_v27 = vld [vmem:[%s3753_s30 + $0xb40] sm:$0xff]  ;;  %v520_v36 = vld [vmem:[%s3753_s30 + $0xb58] sm:$0xff] }
  0xd0   : > { %v1525_v47 = vadd.f32 %v1524_v35, %v494_v20  ;;  %v2319_v49 = vmax.f32 %v2318_v37, %v497_v31  ;;  %v2580_v50 = vmax.f32 %v2579_v38, %v498_v32  ;;  %v1786_v53 = vadd.f32 %v1785_v41, %v495_v21  ;;  %v523_v41 = vld [vmem:[%s3753_s30 + $0xb70] sm:$0xff] }
  0xd1   : > { %v2841_v51 = vmax.f32 %v2840_v39, %v499_v33  ;;  %v3102_v54 = vmax.f32 %v3101_v42, %v500_v40  ;;  %v1265_v58 = vadd.f32 %v1264_v46, %v497_v31  ;;  %v2047_v60 = vadd.f32 %v2046_v48, %v496_v28  ;;  %v518_v28 = vld [vmem:[%s3753_s30 + $0xb48] sm:$0xff]  ;;  %v521_v39 = vld [vmem:[%s3753_s30 + $0xb60] sm:$0xff]  ;;  %v524_v48 = vld [vmem:[%s3753_s30 + $0xb78] sm:$0xff] }
  0xd2   : > { %v1526_v59 = vadd.f32 %v1525_v47, %v498_v32  ;;  %v2320_v61 = vmax.f32 %v2319_v49, %v501_v43  ;;  %v2581_v62 = vmax.f32 %v2580_v50, %v502_v44  ;;  %v1787_v1 = vadd.f32 %v1786_v53, %v499_v33  ;;  %v527_v53 = vld [vmem:[%s3753_s30 + $0xb90] sm:$0xff] }
  0xd3   : > { %v2842_v63 = vmax.f32 %v2841_v51, %v503_v45  ;;  %v3103_v2 = vmax.f32 %v3102_v54, %v504_v52  ;;  %v1266_v6 = vadd.f32 %v1265_v58, %v501_v43  ;;  %v2048_v8 = vadd.f32 %v2047_v60, %v500_v40  ;;  %v522_v40 = vld [vmem:[%s3753_s30 + $0xb68] sm:$0xff]  ;;  %v525_v51 = vld [vmem:[%s3753_s30 + $0xb80] sm:$0xff]  ;;  %v528_v60 = vld [vmem:[%s3753_s30 + $0xb98] sm:$0xff] }
  0xd4   : > { %v1527_v7 = vadd.f32 %v1526_v59, %v502_v44  ;;  %v2321_v9 = vmax.f32 %v2320_v61, %v505_v55  ;;  %v2582_v10 = vmax.f32 %v2581_v62, %v506_v56  ;;  %v1788_v13 = vadd.f32 %v1787_v1, %v503_v45  ;;  %v531_v1 = vld [vmem:[%s3753_s30 + $0xbb0] sm:$0xff] }
  0xd5   : > { %v2843_v11 = vmax.f32 %v2842_v63, %v507_v57  ;;  %v3104_v14 = vmax.f32 %v3103_v2, %v508_v0  ;;  %v1267_v18 = vadd.f32 %v1266_v6, %v505_v55  ;;  %v2049_v20 = vadd.f32 %v2048_v8, %v504_v52  ;;  %v526_v52 = vld [vmem:[%s3753_s30 + $0xb88] sm:$0xff]  ;;  %v529_v63 = vld [vmem:[%s3753_s30 + $0xba0] sm:$0xff]  ;;  %v532_v8 = vld [vmem:[%s3753_s30 + $0xbb8] sm:$0xff] }
  0xd6   : > { %v1528_v19 = vadd.f32 %v1527_v7, %v506_v56  ;;  %v2322_v21 = vmax.f32 %v2321_v9, %v509_v3  ;;  %v2583_v22 = vmax.f32 %v2582_v10, %v510_v4  ;;  %v1789_v25 = vadd.f32 %v1788_v13, %v507_v57  ;;  %v535_v13 = vld [vmem:[%s3753_s30 + $0xbd0] sm:$0xff] }
  0xd7   : > { %v2844_v23 = vmax.f32 %v2843_v11, %v511_v5  ;;  %v3105_v26 = vmax.f32 %v3104_v14, %v512_v12  ;;  %v1268_v30 = vadd.f32 %v1267_v18, %v509_v3  ;;  %v2050_v32 = vadd.f32 %v2049_v20, %v508_v0  ;;  %v530_v0 = vld [vmem:[%s3753_s30 + $0xba8] sm:$0xff]  ;;  %v533_v11 = vld [vmem:[%s3753_s30 + $0xbc0] sm:$0xff]  ;;  %v536_v20 = vld [vmem:[%s3753_s30 + $0xbd8] sm:$0xff] }
  0xd8   : > { %v1529_v31 = vadd.f32 %v1528_v19, %v510_v4  ;;  %v2323_v33 = vmax.f32 %v2322_v21, %v513_v15  ;;  %v2584_v34 = vmax.f32 %v2583_v22, %v514_v16  ;;  %v1790_v37 = vadd.f32 %v1789_v25, %v511_v5  ;;  %v539_v25 = vld [vmem:[%s3753_s30 + $0xbf0] sm:$0xff] }
  0xd9   : > { %v2845_v35 = vmax.f32 %v2844_v23, %v515_v17  ;;  %v3106_v38 = vmax.f32 %v3105_v26, %v516_v24  ;;  %v1269_v42 = vadd.f32 %v1268_v30, %v513_v15  ;;  %v2051_v44 = vadd.f32 %v2050_v32, %v512_v12  ;;  %v534_v12 = vld [vmem:[%s3753_s30 + $0xbc8] sm:$0xff]  ;;  %v537_v23 = vld [vmem:[%s3753_s30 + $0xbe0] sm:$0xff]  ;;  %v540_v32 = vld [vmem:[%s3753_s30 + $0xbf8] sm:$0xff] }
  0xda   : > { %v1530_v43 = vadd.f32 %v1529_v31, %v514_v16  ;;  %v2324_v45 = vmax.f32 %v2323_v33, %v517_v27  ;;  %v2585_v46 = vmax.f32 %v2584_v34, %v518_v28  ;;  %v1791_v49 = vadd.f32 %v1790_v37, %v515_v17  ;;  %v543_v37 = vld [vmem:[%s3753_s30 + $0xc10] sm:$0xff] }
  0xdb   : > { %v2846_v47 = vmax.f32 %v2845_v35, %v519_v29  ;;  %v3107_v50 = vmax.f32 %v3106_v38, %v520_v36  ;;  %v1270_v54 = vadd.f32 %v1269_v42, %v517_v27  ;;  %v2052_v56 = vadd.f32 %v2051_v44, %v516_v24  ;;  %v538_v24 = vld [vmem:[%s3753_s30 + $0xbe8] sm:$0xff]  ;;  %v541_v35 = vld [vmem:[%s3753_s30 + $0xc00] sm:$0xff]  ;;  %v544_v44 = vld [vmem:[%s3753_s30 + $0xc18] sm:$0xff] }
  0xdc   : > { %v1531_v55 = vadd.f32 %v1530_v43, %v518_v28  ;;  %v2325_v57 = vmax.f32 %v2324_v45, %v521_v39  ;;  %v2586_v58 = vmax.f32 %v2585_v46, %v522_v40  ;;  %v1792_v61 = vadd.f32 %v1791_v49, %v519_v29  ;;  %v547_v49 = vld [vmem:[%s3753_s30 + $0xc30] sm:$0xff] }
  0xdd   : > { %v2847_v59 = vmax.f32 %v2846_v47, %v523_v41  ;;  %v3108_v62 = vmax.f32 %v3107_v50, %v524_v48  ;;  %v1271_v2 = vadd.f32 %v1270_v54, %v521_v39  ;;  %v2053_v4 = vadd.f32 %v2052_v56, %v520_v36  ;;  %v542_v36 = vld [vmem:[%s3753_s30 + $0xc08] sm:$0xff]  ;;  %v545_v47 = vld [vmem:[%s3753_s30 + $0xc20] sm:$0xff]  ;;  %v548_v56 = vld [vmem:[%s3753_s30 + $0xc38] sm:$0xff] }
  0xde   : > { %v1532_v3 = vadd.f32 %v1531_v55, %v522_v40  ;;  %v2326_v5 = vmax.f32 %v2325_v57, %v525_v51  ;;  %v2587_v6 = vmax.f32 %v2586_v58, %v526_v52  ;;  %v1793_v9 = vadd.f32 %v1792_v61, %v523_v41  ;;  %v551_v61 = vld [vmem:[%s3753_s30 + $0xc50] sm:$0xff] }
  0xdf   : > { %v2848_v7 = vmax.f32 %v2847_v59, %v527_v53  ;;  %v3109_v10 = vmax.f32 %v3108_v62, %v528_v60  ;;  %v1272_v14 = vadd.f32 %v1271_v2, %v525_v51  ;;  %v2054_v16 = vadd.f32 %v2053_v4, %v524_v48  ;;  %v546_v48 = vld [vmem:[%s3753_s30 + $0xc28] sm:$0xff]  ;;  %v549_v59 = vld [vmem:[%s3753_s30 + $0xc40] sm:$0xff]  ;;  %v552_v4 = vld [vmem:[%s3753_s30 + $0xc58] sm:$0xff] }
  0xe0   : > { %v1533_v15 = vadd.f32 %v1532_v3, %v526_v52  ;;  %v2327_v17 = vmax.f32 %v2326_v5, %v529_v63  ;;  %v2588_v18 = vmax.f32 %v2587_v6, %v530_v0  ;;  %v1794_v21 = vadd.f32 %v1793_v9, %v527_v53  ;;  %v555_v9 = vld [vmem:[%s3753_s30 + $0xc70] sm:$0xff] }
  0xe1   : > { %v2849_v19 = vmax.f32 %v2848_v7, %v531_v1  ;;  %v3110_v22 = vmax.f32 %v3109_v10, %v532_v8  ;;  %v1273_v26 = vadd.f32 %v1272_v14, %v529_v63  ;;  %v2055_v28 = vadd.f32 %v2054_v16, %v528_v60  ;;  %v550_v60 = vld [vmem:[%s3753_s30 + $0xc48] sm:$0xff]  ;;  %v553_v7 = vld [vmem:[%s3753_s30 + $0xc60] sm:$0xff]  ;;  %v556_v16 = vld [vmem:[%s3753_s30 + $0xc78] sm:$0xff] }
  0xe2   : > { %v1534_v27 = vadd.f32 %v1533_v15, %v530_v0  ;;  %v2328_v29 = vmax.f32 %v2327_v17, %v533_v11  ;;  %v2589_v30 = vmax.f32 %v2588_v18, %v534_v12  ;;  %v1795_v33 = vadd.f32 %v1794_v21, %v531_v1  ;;  %v559_v21 = vld [vmem:[%s3753_s30 + $0xc90] sm:$0xff] }
  0xe3   : > { %v2850_v31 = vmax.f32 %v2849_v19, %v535_v13  ;;  %v3111_v34 = vmax.f32 %v3110_v22, %v536_v20  ;;  %v1274_v38 = vadd.f32 %v1273_v26, %v533_v11  ;;  %v2056_v40 = vadd.f32 %v2055_v28, %v532_v8  ;;  %v554_v8 = vld [vmem:[%s3753_s30 + $0xc68] sm:$0xff]  ;;  %v557_v19 = vld [vmem:[%s3753_s30 + $0xc80] sm:$0xff]  ;;  %v560_v28 = vld [vmem:[%s3753_s30 + $0xc98] sm:$0xff] }
  0xe4   : > { %v1535_v39 = vadd.f32 %v1534_v27, %v534_v12  ;;  %v2329_v41 = vmax.f32 %v2328_v29, %v537_v23  ;;  %v2590_v42 = vmax.f32 %v2589_v30, %v538_v24  ;;  %v1796_v45 = vadd.f32 %v1795_v33, %v535_v13  ;;  %v563_v33 = vld [vmem:[%s3753_s30 + $0xcb0] sm:$0xff] }
  0xe5   : > { %v2851_v43 = vmax.f32 %v2850_v31, %v539_v25  ;;  %v3112_v46 = vmax.f32 %v3111_v34, %v540_v32  ;;  %v1275_v50 = vadd.f32 %v1274_v38, %v537_v23  ;;  %v2057_v52 = vadd.f32 %v2056_v40, %v536_v20  ;;  %v558_v20 = vld [vmem:[%s3753_s30 + $0xc88] sm:$0xff]  ;;  %v561_v31 = vld [vmem:[%s3753_s30 + $0xca0] sm:$0xff]  ;;  %v564_v40 = vld [vmem:[%s3753_s30 + $0xcb8] sm:$0xff] }
  0xe6   : > { %v1536_v51 = vadd.f32 %v1535_v39, %v538_v24  ;;  %v2330_v53 = vmax.f32 %v2329_v41, %v541_v35  ;;  %v2591_v54 = vmax.f32 %v2590_v42, %v542_v36  ;;  %v1797_v57 = vadd.f32 %v1796_v45, %v539_v25  ;;  %v567_v45 = vld [vmem:[%s3753_s30 + $0xcd0] sm:$0xff] }
  0xe7   : > { %v2852_v55 = vmax.f32 %v2851_v43, %v543_v37  ;;  %v3113_v58 = vmax.f32 %v3112_v46, %v544_v44  ;;  %v1276_v62 = vadd.f32 %v1275_v50, %v541_v35  ;;  %v2058_v0 = vadd.f32 %v2057_v52, %v540_v32  ;;  %v562_v32 = vld [vmem:[%s3753_s30 + $0xca8] sm:$0xff]  ;;  %v565_v43 = vld [vmem:[%s3753_s30 + $0xcc0] sm:$0xff]  ;;  %v568_v52 = vld [vmem:[%s3753_s30 + $0xcd8] sm:$0xff] }
  0xe8   : > { %v1537_v63 = vadd.f32 %v1536_v51, %v542_v36  ;;  %v2331_v1 = vmax.f32 %v2330_v53, %v545_v47  ;;  %v2592_v2 = vmax.f32 %v2591_v54, %v546_v48  ;;  %v1798_v5 = vadd.f32 %v1797_v57, %v543_v37  ;;  %v571_v57 = vld [vmem:[%s3753_s30 + $0xcf0] sm:$0xff] }
  0xe9   : > { %v2853_v3 = vmax.f32 %v2852_v55, %v547_v49  ;;  %v3114_v6 = vmax.f32 %v3113_v58, %v548_v56  ;;  %v1277_v10 = vadd.f32 %v1276_v62, %v545_v47  ;;  %v2059_v12 = vadd.f32 %v2058_v0, %v544_v44  ;;  %v566_v44 = vld [vmem:[%s3753_s30 + $0xcc8] sm:$0xff]  ;;  %v569_v55 = vld [vmem:[%s3753_s30 + $0xce0] sm:$0xff]  ;;  %v572_v0 = vld [vmem:[%s3753_s30 + $0xcf8] sm:$0xff] }
  0xea   : > { %v1538_v11 = vadd.f32 %v1537_v63, %v546_v48  ;;  %v2332_v13 = vmax.f32 %v2331_v1, %v549_v59  ;;  %v2593_v14 = vmax.f32 %v2592_v2, %v550_v60  ;;  %v1799_v17 = vadd.f32 %v1798_v5, %v547_v49  ;;  %v575_v5 = vld [vmem:[%s3753_s30 + $0xd10] sm:$0xff] }
  0xeb   : > { %v2854_v15 = vmax.f32 %v2853_v3, %v551_v61  ;;  %v3115_v18 = vmax.f32 %v3114_v6, %v552_v4  ;;  %v1278_v22 = vadd.f32 %v1277_v10, %v549_v59  ;;  %v2060_v24 = vadd.f32 %v2059_v12, %v548_v56  ;;  %v570_v56 = vld [vmem:[%s3753_s30 + $0xce8] sm:$0xff]  ;;  %v573_v3 = vld [vmem:[%s3753_s30 + $0xd00] sm:$0xff]  ;;  %v576_v12 = vld [vmem:[%s3753_s30 + $0xd18] sm:$0xff] }
  0xec   : > { %v1539_v23 = vadd.f32 %v1538_v11, %v550_v60  ;;  %v2333_v25 = vmax.f32 %v2332_v13, %v553_v7  ;;  %v2594_v26 = vmax.f32 %v2593_v14, %v554_v8  ;;  %v1800_v29 = vadd.f32 %v1799_v17, %v551_v61  ;;  %v579_v17 = vld [vmem:[%s3753_s30 + $0xd30] sm:$0xff] }
  0xed   : > { %v2855_v27 = vmax.f32 %v2854_v15, %v555_v9  ;;  %v3116_v30 = vmax.f32 %v3115_v18, %v556_v16  ;;  %v1279_v34 = vadd.f32 %v1278_v22, %v553_v7  ;;  %v2061_v36 = vadd.f32 %v2060_v24, %v552_v4  ;;  %v574_v4 = vld [vmem:[%s3753_s30 + $0xd08] sm:$0xff]  ;;  %v577_v15 = vld [vmem:[%s3753_s30 + $0xd20] sm:$0xff]  ;;  %v580_v24 = vld [vmem:[%s3753_s30 + $0xd38] sm:$0xff] }
  0xee   : > { %v1540_v35 = vadd.f32 %v1539_v23, %v554_v8  ;;  %v2334_v37 = vmax.f32 %v2333_v25, %v557_v19  ;;  %v2595_v38 = vmax.f32 %v2594_v26, %v558_v20  ;;  %v1801_v41 = vadd.f32 %v1800_v29, %v555_v9  ;;  %v583_v29 = vld [vmem:[%s3753_s30 + $0xd50] sm:$0xff] }
  0xef   : > { %v2856_v39 = vmax.f32 %v2855_v27, %v559_v21  ;;  %v3117_v42 = vmax.f32 %v3116_v30, %v560_v28  ;;  %v1280_v46 = vadd.f32 %v1279_v34, %v557_v19  ;;  %v2062_v48 = vadd.f32 %v2061_v36, %v556_v16  ;;  %v578_v16 = vld [vmem:[%s3753_s30 + $0xd28] sm:$0xff]  ;;  %v581_v27 = vld [vmem:[%s3753_s30 + $0xd40] sm:$0xff]  ;;  %v584_v36 = vld [vmem:[%s3753_s30 + $0xd58] sm:$0xff] }
  0xf0   : > { %v1541_v47 = vadd.f32 %v1540_v35, %v558_v20  ;;  %v2335_v49 = vmax.f32 %v2334_v37, %v561_v31  ;;  %v2596_v50 = vmax.f32 %v2595_v38, %v562_v32  ;;  %v1802_v53 = vadd.f32 %v1801_v41, %v559_v21  ;;  %v587_v41 = vld [vmem:[%s3753_s30 + $0xd70] sm:$0xff] }
  0xf1   : > { %v2857_v51 = vmax.f32 %v2856_v39, %v563_v33  ;;  %v3118_v54 = vmax.f32 %v3117_v42, %v564_v40  ;;  %v1281_v58 = vadd.f32 %v1280_v46, %v561_v31  ;;  %v2063_v60 = vadd.f32 %v2062_v48, %v560_v28  ;;  %v582_v28 = vld [vmem:[%s3753_s30 + $0xd48] sm:$0xff]  ;;  %v585_v39 = vld [vmem:[%s3753_s30 + $0xd60] sm:$0xff]  ;;  %v588_v48 = vld [vmem:[%s3753_s30 + $0xd78] sm:$0xff] }
  0xf2   : > { %v1542_v59 = vadd.f32 %v1541_v47, %v562_v32  ;;  %v2336_v61 = vmax.f32 %v2335_v49, %v565_v43  ;;  %v2597_v62 = vmax.f32 %v2596_v50, %v566_v44  ;;  %v1803_v1 = vadd.f32 %v1802_v53, %v563_v33  ;;  %v591_v53 = vld [vmem:[%s3753_s30 + $0xd90] sm:$0xff] }
  0xf3   : > { %v2858_v63 = vmax.f32 %v2857_v51, %v567_v45  ;;  %v3119_v2 = vmax.f32 %v3118_v54, %v568_v52  ;;  %v1282_v6 = vadd.f32 %v1281_v58, %v565_v43  ;;  %v2064_v8 = vadd.f32 %v2063_v60, %v564_v40  ;;  %v586_v40 = vld [vmem:[%s3753_s30 + $0xd68] sm:$0xff]  ;;  %v589_v51 = vld [vmem:[%s3753_s30 + $0xd80] sm:$0xff]  ;;  %v592_v60 = vld [vmem:[%s3753_s30 + $0xd98] sm:$0xff] }
  0xf4   : > { %v1543_v7 = vadd.f32 %v1542_v59, %v566_v44  ;;  %v2337_v9 = vmax.f32 %v2336_v61, %v569_v55  ;;  %v2598_v10 = vmax.f32 %v2597_v62, %v570_v56  ;;  %v1804_v13 = vadd.f32 %v1803_v1, %v567_v45  ;;  %v595_v1 = vld [vmem:[%s3753_s30 + $0xdb0] sm:$0xff] }
  0xf5   : > { %v2859_v11 = vmax.f32 %v2858_v63, %v571_v57  ;;  %v3120_v14 = vmax.f32 %v3119_v2, %v572_v0  ;;  %v1283_v18 = vadd.f32 %v1282_v6, %v569_v55  ;;  %v2065_v20 = vadd.f32 %v2064_v8, %v568_v52  ;;  %v590_v52 = vld [vmem:[%s3753_s30 + $0xd88] sm:$0xff]  ;;  %v593_v63 = vld [vmem:[%s3753_s30 + $0xda0] sm:$0xff]  ;;  %v596_v8 = vld [vmem:[%s3753_s30 + $0xdb8] sm:$0xff] }
  0xf6   : > { %v1544_v19 = vadd.f32 %v1543_v7, %v570_v56  ;;  %v2338_v21 = vmax.f32 %v2337_v9, %v573_v3  ;;  %v2599_v22 = vmax.f32 %v2598_v10, %v574_v4  ;;  %v1805_v25 = vadd.f32 %v1804_v13, %v571_v57  ;;  %v599_v13 = vld [vmem:[%s3753_s30 + $0xdd0] sm:$0xff] }
  0xf7   : > { %v2860_v23 = vmax.f32 %v2859_v11, %v575_v5  ;;  %v3121_v26 = vmax.f32 %v3120_v14, %v576_v12  ;;  %v1284_v30 = vadd.f32 %v1283_v18, %v573_v3  ;;  %v2066_v32 = vadd.f32 %v2065_v20, %v572_v0  ;;  %v594_v0 = vld [vmem:[%s3753_s30 + $0xda8] sm:$0xff]  ;;  %v597_v11 = vld [vmem:[%s3753_s30 + $0xdc0] sm:$0xff]  ;;  %v600_v20 = vld [vmem:[%s3753_s30 + $0xdd8] sm:$0xff] }
  0xf8   : > { %v1545_v31 = vadd.f32 %v1544_v19, %v574_v4  ;;  %v2339_v33 = vmax.f32 %v2338_v21, %v577_v15  ;;  %v2600_v34 = vmax.f32 %v2599_v22, %v578_v16  ;;  %v1806_v37 = vadd.f32 %v1805_v25, %v575_v5  ;;  %v603_v25 = vld [vmem:[%s3753_s30 + $0xdf0] sm:$0xff] }
  0xf9   : > { %v2861_v35 = vmax.f32 %v2860_v23, %v579_v17  ;;  %v3122_v38 = vmax.f32 %v3121_v26, %v580_v24  ;;  %v1285_v42 = vadd.f32 %v1284_v30, %v577_v15  ;;  %v2067_v44 = vadd.f32 %v2066_v32, %v576_v12  ;;  %v598_v12 = vld [vmem:[%s3753_s30 + $0xdc8] sm:$0xff]  ;;  %v601_v23 = vld [vmem:[%s3753_s30 + $0xde0] sm:$0xff]  ;;  %v604_v32 = vld [vmem:[%s3753_s30 + $0xdf8] sm:$0xff] }
  0xfa   : > { %v1546_v43 = vadd.f32 %v1545_v31, %v578_v16  ;;  %v2340_v45 = vmax.f32 %v2339_v33, %v581_v27  ;;  %v2601_v46 = vmax.f32 %v2600_v34, %v582_v28  ;;  %v1807_v49 = vadd.f32 %v1806_v37, %v579_v17  ;;  %v607_v37 = vld [vmem:[%s3753_s30 + $0xe10] sm:$0xff] }
  0xfb   : > { %v2862_v47 = vmax.f32 %v2861_v35, %v583_v29  ;;  %v3123_v50 = vmax.f32 %v3122_v38, %v584_v36  ;;  %v1286_v54 = vadd.f32 %v1285_v42, %v581_v27  ;;  %v2068_v56 = vadd.f32 %v2067_v44, %v580_v24  ;;  %v602_v24 = vld [vmem:[%s3753_s30 + $0xde8] sm:$0xff]  ;;  %v605_v35 = vld [vmem:[%s3753_s30 + $0xe00] sm:$0xff]  ;;  %v608_v44 = vld [vmem:[%s3753_s30 + $0xe18] sm:$0xff] }
  0xfc   : > { %v1547_v55 = vadd.f32 %v1546_v43, %v582_v28  ;;  %v2341_v57 = vmax.f32 %v2340_v45, %v585_v39  ;;  %v2602_v58 = vmax.f32 %v2601_v46, %v586_v40  ;;  %v1808_v61 = vadd.f32 %v1807_v49, %v583_v29  ;;  %v611_v49 = vld [vmem:[%s3753_s30 + $0xe30] sm:$0xff] }
  0xfd   : > { %v2863_v59 = vmax.f32 %v2862_v47, %v587_v41  ;;  %v3124_v62 = vmax.f32 %v3123_v50, %v588_v48  ;;  %v1287_v2 = vadd.f32 %v1286_v54, %v585_v39  ;;  %v2069_v4 = vadd.f32 %v2068_v56, %v584_v36  ;;  %v606_v36 = vld [vmem:[%s3753_s30 + $0xe08] sm:$0xff]  ;;  %v609_v47 = vld [vmem:[%s3753_s30 + $0xe20] sm:$0xff]  ;;  %v612_v56 = vld [vmem:[%s3753_s30 + $0xe38] sm:$0xff] }
  0xfe   : > { %v1548_v3 = vadd.f32 %v1547_v55, %v586_v40  ;;  %v2342_v5 = vmax.f32 %v2341_v57, %v589_v51  ;;  %v2603_v6 = vmax.f32 %v2602_v58, %v590_v52  ;;  %v1809_v9 = vadd.f32 %v1808_v61, %v587_v41  ;;  %v615_v61 = vld [vmem:[%s3753_s30 + $0xe50] sm:$0xff] }
  0xff   : > { %v2864_v7 = vmax.f32 %v2863_v59, %v591_v53  ;;  %v3125_v10 = vmax.f32 %v3124_v62, %v592_v60  ;;  %v1288_v14 = vadd.f32 %v1287_v2, %v589_v51  ;;  %v2070_v16 = vadd.f32 %v2069_v4, %v588_v48  ;;  %v610_v48 = vld [vmem:[%s3753_s30 + $0xe28] sm:$0xff]  ;;  %v613_v59 = vld [vmem:[%s3753_s30 + $0xe40] sm:$0xff]  ;;  %v616_v4 = vld [vmem:[%s3753_s30 + $0xe58] sm:$0xff] }
 0x100   : > { %v1549_v15 = vadd.f32 %v1548_v3, %v590_v52  ;;  %v2343_v17 = vmax.f32 %v2342_v5, %v593_v63  ;;  %v2604_v18 = vmax.f32 %v2603_v6, %v594_v0  ;;  %v1810_v21 = vadd.f32 %v1809_v9, %v591_v53  ;;  %v619_v9 = vld [vmem:[%s3753_s30 + $0xe70] sm:$0xff] }
 0x101   : > { %v2865_v19 = vmax.f32 %v2864_v7, %v595_v1  ;;  %v3126_v22 = vmax.f32 %v3125_v10, %v596_v8  ;;  %v1289_v26 = vadd.f32 %v1288_v14, %v593_v63  ;;  %v2071_v28 = vadd.f32 %v2070_v16, %v592_v60  ;;  %v614_v60 = vld [vmem:[%s3753_s30 + $0xe48] sm:$0xff]  ;;  %v617_v7 = vld [vmem:[%s3753_s30 + $0xe60] sm:$0xff]  ;;  %v620_v16 = vld [vmem:[%s3753_s30 + $0xe78] sm:$0xff] }
 0x102   : > { %v1550_v27 = vadd.f32 %v1549_v15, %v594_v0  ;;  %v2344_v29 = vmax.f32 %v2343_v17, %v597_v11  ;;  %v2605_v30 = vmax.f32 %v2604_v18, %v598_v12  ;;  %v1811_v33 = vadd.f32 %v1810_v21, %v595_v1  ;;  %v623_v21 = vld [vmem:[%s3753_s30 + $0xe90] sm:$0xff] }
 0x103   : > { %v2866_v31 = vmax.f32 %v2865_v19, %v599_v13  ;;  %v3127_v34 = vmax.f32 %v3126_v22, %v600_v20  ;;  %v1290_v38 = vadd.f32 %v1289_v26, %v597_v11  ;;  %v2072_v40 = vadd.f32 %v2071_v28, %v596_v8  ;;  %v618_v8 = vld [vmem:[%s3753_s30 + $0xe68] sm:$0xff]  ;;  %v621_v19 = vld [vmem:[%s3753_s30 + $0xe80] sm:$0xff]  ;;  %v624_v28 = vld [vmem:[%s3753_s30 + $0xe98] sm:$0xff] }
 0x104   : > { %v1551_v39 = vadd.f32 %v1550_v27, %v598_v12  ;;  %v2345_v41 = vmax.f32 %v2344_v29, %v601_v23  ;;  %v2606_v42 = vmax.f32 %v2605_v30, %v602_v24  ;;  %v1812_v45 = vadd.f32 %v1811_v33, %v599_v13  ;;  %v627_v33 = vld [vmem:[%s3753_s30 + $0xeb0] sm:$0xff] }
 0x105   : > { %v2867_v43 = vmax.f32 %v2866_v31, %v603_v25  ;;  %v3128_v46 = vmax.f32 %v3127_v34, %v604_v32  ;;  %v1291_v50 = vadd.f32 %v1290_v38, %v601_v23  ;;  %v2073_v52 = vadd.f32 %v2072_v40, %v600_v20  ;;  %v622_v20 = vld [vmem:[%s3753_s30 + $0xe88] sm:$0xff]  ;;  %v625_v31 = vld [vmem:[%s3753_s30 + $0xea0] sm:$0xff]  ;;  %v628_v40 = vld [vmem:[%s3753_s30 + $0xeb8] sm:$0xff] }
 0x106   : > { %v1552_v51 = vadd.f32 %v1551_v39, %v602_v24  ;;  %v2346_v53 = vmax.f32 %v2345_v41, %v605_v35  ;;  %v2607_v54 = vmax.f32 %v2606_v42, %v606_v36  ;;  %v1813_v57 = vadd.f32 %v1812_v45, %v603_v25  ;;  %v631_v45 = vld [vmem:[%s3753_s30 + $0xed0] sm:$0xff] }
 0x107   : > { %v2868_v55 = vmax.f32 %v2867_v43, %v607_v37  ;;  %v3129_v58 = vmax.f32 %v3128_v46, %v608_v44  ;;  %v1292_v62 = vadd.f32 %v1291_v50, %v605_v35  ;;  %v2074_v0 = vadd.f32 %v2073_v52, %v604_v32  ;;  %v626_v32 = vld [vmem:[%s3753_s30 + $0xea8] sm:$0xff]  ;;  %v629_v43 = vld [vmem:[%s3753_s30 + $0xec0] sm:$0xff]  ;;  %v632_v52 = vld [vmem:[%s3753_s30 + $0xed8] sm:$0xff] }
 0x108   : > { %v1553_v63 = vadd.f32 %v1552_v51, %v606_v36  ;;  %v2347_v1 = vmax.f32 %v2346_v53, %v609_v47  ;;  %v2608_v2 = vmax.f32 %v2607_v54, %v610_v48  ;;  %v1814_v5 = vadd.f32 %v1813_v57, %v607_v37  ;;  %v635_v57 = vld [vmem:[%s3753_s30 + $0xef0] sm:$0xff] }
 0x109   : > { %v2869_v3 = vmax.f32 %v2868_v55, %v611_v49  ;;  %v3130_v6 = vmax.f32 %v3129_v58, %v612_v56  ;;  %v1293_v10 = vadd.f32 %v1292_v62, %v609_v47  ;;  %v2075_v12 = vadd.f32 %v2074_v0, %v608_v44  ;;  %v630_v44 = vld [vmem:[%s3753_s30 + $0xec8] sm:$0xff]  ;;  %v633_v55 = vld [vmem:[%s3753_s30 + $0xee0] sm:$0xff]  ;;  %v636_v0 = vld [vmem:[%s3753_s30 + $0xef8] sm:$0xff] }
 0x10a   : > { %v1554_v11 = vadd.f32 %v1553_v63, %v610_v48  ;;  %v2348_v13 = vmax.f32 %v2347_v1, %v613_v59  ;;  %v2609_v14 = vmax.f32 %v2608_v2, %v614_v60  ;;  %v1815_v17 = vadd.f32 %v1814_v5, %v611_v49  ;;  %v639_v5 = vld [vmem:[%s3753_s30 + $0xf10] sm:$0xff] }
 0x10b   : > { %v2870_v15 = vmax.f32 %v2869_v3, %v615_v61  ;;  %v3131_v18 = vmax.f32 %v3130_v6, %v616_v4  ;;  %v1294_v22 = vadd.f32 %v1293_v10, %v613_v59  ;;  %v2076_v24 = vadd.f32 %v2075_v12, %v612_v56  ;;  %v634_v56 = vld [vmem:[%s3753_s30 + $0xee8] sm:$0xff]  ;;  %v637_v3 = vld [vmem:[%s3753_s30 + $0xf00] sm:$0xff]  ;;  %v640_v12 = vld [vmem:[%s3753_s30 + $0xf18] sm:$0xff] }
 0x10c   : > { %v1555_v23 = vadd.f32 %v1554_v11, %v614_v60  ;;  %v2349_v25 = vmax.f32 %v2348_v13, %v617_v7  ;;  %v2610_v26 = vmax.f32 %v2609_v14, %v618_v8  ;;  %v1816_v29 = vadd.f32 %v1815_v17, %v615_v61  ;;  %v643_v17 = vld [vmem:[%s3753_s30 + $0xf30] sm:$0xff] }
 0x10d   : > { %v2871_v27 = vmax.f32 %v2870_v15, %v619_v9  ;;  %v3132_v30 = vmax.f32 %v3131_v18, %v620_v16  ;;  %v1295_v34 = vadd.f32 %v1294_v22, %v617_v7  ;;  %v2077_v36 = vadd.f32 %v2076_v24, %v616_v4  ;;  %v638_v4 = vld [vmem:[%s3753_s30 + $0xf08] sm:$0xff]  ;;  %v641_v15 = vld [vmem:[%s3753_s30 + $0xf20] sm:$0xff]  ;;  %v644_v24 = vld [vmem:[%s3753_s30 + $0xf38] sm:$0xff] }
 0x10e   : > { %v1556_v35 = vadd.f32 %v1555_v23, %v618_v8  ;;  %v2350_v37 = vmax.f32 %v2349_v25, %v621_v19  ;;  %v2611_v38 = vmax.f32 %v2610_v26, %v622_v20  ;;  %v1817_v41 = vadd.f32 %v1816_v29, %v619_v9  ;;  %v647_v29 = vld [vmem:[%s3753_s30 + $0xf50] sm:$0xff] }
 0x10f   : > { %v2872_v39 = vmax.f32 %v2871_v27, %v623_v21  ;;  %v3133_v42 = vmax.f32 %v3132_v30, %v624_v28  ;;  %v1296_v46 = vadd.f32 %v1295_v34, %v621_v19  ;;  %v2078_v48 = vadd.f32 %v2077_v36, %v620_v16  ;;  %v642_v16 = vld [vmem:[%s3753_s30 + $0xf28] sm:$0xff]  ;;  %v645_v27 = vld [vmem:[%s3753_s30 + $0xf40] sm:$0xff]  ;;  %v648_v36 = vld [vmem:[%s3753_s30 + $0xf58] sm:$0xff] }
 0x110   : > { %v1557_v47 = vadd.f32 %v1556_v35, %v622_v20  ;;  %v2351_v49 = vmax.f32 %v2350_v37, %v625_v31  ;;  %v2612_v50 = vmax.f32 %v2611_v38, %v626_v32  ;;  %v1818_v53 = vadd.f32 %v1817_v41, %v623_v21  ;;  %v651_v41 = vld [vmem:[%s3753_s30 + $0xf70] sm:$0xff] }
 0x111   : > { %v2873_v51 = vmax.f32 %v2872_v39, %v627_v33  ;;  %v3134_v54 = vmax.f32 %v3133_v42, %v628_v40  ;;  %v1297_v58 = vadd.f32 %v1296_v46, %v625_v31  ;;  %v2079_v60 = vadd.f32 %v2078_v48, %v624_v28  ;;  %v646_v28 = vld [vmem:[%s3753_s30 + $0xf48] sm:$0xff]  ;;  %v649_v39 = vld [vmem:[%s3753_s30 + $0xf60] sm:$0xff]  ;;  %v652_v48 = vld [vmem:[%s3753_s30 + $0xf78] sm:$0xff] }
 0x112   : > { %v1558_v59 = vadd.f32 %v1557_v47, %v626_v32  ;;  %v2352_v61 = vmax.f32 %v2351_v49, %v629_v43  ;;  %v2613_v62 = vmax.f32 %v2612_v50, %v630_v44  ;;  %v1819_v1 = vadd.f32 %v1818_v53, %v627_v33  ;;  %v655_v53 = vld [vmem:[%s3753_s30 + $0xf90] sm:$0xff] }
 0x113   : > { %v2874_v63 = vmax.f32 %v2873_v51, %v631_v45  ;;  %v3135_v2 = vmax.f32 %v3134_v54, %v632_v52  ;;  %v1298_v6 = vadd.f32 %v1297_v58, %v629_v43  ;;  %v2080_v8 = vadd.f32 %v2079_v60, %v628_v40  ;;  %v650_v40 = vld [vmem:[%s3753_s30 + $0xf68] sm:$0xff]  ;;  %v653_v51 = vld [vmem:[%s3753_s30 + $0xf80] sm:$0xff]  ;;  %v656_v60 = vld [vmem:[%s3753_s30 + $0xf98] sm:$0xff] }
 0x114   : > { %v1559_v7 = vadd.f32 %v1558_v59, %v630_v44  ;;  %v2353_v9 = vmax.f32 %v2352_v61, %v633_v55  ;;  %v2614_v10 = vmax.f32 %v2613_v62, %v634_v56  ;;  %v1820_v13 = vadd.f32 %v1819_v1, %v631_v45  ;;  %v659_v1 = vld [vmem:[%s3753_s30 + $0xfb0] sm:$0xff] }
 0x115   : > { %v2875_v11 = vmax.f32 %v2874_v63, %v635_v57  ;;  %v3136_v14 = vmax.f32 %v3135_v2, %v636_v0  ;;  %v1299_v18 = vadd.f32 %v1298_v6, %v633_v55  ;;  %v2081_v20 = vadd.f32 %v2080_v8, %v632_v52  ;;  %v654_v52 = vld [vmem:[%s3753_s30 + $0xf88] sm:$0xff]  ;;  %v657_v63 = vld [vmem:[%s3753_s30 + $0xfa0] sm:$0xff]  ;;  %v660_v8 = vld [vmem:[%s3753_s30 + $0xfb8] sm:$0xff] }
 0x116   : > { %v1560_v19 = vadd.f32 %v1559_v7, %v634_v56  ;;  %v2354_v21 = vmax.f32 %v2353_v9, %v637_v3  ;;  %v2615_v22 = vmax.f32 %v2614_v10, %v638_v4  ;;  %v1821_v25 = vadd.f32 %v1820_v13, %v635_v57  ;;  %v663_v13 = vld [vmem:[%s3753_s30 + $0xfd0] sm:$0xff] }
 0x117   : > { %v2876_v23 = vmax.f32 %v2875_v11, %v639_v5  ;;  %v3137_v26 = vmax.f32 %v3136_v14, %v640_v12  ;;  %v1300_v30 = vadd.f32 %v1299_v18, %v637_v3  ;;  %v2082_v32 = vadd.f32 %v2081_v20, %v636_v0  ;;  %v658_v0 = vld [vmem:[%s3753_s30 + $0xfa8] sm:$0xff]  ;;  %v661_v11 = vld [vmem:[%s3753_s30 + $0xfc0] sm:$0xff]  ;;  %v664_v20 = vld [vmem:[%s3753_s30 + $0xfd8] sm:$0xff] }
 0x118   : > { %v1561_v31 = vadd.f32 %v1560_v19, %v638_v4  ;;  %v2355_v33 = vmax.f32 %v2354_v21, %v641_v15  ;;  %v2616_v34 = vmax.f32 %v2615_v22, %v642_v16  ;;  %v1822_v37 = vadd.f32 %v1821_v25, %v639_v5  ;;  %v667_v25 = vld [vmem:[%s3753_s30 + $0xff0] sm:$0xff] }
 0x119   : > { %v2877_v35 = vmax.f32 %v2876_v23, %v643_v17  ;;  %v3138_v38 = vmax.f32 %v3137_v26, %v644_v24  ;;  %v1301_v42 = vadd.f32 %v1300_v30, %v641_v15  ;;  %v2083_v44 = vadd.f32 %v2082_v32, %v640_v12  ;;  %v662_v12 = vld [vmem:[%s3753_s30 + $0xfc8] sm:$0xff]  ;;  %v665_v23 = vld [vmem:[%s3753_s30 + $0xfe0] sm:$0xff]  ;;  %v668_v32 = vld [vmem:[%s3753_s30 + $0xff8] sm:$0xff] }
 0x11a   : > { %v1562_v43 = vadd.f32 %v1561_v31, %v642_v16  ;;  %v2356_v45 = vmax.f32 %v2355_v33, %v645_v27  ;;  %v2617_v46 = vmax.f32 %v2616_v34, %v646_v28  ;;  %v1823_v49 = vadd.f32 %v1822_v37, %v643_v17  ;;  %v671_v37 = vld [vmem:[%s3753_s30 + $0x1010] sm:$0xff] }
 0x11b   : > { %v2878_v47 = vmax.f32 %v2877_v35, %v647_v29  ;;  %v3139_v50 = vmax.f32 %v3138_v38, %v648_v36  ;;  %v1302_v54 = vadd.f32 %v1301_v42, %v645_v27  ;;  %v2084_v56 = vadd.f32 %v2083_v44, %v644_v24  ;;  %v666_v24 = vld [vmem:[%s3753_s30 + $0xfe8] sm:$0xff]  ;;  %v669_v35 = vld [vmem:[%s3753_s30 + $0x1000] sm:$0xff]  ;;  %v672_v44 = vld [vmem:[%s3753_s30 + $0x1018] sm:$0xff] }
 0x11c   : > { %v1563_v55 = vadd.f32 %v1562_v43, %v646_v28  ;;  %v2357_v57 = vmax.f32 %v2356_v45, %v649_v39  ;;  %v2618_v58 = vmax.f32 %v2617_v46, %v650_v40  ;;  %v1824_v61 = vadd.f32 %v1823_v49, %v647_v29  ;;  %v675_v49 = vld [vmem:[%s3753_s30 + $0x1030] sm:$0xff] }
 0x11d   : > { %v2879_v59 = vmax.f32 %v2878_v47, %v651_v41  ;;  %v3140_v62 = vmax.f32 %v3139_v50, %v652_v48  ;;  %v1303_v2 = vadd.f32 %v1302_v54, %v649_v39  ;;  %v2085_v4 = vadd.f32 %v2084_v56, %v648_v36  ;;  %v670_v36 = vld [vmem:[%s3753_s30 + $0x1008] sm:$0xff]  ;;  %v673_v47 = vld [vmem:[%s3753_s30 + $0x1020] sm:$0xff]  ;;  %v676_v56 = vld [vmem:[%s3753_s30 + $0x1038] sm:$0xff] }
 0x11e   : > { %v1564_v3 = vadd.f32 %v1563_v55, %v650_v40  ;;  %v2358_v5 = vmax.f32 %v2357_v57, %v653_v51  ;;  %v2619_v6 = vmax.f32 %v2618_v58, %v654_v52  ;;  %v1825_v9 = vadd.f32 %v1824_v61, %v651_v41  ;;  %v679_v61 = vld [vmem:[%s3753_s30 + $0x1050] sm:$0xff] }
 0x11f   : > { %v2880_v7 = vmax.f32 %v2879_v59, %v655_v53  ;;  %v3141_v10 = vmax.f32 %v3140_v62, %v656_v60  ;;  %v1304_v14 = vadd.f32 %v1303_v2, %v653_v51  ;;  %v2086_v16 = vadd.f32 %v2085_v4, %v652_v48  ;;  %v674_v48 = vld [vmem:[%s3753_s30 + $0x1028] sm:$0xff]  ;;  %v677_v59 = vld [vmem:[%s3753_s30 + $0x1040] sm:$0xff]  ;;  %v680_v4 = vld [vmem:[%s3753_s30 + $0x1058] sm:$0xff] }
 0x120   : > { %v1565_v15 = vadd.f32 %v1564_v3, %v654_v52  ;;  %v2359_v17 = vmax.f32 %v2358_v5, %v657_v63  ;;  %v2620_v18 = vmax.f32 %v2619_v6, %v658_v0  ;;  %v1826_v21 = vadd.f32 %v1825_v9, %v655_v53  ;;  %v683_v9 = vld [vmem:[%s3753_s30 + $0x1070] sm:$0xff] }
 0x121   : > { %v2881_v19 = vmax.f32 %v2880_v7, %v659_v1  ;;  %v3142_v22 = vmax.f32 %v3141_v10, %v660_v8  ;;  %v1305_v26 = vadd.f32 %v1304_v14, %v657_v63  ;;  %v2087_v28 = vadd.f32 %v2086_v16, %v656_v60  ;;  %v678_v60 = vld [vmem:[%s3753_s30 + $0x1048] sm:$0xff]  ;;  %v681_v7 = vld [vmem:[%s3753_s30 + $0x1060] sm:$0xff]  ;;  %v684_v16 = vld [vmem:[%s3753_s30 + $0x1078] sm:$0xff] }
 0x122   : > { %v1566_v27 = vadd.f32 %v1565_v15, %v658_v0  ;;  %v2360_v29 = vmax.f32 %v2359_v17, %v661_v11  ;;  %v2621_v30 = vmax.f32 %v2620_v18, %v662_v12  ;;  %v1827_v33 = vadd.f32 %v1826_v21, %v659_v1  ;;  %v687_v21 = vld [vmem:[%s3753_s30 + $0x1090] sm:$0xff] }
 0x123   : > { %v2882_v31 = vmax.f32 %v2881_v19, %v663_v13  ;;  %v3143_v34 = vmax.f32 %v3142_v22, %v664_v20  ;;  %v1306_v38 = vadd.f32 %v1305_v26, %v661_v11  ;;  %v2088_v40 = vadd.f32 %v2087_v28, %v660_v8  ;;  %v682_v8 = vld [vmem:[%s3753_s30 + $0x1068] sm:$0xff]  ;;  %v685_v19 = vld [vmem:[%s3753_s30 + $0x1080] sm:$0xff]  ;;  %v688_v28 = vld [vmem:[%s3753_s30 + $0x1098] sm:$0xff] }
 0x124   : > { %v1567_v39 = vadd.f32 %v1566_v27, %v662_v12  ;;  %v2361_v41 = vmax.f32 %v2360_v29, %v665_v23  ;;  %v2622_v42 = vmax.f32 %v2621_v30, %v666_v24  ;;  %v1828_v45 = vadd.f32 %v1827_v33, %v663_v13  ;;  %v691_v33 = vld [vmem:[%s3753_s30 + $0x10b0] sm:$0xff] }
 0x125   : > { %v2883_v43 = vmax.f32 %v2882_v31, %v667_v25  ;;  %v3144_v46 = vmax.f32 %v3143_v34, %v668_v32  ;;  %v1307_v50 = vadd.f32 %v1306_v38, %v665_v23  ;;  %v2089_v52 = vadd.f32 %v2088_v40, %v664_v20  ;;  %v686_v20 = vld [vmem:[%s3753_s30 + $0x1088] sm:$0xff]  ;;  %v689_v31 = vld [vmem:[%s3753_s30 + $0x10a0] sm:$0xff]  ;;  %v692_v40 = vld [vmem:[%s3753_s30 + $0x10b8] sm:$0xff] }
 0x126   : > { %v1568_v51 = vadd.f32 %v1567_v39, %v666_v24  ;;  %v2362_v53 = vmax.f32 %v2361_v41, %v669_v35  ;;  %v2623_v54 = vmax.f32 %v2622_v42, %v670_v36  ;;  %v1829_v57 = vadd.f32 %v1828_v45, %v667_v25  ;;  %v695_v45 = vld [vmem:[%s3753_s30 + $0x10d0] sm:$0xff] }
 0x127   : > { %v2884_v55 = vmax.f32 %v2883_v43, %v671_v37  ;;  %v3145_v58 = vmax.f32 %v3144_v46, %v672_v44  ;;  %v1308_v62 = vadd.f32 %v1307_v50, %v669_v35  ;;  %v2090_v0 = vadd.f32 %v2089_v52, %v668_v32  ;;  %v690_v32 = vld [vmem:[%s3753_s30 + $0x10a8] sm:$0xff]  ;;  %v693_v43 = vld [vmem:[%s3753_s30 + $0x10c0] sm:$0xff]  ;;  %v696_v52 = vld [vmem:[%s3753_s30 + $0x10d8] sm:$0xff] }
 0x128   : > { %v1569_v63 = vadd.f32 %v1568_v51, %v670_v36  ;;  %v2363_v1 = vmax.f32 %v2362_v53, %v673_v47  ;;  %v2624_v2 = vmax.f32 %v2623_v54, %v674_v48  ;;  %v1830_v5 = vadd.f32 %v1829_v57, %v671_v37  ;;  %v699_v57 = vld [vmem:[%s3753_s30 + $0x10f0] sm:$0xff] }
 0x129   : > { %v2885_v3 = vmax.f32 %v2884_v55, %v675_v49  ;;  %v3146_v6 = vmax.f32 %v3145_v58, %v676_v56  ;;  %v1309_v10 = vadd.f32 %v1308_v62, %v673_v47  ;;  %v2091_v12 = vadd.f32 %v2090_v0, %v672_v44  ;;  %v694_v44 = vld [vmem:[%s3753_s30 + $0x10c8] sm:$0xff]  ;;  %v697_v55 = vld [vmem:[%s3753_s30 + $0x10e0] sm:$0xff]  ;;  %v700_v0 = vld [vmem:[%s3753_s30 + $0x10f8] sm:$0xff] }
 0x12a   : > { %v1570_v11 = vadd.f32 %v1569_v63, %v674_v48  ;;  %v2364_v13 = vmax.f32 %v2363_v1, %v677_v59  ;;  %v2625_v14 = vmax.f32 %v2624_v2, %v678_v60  ;;  %v1831_v17 = vadd.f32 %v1830_v5, %v675_v49  ;;  %v703_v5 = vld [vmem:[%s3753_s30 + $0x1110] sm:$0xff] }
 0x12b   : > { %v2886_v15 = vmax.f32 %v2885_v3, %v679_v61  ;;  %v3147_v18 = vmax.f32 %v3146_v6, %v680_v4  ;;  %v1310_v22 = vadd.f32 %v1309_v10, %v677_v59  ;;  %v2092_v24 = vadd.f32 %v2091_v12, %v676_v56  ;;  %v698_v56 = vld [vmem:[%s3753_s30 + $0x10e8] sm:$0xff]  ;;  %v701_v3 = vld [vmem:[%s3753_s30 + $0x1100] sm:$0xff]  ;;  %v704_v12 = vld [vmem:[%s3753_s30 + $0x1118] sm:$0xff] }
 0x12c   : > { %v1571_v23 = vadd.f32 %v1570_v11, %v678_v60  ;;  %v2365_v25 = vmax.f32 %v2364_v13, %v681_v7  ;;  %v2626_v26 = vmax.f32 %v2625_v14, %v682_v8  ;;  %v1832_v29 = vadd.f32 %v1831_v17, %v679_v61  ;;  %v707_v17 = vld [vmem:[%s3753_s30 + $0x1130] sm:$0xff] }
 0x12d   : > { %v2887_v27 = vmax.f32 %v2886_v15, %v683_v9  ;;  %v3148_v30 = vmax.f32 %v3147_v18, %v684_v16  ;;  %v1311_v34 = vadd.f32 %v1310_v22, %v681_v7  ;;  %v2093_v36 = vadd.f32 %v2092_v24, %v680_v4  ;;  %v702_v4 = vld [vmem:[%s3753_s30 + $0x1108] sm:$0xff]  ;;  %v705_v15 = vld [vmem:[%s3753_s30 + $0x1120] sm:$0xff]  ;;  %v708_v24 = vld [vmem:[%s3753_s30 + $0x1138] sm:$0xff] }
 0x12e   : > { %v1572_v35 = vadd.f32 %v1571_v23, %v682_v8  ;;  %v2366_v37 = vmax.f32 %v2365_v25, %v685_v19  ;;  %v2627_v38 = vmax.f32 %v2626_v26, %v686_v20  ;;  %v1833_v41 = vadd.f32 %v1832_v29, %v683_v9  ;;  %v711_v29 = vld [vmem:[%s3753_s30 + $0x1150] sm:$0xff] }
 0x12f   : > { %v2888_v39 = vmax.f32 %v2887_v27, %v687_v21  ;;  %v3149_v42 = vmax.f32 %v3148_v30, %v688_v28  ;;  %v1312_v46 = vadd.f32 %v1311_v34, %v685_v19  ;;  %v2094_v48 = vadd.f32 %v2093_v36, %v684_v16  ;;  %v706_v16 = vld [vmem:[%s3753_s30 + $0x1128] sm:$0xff]  ;;  %v709_v27 = vld [vmem:[%s3753_s30 + $0x1140] sm:$0xff]  ;;  %v712_v36 = vld [vmem:[%s3753_s30 + $0x1158] sm:$0xff] }
 0x130   : > { %v1573_v47 = vadd.f32 %v1572_v35, %v686_v20  ;;  %v2367_v49 = vmax.f32 %v2366_v37, %v689_v31  ;;  %v2628_v50 = vmax.f32 %v2627_v38, %v690_v32  ;;  %v1834_v53 = vadd.f32 %v1833_v41, %v687_v21  ;;  %v715_v41 = vld [vmem:[%s3753_s30 + $0x1170] sm:$0xff] }
 0x131   : > { %v2889_v51 = vmax.f32 %v2888_v39, %v691_v33  ;;  %v3150_v54 = vmax.f32 %v3149_v42, %v692_v40  ;;  %v1313_v58 = vadd.f32 %v1312_v46, %v689_v31  ;;  %v2095_v60 = vadd.f32 %v2094_v48, %v688_v28  ;;  %v710_v28 = vld [vmem:[%s3753_s30 + $0x1148] sm:$0xff]  ;;  %v713_v39 = vld [vmem:[%s3753_s30 + $0x1160] sm:$0xff]  ;;  %v716_v48 = vld [vmem:[%s3753_s30 + $0x1178] sm:$0xff] }
 0x132   : > { %v1574_v59 = vadd.f32 %v1573_v47, %v690_v32  ;;  %v2368_v61 = vmax.f32 %v2367_v49, %v693_v43  ;;  %v2629_v62 = vmax.f32 %v2628_v50, %v694_v44  ;;  %v1835_v1 = vadd.f32 %v1834_v53, %v691_v33  ;;  %v719_v53 = vld [vmem:[%s3753_s30 + $0x1190] sm:$0xff] }
 0x133   : > { %v2890_v63 = vmax.f32 %v2889_v51, %v695_v45  ;;  %v3151_v2 = vmax.f32 %v3150_v54, %v696_v52  ;;  %v1314_v6 = vadd.f32 %v1313_v58, %v693_v43  ;;  %v2096_v8 = vadd.f32 %v2095_v60, %v692_v40  ;;  %v714_v40 = vld [vmem:[%s3753_s30 + $0x1168] sm:$0xff]  ;;  %v717_v51 = vld [vmem:[%s3753_s30 + $0x1180] sm:$0xff]  ;;  %v720_v60 = vld [vmem:[%s3753_s30 + $0x1198] sm:$0xff] }
 0x134   : > { %v1575_v7 = vadd.f32 %v1574_v59, %v694_v44  ;;  %v2369_v9 = vmax.f32 %v2368_v61, %v697_v55  ;;  %v2630_v10 = vmax.f32 %v2629_v62, %v698_v56  ;;  %v1836_v13 = vadd.f32 %v1835_v1, %v695_v45  ;;  %v723_v1 = vld [vmem:[%s3753_s30 + $0x11b0] sm:$0xff] }
 0x135   : > { %v2891_v11 = vmax.f32 %v2890_v63, %v699_v57  ;;  %v3152_v14 = vmax.f32 %v3151_v2, %v700_v0  ;;  %v1315_v18 = vadd.f32 %v1314_v6, %v697_v55  ;;  %v2097_v20 = vadd.f32 %v2096_v8, %v696_v52  ;;  %v718_v52 = vld [vmem:[%s3753_s30 + $0x1188] sm:$0xff]  ;;  %v721_v63 = vld [vmem:[%s3753_s30 + $0x11a0] sm:$0xff]  ;;  %v724_v8 = vld [vmem:[%s3753_s30 + $0x11b8] sm:$0xff] }
 0x136   : > { %v1576_v19 = vadd.f32 %v1575_v7, %v698_v56  ;;  %v2370_v21 = vmax.f32 %v2369_v9, %v701_v3  ;;  %v2631_v22 = vmax.f32 %v2630_v10, %v702_v4  ;;  %v1837_v25 = vadd.f32 %v1836_v13, %v699_v57  ;;  %v727_v13 = vld [vmem:[%s3753_s30 + $0x11d0] sm:$0xff] }
 0x137   : > { %v2892_v23 = vmax.f32 %v2891_v11, %v703_v5  ;;  %v3153_v26 = vmax.f32 %v3152_v14, %v704_v12  ;;  %v1316_v30 = vadd.f32 %v1315_v18, %v701_v3  ;;  %v2098_v32 = vadd.f32 %v2097_v20, %v700_v0  ;;  %v722_v0 = vld [vmem:[%s3753_s30 + $0x11a8] sm:$0xff]  ;;  %v725_v11 = vld [vmem:[%s3753_s30 + $0x11c0] sm:$0xff]  ;;  %v728_v20 = vld [vmem:[%s3753_s30 + $0x11d8] sm:$0xff] }
 0x138   : > { %v1577_v31 = vadd.f32 %v1576_v19, %v702_v4  ;;  %v2371_v33 = vmax.f32 %v2370_v21, %v705_v15  ;;  %v2632_v34 = vmax.f32 %v2631_v22, %v706_v16  ;;  %v1838_v37 = vadd.f32 %v1837_v25, %v703_v5  ;;  %v731_v25 = vld [vmem:[%s3753_s30 + $0x11f0] sm:$0xff] }
 0x139   : > { %v2893_v35 = vmax.f32 %v2892_v23, %v707_v17  ;;  %v3154_v38 = vmax.f32 %v3153_v26, %v708_v24  ;;  %v1317_v42 = vadd.f32 %v1316_v30, %v705_v15  ;;  %v2099_v44 = vadd.f32 %v2098_v32, %v704_v12  ;;  %v726_v12 = vld [vmem:[%s3753_s30 + $0x11c8] sm:$0xff]  ;;  %v729_v23 = vld [vmem:[%s3753_s30 + $0x11e0] sm:$0xff]  ;;  %v732_v32 = vld [vmem:[%s3753_s30 + $0x11f8] sm:$0xff] }
 0x13a   : > { %v1578_v43 = vadd.f32 %v1577_v31, %v706_v16  ;;  %v2372_v45 = vmax.f32 %v2371_v33, %v709_v27  ;;  %v2633_v46 = vmax.f32 %v2632_v34, %v710_v28  ;;  %v1839_v49 = vadd.f32 %v1838_v37, %v707_v17  ;;  %v735_v37 = vld [vmem:[%s3753_s30 + $0x1210] sm:$0xff] }
 0x13b   : > { %v2894_v47 = vmax.f32 %v2893_v35, %v711_v29  ;;  %v3155_v50 = vmax.f32 %v3154_v38, %v712_v36  ;;  %v1318_v54 = vadd.f32 %v1317_v42, %v709_v27  ;;  %v2100_v56 = vadd.f32 %v2099_v44, %v708_v24  ;;  %v730_v24 = vld [vmem:[%s3753_s30 + $0x11e8] sm:$0xff]  ;;  %v733_v35 = vld [vmem:[%s3753_s30 + $0x1200] sm:$0xff]  ;;  %v736_v44 = vld [vmem:[%s3753_s30 + $0x1218] sm:$0xff] }
 0x13c   : > { %v1579_v55 = vadd.f32 %v1578_v43, %v710_v28  ;;  %v2373_v57 = vmax.f32 %v2372_v45, %v713_v39  ;;  %v2634_v58 = vmax.f32 %v2633_v46, %v714_v40  ;;  %v1840_v61 = vadd.f32 %v1839_v49, %v711_v29  ;;  %v739_v49 = vld [vmem:[%s3753_s30 + $0x1230] sm:$0xff] }
 0x13d   : > { %v2895_v59 = vmax.f32 %v2894_v47, %v715_v41  ;;  %v3156_v62 = vmax.f32 %v3155_v50, %v716_v48  ;;  %v1319_v2 = vadd.f32 %v1318_v54, %v713_v39  ;;  %v2101_v4 = vadd.f32 %v2100_v56, %v712_v36  ;;  %v734_v36 = vld [vmem:[%s3753_s30 + $0x1208] sm:$0xff]  ;;  %v737_v47 = vld [vmem:[%s3753_s30 + $0x1220] sm:$0xff]  ;;  %v740_v56 = vld [vmem:[%s3753_s30 + $0x1238] sm:$0xff] }
 0x13e   : > { %v1580_v3 = vadd.f32 %v1579_v55, %v714_v40  ;;  %v2374_v5 = vmax.f32 %v2373_v57, %v717_v51  ;;  %v2635_v6 = vmax.f32 %v2634_v58, %v718_v52  ;;  %v1841_v9 = vadd.f32 %v1840_v61, %v715_v41  ;;  %v743_v61 = vld [vmem:[%s3753_s30 + $0x1250] sm:$0xff] }
 0x13f   : > { %v2896_v7 = vmax.f32 %v2895_v59, %v719_v53  ;;  %v3157_v10 = vmax.f32 %v3156_v62, %v720_v60  ;;  %v1320_v14 = vadd.f32 %v1319_v2, %v717_v51  ;;  %v2102_v16 = vadd.f32 %v2101_v4, %v716_v48  ;;  %v738_v48 = vld [vmem:[%s3753_s30 + $0x1228] sm:$0xff]  ;;  %v741_v59 = vld [vmem:[%s3753_s30 + $0x1240] sm:$0xff]  ;;  %v744_v4 = vld [vmem:[%s3753_s30 + $0x1258] sm:$0xff] }
 0x140   : > { %v1581_v15 = vadd.f32 %v1580_v3, %v718_v52  ;;  %v2375_v17 = vmax.f32 %v2374_v5, %v721_v63  ;;  %v2636_v18 = vmax.f32 %v2635_v6, %v722_v0  ;;  %v1842_v21 = vadd.f32 %v1841_v9, %v719_v53  ;;  %v747_v9 = vld [vmem:[%s3753_s30 + $0x1270] sm:$0xff] }
 0x141   : > { %v2897_v19 = vmax.f32 %v2896_v7, %v723_v1  ;;  %v3158_v22 = vmax.f32 %v3157_v10, %v724_v8  ;;  %v1321_v26 = vadd.f32 %v1320_v14, %v721_v63  ;;  %v2103_v28 = vadd.f32 %v2102_v16, %v720_v60  ;;  %v742_v60 = vld [vmem:[%s3753_s30 + $0x1248] sm:$0xff]  ;;  %v745_v7 = vld [vmem:[%s3753_s30 + $0x1260] sm:$0xff]  ;;  %v748_v16 = vld [vmem:[%s3753_s30 + $0x1278] sm:$0xff] }
 0x142   : > { %v1582_v27 = vadd.f32 %v1581_v15, %v722_v0  ;;  %v2376_v29 = vmax.f32 %v2375_v17, %v725_v11  ;;  %v2637_v30 = vmax.f32 %v2636_v18, %v726_v12  ;;  %v1843_v33 = vadd.f32 %v1842_v21, %v723_v1  ;;  %v751_v21 = vld [vmem:[%s3753_s30 + $0x1290] sm:$0xff] }
 0x143   : > { %v2898_v31 = vmax.f32 %v2897_v19, %v727_v13  ;;  %v3159_v34 = vmax.f32 %v3158_v22, %v728_v20  ;;  %v1322_v38 = vadd.f32 %v1321_v26, %v725_v11  ;;  %v2104_v40 = vadd.f32 %v2103_v28, %v724_v8  ;;  %v746_v8 = vld [vmem:[%s3753_s30 + $0x1268] sm:$0xff]  ;;  %v749_v19 = vld [vmem:[%s3753_s30 + $0x1280] sm:$0xff]  ;;  %v752_v28 = vld [vmem:[%s3753_s30 + $0x1298] sm:$0xff] }
 0x144   : > { %v1583_v39 = vadd.f32 %v1582_v27, %v726_v12  ;;  %v2377_v41 = vmax.f32 %v2376_v29, %v729_v23  ;;  %v2638_v42 = vmax.f32 %v2637_v30, %v730_v24  ;;  %v1844_v45 = vadd.f32 %v1843_v33, %v727_v13  ;;  %v755_v33 = vld [vmem:[%s3753_s30 + $0x12b0] sm:$0xff] }
 0x145   : > { %v2899_v43 = vmax.f32 %v2898_v31, %v731_v25  ;;  %v3160_v46 = vmax.f32 %v3159_v34, %v732_v32  ;;  %v1323_v50 = vadd.f32 %v1322_v38, %v729_v23  ;;  %v2105_v52 = vadd.f32 %v2104_v40, %v728_v20  ;;  %v750_v20 = vld [vmem:[%s3753_s30 + $0x1288] sm:$0xff]  ;;  %v753_v31 = vld [vmem:[%s3753_s30 + $0x12a0] sm:$0xff]  ;;  %v756_v40 = vld [vmem:[%s3753_s30 + $0x12b8] sm:$0xff] }
 0x146   : > { %v1584_v51 = vadd.f32 %v1583_v39, %v730_v24  ;;  %v2378_v53 = vmax.f32 %v2377_v41, %v733_v35  ;;  %v2639_v54 = vmax.f32 %v2638_v42, %v734_v36  ;;  %v1845_v57 = vadd.f32 %v1844_v45, %v731_v25  ;;  %v759_v45 = vld [vmem:[%s3753_s30 + $0x12d0] sm:$0xff] }
 0x147   : > { %v2900_v55 = vmax.f32 %v2899_v43, %v735_v37  ;;  %v3161_v58 = vmax.f32 %v3160_v46, %v736_v44  ;;  %v1324_v62 = vadd.f32 %v1323_v50, %v733_v35  ;;  %v2106_v0 = vadd.f32 %v2105_v52, %v732_v32  ;;  %v754_v32 = vld [vmem:[%s3753_s30 + $0x12a8] sm:$0xff]  ;;  %v757_v43 = vld [vmem:[%s3753_s30 + $0x12c0] sm:$0xff]  ;;  %v760_v52 = vld [vmem:[%s3753_s30 + $0x12d8] sm:$0xff] }
 0x148   : > { %v1585_v63 = vadd.f32 %v1584_v51, %v734_v36  ;;  %v2379_v1 = vmax.f32 %v2378_v53, %v737_v47  ;;  %v2640_v2 = vmax.f32 %v2639_v54, %v738_v48  ;;  %v1846_v5 = vadd.f32 %v1845_v57, %v735_v37  ;;  %v763_v57 = vld [vmem:[%s3753_s30 + $0x12f0] sm:$0xff] }
 0x149   : > { %v2901_v3 = vmax.f32 %v2900_v55, %v739_v49  ;;  %v3162_v6 = vmax.f32 %v3161_v58, %v740_v56  ;;  %v1325_v10 = vadd.f32 %v1324_v62, %v737_v47  ;;  %v2107_v12 = vadd.f32 %v2106_v0, %v736_v44  ;;  %v758_v44 = vld [vmem:[%s3753_s30 + $0x12c8] sm:$0xff]  ;;  %v761_v55 = vld [vmem:[%s3753_s30 + $0x12e0] sm:$0xff]  ;;  %v764_v0 = vld [vmem:[%s3753_s30 + $0x12f8] sm:$0xff] }
 0x14a   : > { %v1586_v11 = vadd.f32 %v1585_v63, %v738_v48  ;;  %v2380_v13 = vmax.f32 %v2379_v1, %v741_v59  ;;  %v2641_v14 = vmax.f32 %v2640_v2, %v742_v60  ;;  %v1847_v17 = vadd.f32 %v1846_v5, %v739_v49  ;;  %v767_v5 = vld [vmem:[%s3753_s30 + $0x1310] sm:$0xff] }
 0x14b   : > { %v2902_v15 = vmax.f32 %v2901_v3, %v743_v61  ;;  %v3163_v18 = vmax.f32 %v3162_v6, %v744_v4  ;;  %v1326_v22 = vadd.f32 %v1325_v10, %v741_v59  ;;  %v2108_v24 = vadd.f32 %v2107_v12, %v740_v56  ;;  %v762_v56 = vld [vmem:[%s3753_s30 + $0x12e8] sm:$0xff]  ;;  %v765_v3 = vld [vmem:[%s3753_s30 + $0x1300] sm:$0xff]  ;;  %v768_v12 = vld [vmem:[%s3753_s30 + $0x1318] sm:$0xff] }
 0x14c   : > { %v1587_v23 = vadd.f32 %v1586_v11, %v742_v60  ;;  %v2381_v25 = vmax.f32 %v2380_v13, %v745_v7  ;;  %v2642_v26 = vmax.f32 %v2641_v14, %v746_v8  ;;  %v1848_v29 = vadd.f32 %v1847_v17, %v743_v61  ;;  %v771_v17 = vld [vmem:[%s3753_s30 + $0x1330] sm:$0xff] }
 0x14d   : > { %v2903_v27 = vmax.f32 %v2902_v15, %v747_v9  ;;  %v3164_v30 = vmax.f32 %v3163_v18, %v748_v16  ;;  %v1327_v34 = vadd.f32 %v1326_v22, %v745_v7  ;;  %v2109_v36 = vadd.f32 %v2108_v24, %v744_v4  ;;  %v766_v4 = vld [vmem:[%s3753_s30 + $0x1308] sm:$0xff]  ;;  %v769_v15 = vld [vmem:[%s3753_s30 + $0x1320] sm:$0xff]  ;;  %v772_v24 = vld [vmem:[%s3753_s30 + $0x1338] sm:$0xff] }
 0x14e   : > { %v1588_v35 = vadd.f32 %v1587_v23, %v746_v8  ;;  %v2382_v37 = vmax.f32 %v2381_v25, %v749_v19  ;;  %v2643_v38 = vmax.f32 %v2642_v26, %v750_v20  ;;  %v1849_v41 = vadd.f32 %v1848_v29, %v747_v9  ;;  %v775_v29 = vld [vmem:[%s3753_s30 + $0x1350] sm:$0xff] }
 0x14f   : > { %v2904_v39 = vmax.f32 %v2903_v27, %v751_v21  ;;  %v3165_v42 = vmax.f32 %v3164_v30, %v752_v28  ;;  %v1328_v46 = vadd.f32 %v1327_v34, %v749_v19  ;;  %v2110_v48 = vadd.f32 %v2109_v36, %v748_v16  ;;  %v770_v16 = vld [vmem:[%s3753_s30 + $0x1328] sm:$0xff]  ;;  %v773_v27 = vld [vmem:[%s3753_s30 + $0x1340] sm:$0xff]  ;;  %v776_v36 = vld [vmem:[%s3753_s30 + $0x1358] sm:$0xff] }
 0x150   : > { %v1589_v47 = vadd.f32 %v1588_v35, %v750_v20  ;;  %v2383_v49 = vmax.f32 %v2382_v37, %v753_v31  ;;  %v2644_v50 = vmax.f32 %v2643_v38, %v754_v32  ;;  %v1850_v53 = vadd.f32 %v1849_v41, %v751_v21  ;;  %v779_v41 = vld [vmem:[%s3753_s30 + $0x1370] sm:$0xff] }
 0x151   : > { %v2905_v51 = vmax.f32 %v2904_v39, %v755_v33  ;;  %v3166_v54 = vmax.f32 %v3165_v42, %v756_v40  ;;  %v1329_v58 = vadd.f32 %v1328_v46, %v753_v31  ;;  %v2111_v60 = vadd.f32 %v2110_v48, %v752_v28  ;;  %v774_v28 = vld [vmem:[%s3753_s30 + $0x1348] sm:$0xff]  ;;  %v777_v39 = vld [vmem:[%s3753_s30 + $0x1360] sm:$0xff]  ;;  %v780_v48 = vld [vmem:[%s3753_s30 + $0x1378] sm:$0xff] }
 0x152   : > { %v1590_v59 = vadd.f32 %v1589_v47, %v754_v32  ;;  %v2384_v61 = vmax.f32 %v2383_v49, %v757_v43  ;;  %v2645_v62 = vmax.f32 %v2644_v50, %v758_v44  ;;  %v1851_v1 = vadd.f32 %v1850_v53, %v755_v33  ;;  %v783_v53 = vld [vmem:[%s3753_s30 + $0x1390] sm:$0xff] }
 0x153   : > { %v2906_v63 = vmax.f32 %v2905_v51, %v759_v45  ;;  %v3167_v2 = vmax.f32 %v3166_v54, %v760_v52  ;;  %v1330_v6 = vadd.f32 %v1329_v58, %v757_v43  ;;  %v2112_v8 = vadd.f32 %v2111_v60, %v756_v40  ;;  %v778_v40 = vld [vmem:[%s3753_s30 + $0x1368] sm:$0xff]  ;;  %v781_v51 = vld [vmem:[%s3753_s30 + $0x1380] sm:$0xff]  ;;  %v784_v60 = vld [vmem:[%s3753_s30 + $0x1398] sm:$0xff] }
 0x154   : > { %v1591_v7 = vadd.f32 %v1590_v59, %v758_v44  ;;  %v2385_v9 = vmax.f32 %v2384_v61, %v761_v55  ;;  %v2646_v10 = vmax.f32 %v2645_v62, %v762_v56  ;;  %v1852_v13 = vadd.f32 %v1851_v1, %v759_v45  ;;  %v787_v1 = vld [vmem:[%s3753_s30 + $0x13b0] sm:$0xff] }
 0x155   : > { %v2907_v11 = vmax.f32 %v2906_v63, %v763_v57  ;;  %v3168_v14 = vmax.f32 %v3167_v2, %v764_v0  ;;  %v1331_v18 = vadd.f32 %v1330_v6, %v761_v55  ;;  %v2113_v20 = vadd.f32 %v2112_v8, %v760_v52  ;;  %v782_v52 = vld [vmem:[%s3753_s30 + $0x1388] sm:$0xff]  ;;  %v785_v63 = vld [vmem:[%s3753_s30 + $0x13a0] sm:$0xff]  ;;  %v788_v8 = vld [vmem:[%s3753_s30 + $0x13b8] sm:$0xff] }
 0x156   : > { %v1592_v19 = vadd.f32 %v1591_v7, %v762_v56  ;;  %v2386_v21 = vmax.f32 %v2385_v9, %v765_v3  ;;  %v2647_v22 = vmax.f32 %v2646_v10, %v766_v4  ;;  %v1853_v25 = vadd.f32 %v1852_v13, %v763_v57  ;;  %v791_v13 = vld [vmem:[%s3753_s30 + $0x13d0] sm:$0xff] }
 0x157   : > { %v2908_v23 = vmax.f32 %v2907_v11, %v767_v5  ;;  %v3169_v26 = vmax.f32 %v3168_v14, %v768_v12  ;;  %v1332_v30 = vadd.f32 %v1331_v18, %v765_v3  ;;  %v2114_v32 = vadd.f32 %v2113_v20, %v764_v0  ;;  %v786_v0 = vld [vmem:[%s3753_s30 + $0x13a8] sm:$0xff]  ;;  %v789_v11 = vld [vmem:[%s3753_s30 + $0x13c0] sm:$0xff]  ;;  %v792_v20 = vld [vmem:[%s3753_s30 + $0x13d8] sm:$0xff] }
 0x158   : > { %v1593_v31 = vadd.f32 %v1592_v19, %v766_v4  ;;  %v2387_v33 = vmax.f32 %v2386_v21, %v769_v15  ;;  %v2648_v34 = vmax.f32 %v2647_v22, %v770_v16  ;;  %v1854_v37 = vadd.f32 %v1853_v25, %v767_v5  ;;  %v795_v25 = vld [vmem:[%s3753_s30 + $0x13f0] sm:$0xff] }
 0x159   : > { %v2909_v35 = vmax.f32 %v2908_v23, %v771_v17  ;;  %v3170_v38 = vmax.f32 %v3169_v26, %v772_v24  ;;  %v1333_v42 = vadd.f32 %v1332_v30, %v769_v15  ;;  %v2115_v44 = vadd.f32 %v2114_v32, %v768_v12  ;;  %v790_v12 = vld [vmem:[%s3753_s30 + $0x13c8] sm:$0xff]  ;;  %v793_v23 = vld [vmem:[%s3753_s30 + $0x13e0] sm:$0xff]  ;;  %v796_v32 = vld [vmem:[%s3753_s30 + $0x13f8] sm:$0xff] }
 0x15a   : > { %v1594_v43 = vadd.f32 %v1593_v31, %v770_v16  ;;  %v2388_v45 = vmax.f32 %v2387_v33, %v773_v27  ;;  %v2649_v46 = vmax.f32 %v2648_v34, %v774_v28  ;;  %v1855_v49 = vadd.f32 %v1854_v37, %v771_v17  ;;  %v799_v37 = vld [vmem:[%s3753_s30 + $0x1410] sm:$0xff] }
 0x15b   : > { %v2910_v47 = vmax.f32 %v2909_v35, %v775_v29  ;;  %v3171_v50 = vmax.f32 %v3170_v38, %v776_v36  ;;  %v1334_v54 = vadd.f32 %v1333_v42, %v773_v27  ;;  %v2116_v56 = vadd.f32 %v2115_v44, %v772_v24  ;;  %v794_v24 = vld [vmem:[%s3753_s30 + $0x13e8] sm:$0xff]  ;;  %v797_v35 = vld [vmem:[%s3753_s30 + $0x1400] sm:$0xff]  ;;  %v800_v44 = vld [vmem:[%s3753_s30 + $0x1418] sm:$0xff] }
 0x15c   : > { %v1595_v55 = vadd.f32 %v1594_v43, %v774_v28  ;;  %v2389_v57 = vmax.f32 %v2388_v45, %v777_v39  ;;  %v2650_v58 = vmax.f32 %v2649_v46, %v778_v40  ;;  %v1856_v61 = vadd.f32 %v1855_v49, %v775_v29  ;;  %v803_v49 = vld [vmem:[%s3753_s30 + $0x1430] sm:$0xff] }
 0x15d   : > { %v2911_v59 = vmax.f32 %v2910_v47, %v779_v41  ;;  %v3172_v62 = vmax.f32 %v3171_v50, %v780_v48  ;;  %v1335_v2 = vadd.f32 %v1334_v54, %v777_v39  ;;  %v2117_v4 = vadd.f32 %v2116_v56, %v776_v36  ;;  %v798_v36 = vld [vmem:[%s3753_s30 + $0x1408] sm:$0xff]  ;;  %v801_v47 = vld [vmem:[%s3753_s30 + $0x1420] sm:$0xff]  ;;  %v804_v56 = vld [vmem:[%s3753_s30 + $0x1438] sm:$0xff] }
 0x15e   : > { %v1596_v3 = vadd.f32 %v1595_v55, %v778_v40  ;;  %v2390_v5 = vmax.f32 %v2389_v57, %v781_v51  ;;  %v2651_v6 = vmax.f32 %v2650_v58, %v782_v52  ;;  %v1857_v9 = vadd.f32 %v1856_v61, %v779_v41  ;;  %v807_v61 = vld [vmem:[%s3753_s30 + $0x1450] sm:$0xff] }
 0x15f   : > { %v2912_v7 = vmax.f32 %v2911_v59, %v783_v53  ;;  %v3173_v10 = vmax.f32 %v3172_v62, %v784_v60  ;;  %v1336_v14 = vadd.f32 %v1335_v2, %v781_v51  ;;  %v2118_v16 = vadd.f32 %v2117_v4, %v780_v48  ;;  %v802_v48 = vld [vmem:[%s3753_s30 + $0x1428] sm:$0xff]  ;;  %v805_v59 = vld [vmem:[%s3753_s30 + $0x1440] sm:$0xff]  ;;  %v808_v4 = vld [vmem:[%s3753_s30 + $0x1458] sm:$0xff] }
 0x160   : > { %v1597_v15 = vadd.f32 %v1596_v3, %v782_v52  ;;  %v2391_v17 = vmax.f32 %v2390_v5, %v785_v63  ;;  %v2652_v18 = vmax.f32 %v2651_v6, %v786_v0  ;;  %v1858_v21 = vadd.f32 %v1857_v9, %v783_v53  ;;  %v811_v9 = vld [vmem:[%s3753_s30 + $0x1470] sm:$0xff] }
 0x161   : > { %v2913_v19 = vmax.f32 %v2912_v7, %v787_v1  ;;  %v3174_v22 = vmax.f32 %v3173_v10, %v788_v8  ;;  %v1337_v26 = vadd.f32 %v1336_v14, %v785_v63  ;;  %v2119_v28 = vadd.f32 %v2118_v16, %v784_v60  ;;  %v806_v60 = vld [vmem:[%s3753_s30 + $0x1448] sm:$0xff]  ;;  %v809_v7 = vld [vmem:[%s3753_s30 + $0x1460] sm:$0xff]  ;;  %v812_v16 = vld [vmem:[%s3753_s30 + $0x1478] sm:$0xff] }
 0x162   : > { %v1598_v27 = vadd.f32 %v1597_v15, %v786_v0  ;;  %v2392_v29 = vmax.f32 %v2391_v17, %v789_v11  ;;  %v2653_v30 = vmax.f32 %v2652_v18, %v790_v12  ;;  %v1859_v33 = vadd.f32 %v1858_v21, %v787_v1  ;;  %v815_v21 = vld [vmem:[%s3753_s30 + $0x1490] sm:$0xff] }
 0x163   : > { %v2914_v31 = vmax.f32 %v2913_v19, %v791_v13  ;;  %v3175_v34 = vmax.f32 %v3174_v22, %v792_v20  ;;  %v1338_v38 = vadd.f32 %v1337_v26, %v789_v11  ;;  %v2120_v40 = vadd.f32 %v2119_v28, %v788_v8  ;;  %v810_v8 = vld [vmem:[%s3753_s30 + $0x1468] sm:$0xff]  ;;  %v813_v19 = vld [vmem:[%s3753_s30 + $0x1480] sm:$0xff]  ;;  %v816_v28 = vld [vmem:[%s3753_s30 + $0x1498] sm:$0xff] }
 0x164   : > { %v1599_v39 = vadd.f32 %v1598_v27, %v790_v12  ;;  %v2393_v41 = vmax.f32 %v2392_v29, %v793_v23  ;;  %v2654_v42 = vmax.f32 %v2653_v30, %v794_v24  ;;  %v1860_v45 = vadd.f32 %v1859_v33, %v791_v13  ;;  %v819_v33 = vld [vmem:[%s3753_s30 + $0x14b0] sm:$0xff] }
 0x165   : > { %v2915_v43 = vmax.f32 %v2914_v31, %v795_v25  ;;  %v3176_v46 = vmax.f32 %v3175_v34, %v796_v32  ;;  %v1339_v50 = vadd.f32 %v1338_v38, %v793_v23  ;;  %v2121_v52 = vadd.f32 %v2120_v40, %v792_v20  ;;  %v814_v20 = vld [vmem:[%s3753_s30 + $0x1488] sm:$0xff]  ;;  %v817_v31 = vld [vmem:[%s3753_s30 + $0x14a0] sm:$0xff]  ;;  %v820_v40 = vld [vmem:[%s3753_s30 + $0x14b8] sm:$0xff] }
 0x166   : > { %v1600_v51 = vadd.f32 %v1599_v39, %v794_v24  ;;  %v2394_v53 = vmax.f32 %v2393_v41, %v797_v35  ;;  %v2655_v54 = vmax.f32 %v2654_v42, %v798_v36  ;;  %v1861_v57 = vadd.f32 %v1860_v45, %v795_v25  ;;  %v823_v45 = vld [vmem:[%s3753_s30 + $0x14d0] sm:$0xff] }
 0x167   : > { %v2916_v55 = vmax.f32 %v2915_v43, %v799_v37  ;;  %v3177_v58 = vmax.f32 %v3176_v46, %v800_v44  ;;  %v1340_v62 = vadd.f32 %v1339_v50, %v797_v35  ;;  %v2122_v0 = vadd.f32 %v2121_v52, %v796_v32  ;;  %v818_v32 = vld [vmem:[%s3753_s30 + $0x14a8] sm:$0xff]  ;;  %v821_v43 = vld [vmem:[%s3753_s30 + $0x14c0] sm:$0xff]  ;;  %v824_v52 = vld [vmem:[%s3753_s30 + $0x14d8] sm:$0xff] }
 0x168   : > { %v1601_v63 = vadd.f32 %v1600_v51, %v798_v36  ;;  %v2395_v1 = vmax.f32 %v2394_v53, %v801_v47  ;;  %v2656_v2 = vmax.f32 %v2655_v54, %v802_v48  ;;  %v1862_v5 = vadd.f32 %v1861_v57, %v799_v37  ;;  %v827_v57 = vld [vmem:[%s3753_s30 + $0x14f0] sm:$0xff] }
 0x169   : > { %v2917_v3 = vmax.f32 %v2916_v55, %v803_v49  ;;  %v3178_v6 = vmax.f32 %v3177_v58, %v804_v56  ;;  %v1341_v10 = vadd.f32 %v1340_v62, %v801_v47  ;;  %v2123_v12 = vadd.f32 %v2122_v0, %v800_v44  ;;  %v822_v44 = vld [vmem:[%s3753_s30 + $0x14c8] sm:$0xff]  ;;  %v825_v55 = vld [vmem:[%s3753_s30 + $0x14e0] sm:$0xff]  ;;  %v828_v0 = vld [vmem:[%s3753_s30 + $0x14f8] sm:$0xff] }
 0x16a   : > { %v1602_v11 = vadd.f32 %v1601_v63, %v802_v48  ;;  %v2396_v13 = vmax.f32 %v2395_v1, %v805_v59  ;;  %v2657_v14 = vmax.f32 %v2656_v2, %v806_v60  ;;  %v1863_v17 = vadd.f32 %v1862_v5, %v803_v49  ;;  %v831_v5 = vld [vmem:[%s3753_s30 + $0x1510] sm:$0xff] }
 0x16b   : > { %v2918_v15 = vmax.f32 %v2917_v3, %v807_v61  ;;  %v3179_v18 = vmax.f32 %v3178_v6, %v808_v4  ;;  %v1342_v22 = vadd.f32 %v1341_v10, %v805_v59  ;;  %v2124_v24 = vadd.f32 %v2123_v12, %v804_v56  ;;  %v826_v56 = vld [vmem:[%s3753_s30 + $0x14e8] sm:$0xff]  ;;  %v829_v3 = vld [vmem:[%s3753_s30 + $0x1500] sm:$0xff]  ;;  %v832_v12 = vld [vmem:[%s3753_s30 + $0x1518] sm:$0xff] }
 0x16c   : > { %v1603_v23 = vadd.f32 %v1602_v11, %v806_v60  ;;  %v2397_v25 = vmax.f32 %v2396_v13, %v809_v7  ;;  %v2658_v26 = vmax.f32 %v2657_v14, %v810_v8  ;;  %v1864_v29 = vadd.f32 %v1863_v17, %v807_v61  ;;  %v835_v17 = vld [vmem:[%s3753_s30 + $0x1530] sm:$0xff] }
 0x16d   : > { %v2919_v27 = vmax.f32 %v2918_v15, %v811_v9  ;;  %v3180_v30 = vmax.f32 %v3179_v18, %v812_v16  ;;  %v1343_v34 = vadd.f32 %v1342_v22, %v809_v7  ;;  %v2125_v36 = vadd.f32 %v2124_v24, %v808_v4  ;;  %v830_v4 = vld [vmem:[%s3753_s30 + $0x1508] sm:$0xff]  ;;  %v833_v15 = vld [vmem:[%s3753_s30 + $0x1520] sm:$0xff]  ;;  %v836_v24 = vld [vmem:[%s3753_s30 + $0x1538] sm:$0xff] }
 0x16e   : > { %v1604_v35 = vadd.f32 %v1603_v23, %v810_v8  ;;  %v2398_v37 = vmax.f32 %v2397_v25, %v813_v19  ;;  %v2659_v38 = vmax.f32 %v2658_v26, %v814_v20  ;;  %v1865_v41 = vadd.f32 %v1864_v29, %v811_v9  ;;  %v839_v29 = vld [vmem:[%s3753_s30 + $0x1550] sm:$0xff] }
 0x16f   : > { %v2920_v39 = vmax.f32 %v2919_v27, %v815_v21  ;;  %v3181_v42 = vmax.f32 %v3180_v30, %v816_v28  ;;  %v1344_v46 = vadd.f32 %v1343_v34, %v813_v19  ;;  %v2126_v48 = vadd.f32 %v2125_v36, %v812_v16  ;;  %v834_v16 = vld [vmem:[%s3753_s30 + $0x1528] sm:$0xff]  ;;  %v837_v27 = vld [vmem:[%s3753_s30 + $0x1540] sm:$0xff]  ;;  %v840_v36 = vld [vmem:[%s3753_s30 + $0x1558] sm:$0xff] }
 0x170   : > { %v1605_v47 = vadd.f32 %v1604_v35, %v814_v20  ;;  %v2399_v49 = vmax.f32 %v2398_v37, %v817_v31  ;;  %v2660_v50 = vmax.f32 %v2659_v38, %v818_v32  ;;  %v1866_v53 = vadd.f32 %v1865_v41, %v815_v21  ;;  %v843_v41 = vld [vmem:[%s3753_s30 + $0x1570] sm:$0xff] }
 0x171   : > { %v2921_v51 = vmax.f32 %v2920_v39, %v819_v33  ;;  %v3182_v54 = vmax.f32 %v3181_v42, %v820_v40  ;;  %v1345_v58 = vadd.f32 %v1344_v46, %v817_v31  ;;  %v2127_v60 = vadd.f32 %v2126_v48, %v816_v28  ;;  %v838_v28 = vld [vmem:[%s3753_s30 + $0x1548] sm:$0xff]  ;;  %v841_v39 = vld [vmem:[%s3753_s30 + $0x1560] sm:$0xff]  ;;  %v844_v48 = vld [vmem:[%s3753_s30 + $0x1578] sm:$0xff] }
 0x172   : > { %v1606_v59 = vadd.f32 %v1605_v47, %v818_v32  ;;  %v2400_v61 = vmax.f32 %v2399_v49, %v821_v43  ;;  %v2661_v62 = vmax.f32 %v2660_v50, %v822_v44  ;;  %v1867_v1 = vadd.f32 %v1866_v53, %v819_v33  ;;  %v847_v53 = vld [vmem:[%s3753_s30 + $0x1590] sm:$0xff] }
 0x173   : > { %v2922_v63 = vmax.f32 %v2921_v51, %v823_v45  ;;  %v3183_v2 = vmax.f32 %v3182_v54, %v824_v52  ;;  %v1346_v6 = vadd.f32 %v1345_v58, %v821_v43  ;;  %v2128_v8 = vadd.f32 %v2127_v60, %v820_v40  ;;  %v842_v40 = vld [vmem:[%s3753_s30 + $0x1568] sm:$0xff]  ;;  %v845_v51 = vld [vmem:[%s3753_s30 + $0x1580] sm:$0xff]  ;;  %v848_v60 = vld [vmem:[%s3753_s30 + $0x1598] sm:$0xff] }
 0x174   : > { %v1607_v7 = vadd.f32 %v1606_v59, %v822_v44  ;;  %v2401_v9 = vmax.f32 %v2400_v61, %v825_v55  ;;  %v2662_v10 = vmax.f32 %v2661_v62, %v826_v56  ;;  %v1868_v13 = vadd.f32 %v1867_v1, %v823_v45  ;;  %v851_v1 = vld [vmem:[%s3753_s30 + $0x15b0] sm:$0xff] }
 0x175   : > { %v2923_v11 = vmax.f32 %v2922_v63, %v827_v57  ;;  %v3184_v14 = vmax.f32 %v3183_v2, %v828_v0  ;;  %v1347_v18 = vadd.f32 %v1346_v6, %v825_v55  ;;  %v2129_v20 = vadd.f32 %v2128_v8, %v824_v52  ;;  %v846_v52 = vld [vmem:[%s3753_s30 + $0x1588] sm:$0xff]  ;;  %v849_v63 = vld [vmem:[%s3753_s30 + $0x15a0] sm:$0xff]  ;;  %v852_v8 = vld [vmem:[%s3753_s30 + $0x15b8] sm:$0xff] }
 0x176   : > { %v1608_v19 = vadd.f32 %v1607_v7, %v826_v56  ;;  %v2402_v21 = vmax.f32 %v2401_v9, %v829_v3  ;;  %v2663_v22 = vmax.f32 %v2662_v10, %v830_v4  ;;  %v1869_v25 = vadd.f32 %v1868_v13, %v827_v57  ;;  %v855_v13 = vld [vmem:[%s3753_s30 + $0x15d0] sm:$0xff] }
 0x177   : > { %v2924_v23 = vmax.f32 %v2923_v11, %v831_v5  ;;  %v3185_v26 = vmax.f32 %v3184_v14, %v832_v12  ;;  %v1348_v30 = vadd.f32 %v1347_v18, %v829_v3  ;;  %v2130_v32 = vadd.f32 %v2129_v20, %v828_v0  ;;  %v850_v0 = vld [vmem:[%s3753_s30 + $0x15a8] sm:$0xff]  ;;  %v853_v11 = vld [vmem:[%s3753_s30 + $0x15c0] sm:$0xff]  ;;  %v856_v20 = vld [vmem:[%s3753_s30 + $0x15d8] sm:$0xff] }
 0x178   : > { %v1609_v31 = vadd.f32 %v1608_v19, %v830_v4  ;;  %v2403_v33 = vmax.f32 %v2402_v21, %v833_v15  ;;  %v2664_v34 = vmax.f32 %v2663_v22, %v834_v16  ;;  %v1870_v37 = vadd.f32 %v1869_v25, %v831_v5  ;;  %v859_v25 = vld [vmem:[%s3753_s30 + $0x15f0] sm:$0xff] }
 0x179   : > { %v2925_v35 = vmax.f32 %v2924_v23, %v835_v17  ;;  %v3186_v38 = vmax.f32 %v3185_v26, %v836_v24  ;;  %v1349_v42 = vadd.f32 %v1348_v30, %v833_v15  ;;  %v2131_v44 = vadd.f32 %v2130_v32, %v832_v12  ;;  %v854_v12 = vld [vmem:[%s3753_s30 + $0x15c8] sm:$0xff]  ;;  %v857_v23 = vld [vmem:[%s3753_s30 + $0x15e0] sm:$0xff]  ;;  %v860_v32 = vld [vmem:[%s3753_s30 + $0x15f8] sm:$0xff] }
 0x17a   : > { %v1610_v43 = vadd.f32 %v1609_v31, %v834_v16  ;;  %v2404_v45 = vmax.f32 %v2403_v33, %v837_v27  ;;  %v2665_v46 = vmax.f32 %v2664_v34, %v838_v28  ;;  %v1871_v49 = vadd.f32 %v1870_v37, %v835_v17  ;;  %v863_v37 = vld [vmem:[%s3753_s30 + $0x1610] sm:$0xff] }
 0x17b   : > { %v2926_v47 = vmax.f32 %v2925_v35, %v839_v29  ;;  %v3187_v50 = vmax.f32 %v3186_v38, %v840_v36  ;;  %v1350_v54 = vadd.f32 %v1349_v42, %v837_v27  ;;  %v2132_v56 = vadd.f32 %v2131_v44, %v836_v24  ;;  %v858_v24 = vld [vmem:[%s3753_s30 + $0x15e8] sm:$0xff]  ;;  %v861_v35 = vld [vmem:[%s3753_s30 + $0x1600] sm:$0xff]  ;;  %v864_v44 = vld [vmem:[%s3753_s30 + $0x1618] sm:$0xff] }
 0x17c   : > { %v1611_v55 = vadd.f32 %v1610_v43, %v838_v28  ;;  %v2405_v57 = vmax.f32 %v2404_v45, %v841_v39  ;;  %v2666_v58 = vmax.f32 %v2665_v46, %v842_v40  ;;  %v1872_v61 = vadd.f32 %v1871_v49, %v839_v29  ;;  %v867_v49 = vld [vmem:[%s3753_s30 + $0x1630] sm:$0xff] }
 0x17d   : > { %v2927_v59 = vmax.f32 %v2926_v47, %v843_v41  ;;  %v3188_v62 = vmax.f32 %v3187_v50, %v844_v48  ;;  %v1351_v2 = vadd.f32 %v1350_v54, %v841_v39  ;;  %v2133_v4 = vadd.f32 %v2132_v56, %v840_v36  ;;  %v862_v36 = vld [vmem:[%s3753_s30 + $0x1608] sm:$0xff]  ;;  %v865_v47 = vld [vmem:[%s3753_s30 + $0x1620] sm:$0xff]  ;;  %v868_v56 = vld [vmem:[%s3753_s30 + $0x1638] sm:$0xff] }
 0x17e   : > { %v1612_v3 = vadd.f32 %v1611_v55, %v842_v40  ;;  %v2406_v5 = vmax.f32 %v2405_v57, %v845_v51  ;;  %v2667_v6 = vmax.f32 %v2666_v58, %v846_v52  ;;  %v1873_v9 = vadd.f32 %v1872_v61, %v843_v41  ;;  %v871_v61 = vld [vmem:[%s3753_s30 + $0x1650] sm:$0xff] }
 0x17f   : > { %v2928_v7 = vmax.f32 %v2927_v59, %v847_v53  ;;  %v3189_v10 = vmax.f32 %v3188_v62, %v848_v60  ;;  %v1352_v14 = vadd.f32 %v1351_v2, %v845_v51  ;;  %v2134_v16 = vadd.f32 %v2133_v4, %v844_v48  ;;  %v866_v48 = vld [vmem:[%s3753_s30 + $0x1628] sm:$0xff]  ;;  %v869_v59 = vld [vmem:[%s3753_s30 + $0x1640] sm:$0xff]  ;;  %v872_v4 = vld [vmem:[%s3753_s30 + $0x1658] sm:$0xff] }
 0x180   : > { %v1613_v15 = vadd.f32 %v1612_v3, %v846_v52  ;;  %v2407_v17 = vmax.f32 %v2406_v5, %v849_v63  ;;  %v2668_v18 = vmax.f32 %v2667_v6, %v850_v0  ;;  %v1874_v21 = vadd.f32 %v1873_v9, %v847_v53  ;;  %v875_v9 = vld [vmem:[%s3753_s30 + $0x1670] sm:$0xff] }
 0x181   : > { %v2929_v19 = vmax.f32 %v2928_v7, %v851_v1  ;;  %v3190_v22 = vmax.f32 %v3189_v10, %v852_v8  ;;  %v1353_v26 = vadd.f32 %v1352_v14, %v849_v63  ;;  %v2135_v28 = vadd.f32 %v2134_v16, %v848_v60  ;;  %v870_v60 = vld [vmem:[%s3753_s30 + $0x1648] sm:$0xff]  ;;  %v873_v7 = vld [vmem:[%s3753_s30 + $0x1660] sm:$0xff]  ;;  %v876_v16 = vld [vmem:[%s3753_s30 + $0x1678] sm:$0xff] }
 0x182   : > { %v1614_v27 = vadd.f32 %v1613_v15, %v850_v0  ;;  %v2408_v29 = vmax.f32 %v2407_v17, %v853_v11  ;;  %v2669_v30 = vmax.f32 %v2668_v18, %v854_v12  ;;  %v1875_v33 = vadd.f32 %v1874_v21, %v851_v1  ;;  %v879_v21 = vld [vmem:[%s3753_s30 + $0x1690] sm:$0xff] }
 0x183   : > { %v2930_v31 = vmax.f32 %v2929_v19, %v855_v13  ;;  %v3191_v34 = vmax.f32 %v3190_v22, %v856_v20  ;;  %v1354_v38 = vadd.f32 %v1353_v26, %v853_v11  ;;  %v2136_v40 = vadd.f32 %v2135_v28, %v852_v8  ;;  %v874_v8 = vld [vmem:[%s3753_s30 + $0x1668] sm:$0xff]  ;;  %v877_v19 = vld [vmem:[%s3753_s30 + $0x1680] sm:$0xff]  ;;  %v880_v28 = vld [vmem:[%s3753_s30 + $0x1698] sm:$0xff] }
 0x184   : > { %v1615_v39 = vadd.f32 %v1614_v27, %v854_v12  ;;  %v2409_v41 = vmax.f32 %v2408_v29, %v857_v23  ;;  %v2670_v42 = vmax.f32 %v2669_v30, %v858_v24  ;;  %v1876_v45 = vadd.f32 %v1875_v33, %v855_v13  ;;  %v883_v33 = vld [vmem:[%s3753_s30 + $0x16b0] sm:$0xff] }
 0x185   : > { %v2931_v43 = vmax.f32 %v2930_v31, %v859_v25  ;;  %v3192_v46 = vmax.f32 %v3191_v34, %v860_v32  ;;  %v1355_v50 = vadd.f32 %v1354_v38, %v857_v23  ;;  %v2137_v52 = vadd.f32 %v2136_v40, %v856_v20  ;;  %v878_v20 = vld [vmem:[%s3753_s30 + $0x1688] sm:$0xff]  ;;  %v881_v31 = vld [vmem:[%s3753_s30 + $0x16a0] sm:$0xff]  ;;  %v884_v40 = vld [vmem:[%s3753_s30 + $0x16b8] sm:$0xff] }
 0x186   : > { %v1616_v51 = vadd.f32 %v1615_v39, %v858_v24  ;;  %v2410_v53 = vmax.f32 %v2409_v41, %v861_v35  ;;  %v2671_v54 = vmax.f32 %v2670_v42, %v862_v36  ;;  %v1877_v57 = vadd.f32 %v1876_v45, %v859_v25  ;;  %v887_v45 = vld [vmem:[%s3753_s30 + $0x16d0] sm:$0xff] }
 0x187   : > { %v2932_v55 = vmax.f32 %v2931_v43, %v863_v37  ;;  %v3193_v58 = vmax.f32 %v3192_v46, %v864_v44  ;;  %v1356_v62 = vadd.f32 %v1355_v50, %v861_v35  ;;  %v2138_v0 = vadd.f32 %v2137_v52, %v860_v32  ;;  %v882_v32 = vld [vmem:[%s3753_s30 + $0x16a8] sm:$0xff]  ;;  %v885_v43 = vld [vmem:[%s3753_s30 + $0x16c0] sm:$0xff]  ;;  %v888_v52 = vld [vmem:[%s3753_s30 + $0x16d8] sm:$0xff] }
 0x188   : > { %v1617_v63 = vadd.f32 %v1616_v51, %v862_v36  ;;  %v2411_v1 = vmax.f32 %v2410_v53, %v865_v47  ;;  %v2672_v2 = vmax.f32 %v2671_v54, %v866_v48  ;;  %v1878_v5 = vadd.f32 %v1877_v57, %v863_v37  ;;  %v891_v57 = vld [vmem:[%s3753_s30 + $0x16f0] sm:$0xff] }
 0x189   : > { %v2933_v3 = vmax.f32 %v2932_v55, %v867_v49  ;;  %v3194_v6 = vmax.f32 %v3193_v58, %v868_v56  ;;  %v1357_v10 = vadd.f32 %v1356_v62, %v865_v47  ;;  %v2139_v12 = vadd.f32 %v2138_v0, %v864_v44  ;;  %v886_v44 = vld [vmem:[%s3753_s30 + $0x16c8] sm:$0xff]  ;;  %v889_v55 = vld [vmem:[%s3753_s30 + $0x16e0] sm:$0xff]  ;;  %v892_v0 = vld [vmem:[%s3753_s30 + $0x16f8] sm:$0xff] }
 0x18a   : > { %v1618_v11 = vadd.f32 %v1617_v63, %v866_v48  ;;  %v2412_v13 = vmax.f32 %v2411_v1, %v869_v59  ;;  %v2673_v14 = vmax.f32 %v2672_v2, %v870_v60  ;;  %v1879_v17 = vadd.f32 %v1878_v5, %v867_v49  ;;  %v895_v5 = vld [vmem:[%s3753_s30 + $0x1710] sm:$0xff] }
 0x18b   : > { %v2934_v15 = vmax.f32 %v2933_v3, %v871_v61  ;;  %v3195_v18 = vmax.f32 %v3194_v6, %v872_v4  ;;  %v1358_v22 = vadd.f32 %v1357_v10, %v869_v59  ;;  %v2140_v24 = vadd.f32 %v2139_v12, %v868_v56  ;;  %v890_v56 = vld [vmem:[%s3753_s30 + $0x16e8] sm:$0xff]  ;;  %v893_v3 = vld [vmem:[%s3753_s30 + $0x1700] sm:$0xff]  ;;  %v896_v12 = vld [vmem:[%s3753_s30 + $0x1718] sm:$0xff] }
 0x18c   : > { %v1619_v23 = vadd.f32 %v1618_v11, %v870_v60  ;;  %v2413_v25 = vmax.f32 %v2412_v13, %v873_v7  ;;  %v2674_v26 = vmax.f32 %v2673_v14, %v874_v8  ;;  %v1880_v29 = vadd.f32 %v1879_v17, %v871_v61  ;;  %v899_v17 = vld [vmem:[%s3753_s30 + $0x1730] sm:$0xff] }
 0x18d   : > { %v2935_v27 = vmax.f32 %v2934_v15, %v875_v9  ;;  %v3196_v30 = vmax.f32 %v3195_v18, %v876_v16  ;;  %v1359_v34 = vadd.f32 %v1358_v22, %v873_v7  ;;  %v2141_v36 = vadd.f32 %v2140_v24, %v872_v4  ;;  %v894_v4 = vld [vmem:[%s3753_s30 + $0x1708] sm:$0xff]  ;;  %v897_v15 = vld [vmem:[%s3753_s30 + $0x1720] sm:$0xff]  ;;  %v900_v24 = vld [vmem:[%s3753_s30 + $0x1738] sm:$0xff] }
 0x18e   : > { %v1620_v35 = vadd.f32 %v1619_v23, %v874_v8  ;;  %v2414_v37 = vmax.f32 %v2413_v25, %v877_v19  ;;  %v2675_v38 = vmax.f32 %v2674_v26, %v878_v20  ;;  %v1881_v41 = vadd.f32 %v1880_v29, %v875_v9  ;;  %v903_v29 = vld [vmem:[%s3753_s30 + $0x1750] sm:$0xff] }
 0x18f   : > { %v2936_v39 = vmax.f32 %v2935_v27, %v879_v21  ;;  %v3197_v42 = vmax.f32 %v3196_v30, %v880_v28  ;;  %v1360_v46 = vadd.f32 %v1359_v34, %v877_v19  ;;  %v2142_v48 = vadd.f32 %v2141_v36, %v876_v16  ;;  %v898_v16 = vld [vmem:[%s3753_s30 + $0x1728] sm:$0xff]  ;;  %v901_v27 = vld [vmem:[%s3753_s30 + $0x1740] sm:$0xff]  ;;  %v904_v36 = vld [vmem:[%s3753_s30 + $0x1758] sm:$0xff] }
 0x190   : > { %v1621_v47 = vadd.f32 %v1620_v35, %v878_v20  ;;  %v2415_v49 = vmax.f32 %v2414_v37, %v881_v31  ;;  %v2676_v50 = vmax.f32 %v2675_v38, %v882_v32  ;;  %v1882_v53 = vadd.f32 %v1881_v41, %v879_v21  ;;  %v907_v41 = vld [vmem:[%s3753_s30 + $0x1770] sm:$0xff] }
 0x191   : > { %v2937_v51 = vmax.f32 %v2936_v39, %v883_v33  ;;  %v3198_v54 = vmax.f32 %v3197_v42, %v884_v40  ;;  %v1361_v58 = vadd.f32 %v1360_v46, %v881_v31  ;;  %v2143_v60 = vadd.f32 %v2142_v48, %v880_v28  ;;  %v902_v28 = vld [vmem:[%s3753_s30 + $0x1748] sm:$0xff]  ;;  %v905_v39 = vld [vmem:[%s3753_s30 + $0x1760] sm:$0xff]  ;;  %v908_v48 = vld [vmem:[%s3753_s30 + $0x1778] sm:$0xff] }
 0x192   : > { %v1622_v59 = vadd.f32 %v1621_v47, %v882_v32  ;;  %v2416_v61 = vmax.f32 %v2415_v49, %v885_v43  ;;  %v2677_v62 = vmax.f32 %v2676_v50, %v886_v44  ;;  %v1883_v1 = vadd.f32 %v1882_v53, %v883_v33  ;;  %v911_v53 = vld [vmem:[%s3753_s30 + $0x1790] sm:$0xff] }
 0x193   : > { %v2938_v63 = vmax.f32 %v2937_v51, %v887_v45  ;;  %v3199_v2 = vmax.f32 %v3198_v54, %v888_v52  ;;  %v1362_v6 = vadd.f32 %v1361_v58, %v885_v43  ;;  %v2144_v8 = vadd.f32 %v2143_v60, %v884_v40  ;;  %v906_v40 = vld [vmem:[%s3753_s30 + $0x1768] sm:$0xff]  ;;  %v909_v51 = vld [vmem:[%s3753_s30 + $0x1780] sm:$0xff]  ;;  %v912_v60 = vld [vmem:[%s3753_s30 + $0x1798] sm:$0xff] }
 0x194   : > { %v1623_v7 = vadd.f32 %v1622_v59, %v886_v44  ;;  %v2417_v9 = vmax.f32 %v2416_v61, %v889_v55  ;;  %v2678_v10 = vmax.f32 %v2677_v62, %v890_v56  ;;  %v1884_v13 = vadd.f32 %v1883_v1, %v887_v45  ;;  %v915_v1 = vld [vmem:[%s3753_s30 + $0x17b0] sm:$0xff] }
 0x195   : > { %v2939_v11 = vmax.f32 %v2938_v63, %v891_v57  ;;  %v3200_v14 = vmax.f32 %v3199_v2, %v892_v0  ;;  %v1363_v18 = vadd.f32 %v1362_v6, %v889_v55  ;;  %v2145_v20 = vadd.f32 %v2144_v8, %v888_v52  ;;  %v910_v52 = vld [vmem:[%s3753_s30 + $0x1788] sm:$0xff]  ;;  %v913_v63 = vld [vmem:[%s3753_s30 + $0x17a0] sm:$0xff]  ;;  %v916_v8 = vld [vmem:[%s3753_s30 + $0x17b8] sm:$0xff] }
 0x196   : > { %v1624_v19 = vadd.f32 %v1623_v7, %v890_v56  ;;  %v2418_v21 = vmax.f32 %v2417_v9, %v893_v3  ;;  %v2679_v22 = vmax.f32 %v2678_v10, %v894_v4  ;;  %v1885_v25 = vadd.f32 %v1884_v13, %v891_v57  ;;  %v919_v13 = vld [vmem:[%s3753_s30 + $0x17d0] sm:$0xff] }
 0x197   : > { %v2940_v23 = vmax.f32 %v2939_v11, %v895_v5  ;;  %v3201_v26 = vmax.f32 %v3200_v14, %v896_v12  ;;  %v1364_v30 = vadd.f32 %v1363_v18, %v893_v3  ;;  %v2146_v32 = vadd.f32 %v2145_v20, %v892_v0  ;;  %v914_v0 = vld [vmem:[%s3753_s30 + $0x17a8] sm:$0xff]  ;;  %v917_v11 = vld [vmem:[%s3753_s30 + $0x17c0] sm:$0xff]  ;;  %v920_v20 = vld [vmem:[%s3753_s30 + $0x17d8] sm:$0xff] }
 0x198   : > { %v1625_v31 = vadd.f32 %v1624_v19, %v894_v4  ;;  %v2419_v33 = vmax.f32 %v2418_v21, %v897_v15  ;;  %v2680_v34 = vmax.f32 %v2679_v22, %v898_v16  ;;  %v1886_v37 = vadd.f32 %v1885_v25, %v895_v5  ;;  %v923_v25 = vld [vmem:[%s3753_s30 + $0x17f0] sm:$0xff] }
 0x199   : > { %v2941_v35 = vmax.f32 %v2940_v23, %v899_v17  ;;  %v3202_v38 = vmax.f32 %v3201_v26, %v900_v24  ;;  %v1365_v42 = vadd.f32 %v1364_v30, %v897_v15  ;;  %v2147_v44 = vadd.f32 %v2146_v32, %v896_v12  ;;  %v918_v12 = vld [vmem:[%s3753_s30 + $0x17c8] sm:$0xff]  ;;  %v921_v23 = vld [vmem:[%s3753_s30 + $0x17e0] sm:$0xff]  ;;  %v924_v32 = vld [vmem:[%s3753_s30 + $0x17f8] sm:$0xff] }
 0x19a   : > { %v1626_v43 = vadd.f32 %v1625_v31, %v898_v16  ;;  %v2420_v45 = vmax.f32 %v2419_v33, %v901_v27  ;;  %v2681_v46 = vmax.f32 %v2680_v34, %v902_v28  ;;  %v1887_v49 = vadd.f32 %v1886_v37, %v899_v17  ;;  %v927_v37 = vld [vmem:[%s3753_s30 + $0x1810] sm:$0xff] }
 0x19b   : > { %v2942_v47 = vmax.f32 %v2941_v35, %v903_v29  ;;  %v3203_v50 = vmax.f32 %v3202_v38, %v904_v36  ;;  %v1366_v54 = vadd.f32 %v1365_v42, %v901_v27  ;;  %v2148_v56 = vadd.f32 %v2147_v44, %v900_v24  ;;  %v922_v24 = vld [vmem:[%s3753_s30 + $0x17e8] sm:$0xff]  ;;  %v925_v35 = vld [vmem:[%s3753_s30 + $0x1800] sm:$0xff]  ;;  %v928_v44 = vld [vmem:[%s3753_s30 + $0x1818] sm:$0xff] }
 0x19c   : > { %v1627_v55 = vadd.f32 %v1626_v43, %v902_v28  ;;  %v2421_v57 = vmax.f32 %v2420_v45, %v905_v39  ;;  %v2682_v58 = vmax.f32 %v2681_v46, %v906_v40  ;;  %v1888_v61 = vadd.f32 %v1887_v49, %v903_v29  ;;  %v931_v49 = vld [vmem:[%s3753_s30 + $0x1830] sm:$0xff] }
 0x19d   : > { %v2943_v59 = vmax.f32 %v2942_v47, %v907_v41  ;;  %v3204_v62 = vmax.f32 %v3203_v50, %v908_v48  ;;  %v1367_v2 = vadd.f32 %v1366_v54, %v905_v39  ;;  %v2149_v4 = vadd.f32 %v2148_v56, %v904_v36  ;;  %v926_v36 = vld [vmem:[%s3753_s30 + $0x1808] sm:$0xff]  ;;  %v929_v47 = vld [vmem:[%s3753_s30 + $0x1820] sm:$0xff]  ;;  %v932_v56 = vld [vmem:[%s3753_s30 + $0x1838] sm:$0xff] }
 0x19e   : > { %v1628_v3 = vadd.f32 %v1627_v55, %v906_v40  ;;  %v2422_v5 = vmax.f32 %v2421_v57, %v909_v51  ;;  %v2683_v6 = vmax.f32 %v2682_v58, %v910_v52  ;;  %v1889_v9 = vadd.f32 %v1888_v61, %v907_v41  ;;  %v935_v61 = vld [vmem:[%s3753_s30 + $0x1850] sm:$0xff] }
 0x19f   : > { %v2944_v7 = vmax.f32 %v2943_v59, %v911_v53  ;;  %v3205_v10 = vmax.f32 %v3204_v62, %v912_v60  ;;  %v1368_v14 = vadd.f32 %v1367_v2, %v909_v51  ;;  %v2150_v16 = vadd.f32 %v2149_v4, %v908_v48  ;;  %v930_v48 = vld [vmem:[%s3753_s30 + $0x1828] sm:$0xff]  ;;  %v933_v59 = vld [vmem:[%s3753_s30 + $0x1840] sm:$0xff]  ;;  %v936_v4 = vld [vmem:[%s3753_s30 + $0x1858] sm:$0xff] }
 0x1a0   : > { %v1629_v15 = vadd.f32 %v1628_v3, %v910_v52  ;;  %v2423_v17 = vmax.f32 %v2422_v5, %v913_v63  ;;  %v2684_v18 = vmax.f32 %v2683_v6, %v914_v0  ;;  %v1890_v21 = vadd.f32 %v1889_v9, %v911_v53  ;;  %v939_v9 = vld [vmem:[%s3753_s30 + $0x1870] sm:$0xff] }
 0x1a1   : > { %v2945_v19 = vmax.f32 %v2944_v7, %v915_v1  ;;  %v3206_v22 = vmax.f32 %v3205_v10, %v916_v8  ;;  %v1369_v26 = vadd.f32 %v1368_v14, %v913_v63  ;;  %v2151_v28 = vadd.f32 %v2150_v16, %v912_v60  ;;  %v934_v60 = vld [vmem:[%s3753_s30 + $0x1848] sm:$0xff]  ;;  %v937_v7 = vld [vmem:[%s3753_s30 + $0x1860] sm:$0xff]  ;;  %v940_v16 = vld [vmem:[%s3753_s30 + $0x1878] sm:$0xff] }
 0x1a2   : > { %v1630_v27 = vadd.f32 %v1629_v15, %v914_v0  ;;  %v2424_v29 = vmax.f32 %v2423_v17, %v917_v11  ;;  %v2685_v30 = vmax.f32 %v2684_v18, %v918_v12  ;;  %v1891_v33 = vadd.f32 %v1890_v21, %v915_v1  ;;  %v943_v21 = vld [vmem:[%s3753_s30 + $0x1890] sm:$0xff] }
 0x1a3   : > { %v2946_v31 = vmax.f32 %v2945_v19, %v919_v13  ;;  %v3207_v34 = vmax.f32 %v3206_v22, %v920_v20  ;;  %v1370_v38 = vadd.f32 %v1369_v26, %v917_v11  ;;  %v2152_v40 = vadd.f32 %v2151_v28, %v916_v8  ;;  %v938_v8 = vld [vmem:[%s3753_s30 + $0x1868] sm:$0xff]  ;;  %v941_v19 = vld [vmem:[%s3753_s30 + $0x1880] sm:$0xff]  ;;  %v944_v28 = vld [vmem:[%s3753_s30 + $0x1898] sm:$0xff] }
 0x1a4   : > { %v1631_v39 = vadd.f32 %v1630_v27, %v918_v12  ;;  %v2425_v41 = vmax.f32 %v2424_v29, %v921_v23  ;;  %v2686_v42 = vmax.f32 %v2685_v30, %v922_v24  ;;  %v1892_v45 = vadd.f32 %v1891_v33, %v919_v13  ;;  %v947_v33 = vld [vmem:[%s3753_s30 + $0x18b0] sm:$0xff] }
 0x1a5   : > { %v2947_v43 = vmax.f32 %v2946_v31, %v923_v25  ;;  %v3208_v46 = vmax.f32 %v3207_v34, %v924_v32  ;;  %v1371_v50 = vadd.f32 %v1370_v38, %v921_v23  ;;  %v2153_v52 = vadd.f32 %v2152_v40, %v920_v20  ;;  %v942_v20 = vld [vmem:[%s3753_s30 + $0x1888] sm:$0xff]  ;;  %v945_v31 = vld [vmem:[%s3753_s30 + $0x18a0] sm:$0xff]  ;;  %v948_v40 = vld [vmem:[%s3753_s30 + $0x18b8] sm:$0xff] }
 0x1a6   : > { %v1632_v51 = vadd.f32 %v1631_v39, %v922_v24  ;;  %v2426_v53 = vmax.f32 %v2425_v41, %v925_v35  ;;  %v2687_v54 = vmax.f32 %v2686_v42, %v926_v36  ;;  %v1893_v57 = vadd.f32 %v1892_v45, %v923_v25  ;;  %v951_v45 = vld [vmem:[%s3753_s30 + $0x18d0] sm:$0xff] }
 0x1a7   : > { %v2948_v55 = vmax.f32 %v2947_v43, %v927_v37  ;;  %v3209_v58 = vmax.f32 %v3208_v46, %v928_v44  ;;  %v1372_v62 = vadd.f32 %v1371_v50, %v925_v35  ;;  %v2154_v0 = vadd.f32 %v2153_v52, %v924_v32  ;;  %v946_v32 = vld [vmem:[%s3753_s30 + $0x18a8] sm:$0xff]  ;;  %v949_v43 = vld [vmem:[%s3753_s30 + $0x18c0] sm:$0xff]  ;;  %v952_v52 = vld [vmem:[%s3753_s30 + $0x18d8] sm:$0xff] }
 0x1a8   : > { %v1633_v63 = vadd.f32 %v1632_v51, %v926_v36  ;;  %v2427_v1 = vmax.f32 %v2426_v53, %v929_v47  ;;  %v2688_v2 = vmax.f32 %v2687_v54, %v930_v48  ;;  %v1894_v5 = vadd.f32 %v1893_v57, %v927_v37  ;;  %v955_v57 = vld [vmem:[%s3753_s30 + $0x18f0] sm:$0xff] }
 0x1a9   : > { %v2949_v3 = vmax.f32 %v2948_v55, %v931_v49  ;;  %v3210_v6 = vmax.f32 %v3209_v58, %v932_v56  ;;  %v1373_v10 = vadd.f32 %v1372_v62, %v929_v47  ;;  %v2155_v12 = vadd.f32 %v2154_v0, %v928_v44  ;;  %v950_v44 = vld [vmem:[%s3753_s30 + $0x18c8] sm:$0xff]  ;;  %v953_v55 = vld [vmem:[%s3753_s30 + $0x18e0] sm:$0xff]  ;;  %v956_v0 = vld [vmem:[%s3753_s30 + $0x18f8] sm:$0xff] }
 0x1aa   : > { %v1634_v11 = vadd.f32 %v1633_v63, %v930_v48  ;;  %v2428_v13 = vmax.f32 %v2427_v1, %v933_v59  ;;  %v2689_v14 = vmax.f32 %v2688_v2, %v934_v60  ;;  %v1895_v17 = vadd.f32 %v1894_v5, %v931_v49  ;;  %v959_v5 = vld [vmem:[%s3753_s30 + $0x1910] sm:$0xff] }
 0x1ab   : > { %v2950_v15 = vmax.f32 %v2949_v3, %v935_v61  ;;  %v3211_v18 = vmax.f32 %v3210_v6, %v936_v4  ;;  %v1374_v22 = vadd.f32 %v1373_v10, %v933_v59  ;;  %v2156_v24 = vadd.f32 %v2155_v12, %v932_v56  ;;  %v954_v56 = vld [vmem:[%s3753_s30 + $0x18e8] sm:$0xff]  ;;  %v957_v3 = vld [vmem:[%s3753_s30 + $0x1900] sm:$0xff]  ;;  %v960_v12 = vld [vmem:[%s3753_s30 + $0x1918] sm:$0xff] }
 0x1ac   : > { %v1635_v23 = vadd.f32 %v1634_v11, %v934_v60  ;;  %v2429_v25 = vmax.f32 %v2428_v13, %v937_v7  ;;  %v2690_v26 = vmax.f32 %v2689_v14, %v938_v8  ;;  %v1896_v29 = vadd.f32 %v1895_v17, %v935_v61  ;;  %v963_v17 = vld [vmem:[%s3753_s30 + $0x1930] sm:$0xff] }
 0x1ad   : > { %v2951_v27 = vmax.f32 %v2950_v15, %v939_v9  ;;  %v3212_v30 = vmax.f32 %v3211_v18, %v940_v16  ;;  %v1375_v34 = vadd.f32 %v1374_v22, %v937_v7  ;;  %v2157_v36 = vadd.f32 %v2156_v24, %v936_v4  ;;  %v958_v4 = vld [vmem:[%s3753_s30 + $0x1908] sm:$0xff]  ;;  %v961_v15 = vld [vmem:[%s3753_s30 + $0x1920] sm:$0xff]  ;;  %v964_v24 = vld [vmem:[%s3753_s30 + $0x1938] sm:$0xff] }
 0x1ae   : > { %v1636_v35 = vadd.f32 %v1635_v23, %v938_v8  ;;  %v2430_v37 = vmax.f32 %v2429_v25, %v941_v19  ;;  %v2691_v38 = vmax.f32 %v2690_v26, %v942_v20  ;;  %v1897_v41 = vadd.f32 %v1896_v29, %v939_v9  ;;  %v967_v29 = vld [vmem:[%s3753_s30 + $0x1950] sm:$0xff] }
 0x1af   : > { %v2952_v39 = vmax.f32 %v2951_v27, %v943_v21  ;;  %v3213_v42 = vmax.f32 %v3212_v30, %v944_v28  ;;  %v1376_v46 = vadd.f32 %v1375_v34, %v941_v19  ;;  %v2158_v48 = vadd.f32 %v2157_v36, %v940_v16  ;;  %v962_v16 = vld [vmem:[%s3753_s30 + $0x1928] sm:$0xff]  ;;  %v965_v27 = vld [vmem:[%s3753_s30 + $0x1940] sm:$0xff]  ;;  %v968_v36 = vld [vmem:[%s3753_s30 + $0x1958] sm:$0xff] }
 0x1b0   : > { %v1637_v47 = vadd.f32 %v1636_v35, %v942_v20  ;;  %v2431_v49 = vmax.f32 %v2430_v37, %v945_v31  ;;  %v2692_v50 = vmax.f32 %v2691_v38, %v946_v32  ;;  %v1898_v53 = vadd.f32 %v1897_v41, %v943_v21  ;;  %v971_v41 = vld [vmem:[%s3753_s30 + $0x1970] sm:$0xff] }
 0x1b1   : > { %v2953_v51 = vmax.f32 %v2952_v39, %v947_v33  ;;  %v3214_v54 = vmax.f32 %v3213_v42, %v948_v40  ;;  %v1377_v58 = vadd.f32 %v1376_v46, %v945_v31  ;;  %v2159_v60 = vadd.f32 %v2158_v48, %v944_v28  ;;  %v966_v28 = vld [vmem:[%s3753_s30 + $0x1948] sm:$0xff]  ;;  %v969_v39 = vld [vmem:[%s3753_s30 + $0x1960] sm:$0xff]  ;;  %v972_v48 = vld [vmem:[%s3753_s30 + $0x1978] sm:$0xff] }
 0x1b2   : > { %v1638_v59 = vadd.f32 %v1637_v47, %v946_v32  ;;  %v2432_v61 = vmax.f32 %v2431_v49, %v949_v43  ;;  %v2693_v62 = vmax.f32 %v2692_v50, %v950_v44  ;;  %v1899_v1 = vadd.f32 %v1898_v53, %v947_v33  ;;  %v975_v53 = vld [vmem:[%s3753_s30 + $0x1990] sm:$0xff] }
 0x1b3   : > { %v2954_v63 = vmax.f32 %v2953_v51, %v951_v45  ;;  %v3215_v2 = vmax.f32 %v3214_v54, %v952_v52  ;;  %v1378_v6 = vadd.f32 %v1377_v58, %v949_v43  ;;  %v2160_v8 = vadd.f32 %v2159_v60, %v948_v40  ;;  %v970_v40 = vld [vmem:[%s3753_s30 + $0x1968] sm:$0xff]  ;;  %v973_v51 = vld [vmem:[%s3753_s30 + $0x1980] sm:$0xff]  ;;  %v976_v60 = vld [vmem:[%s3753_s30 + $0x1998] sm:$0xff] }
 0x1b4   : > { %v1639_v7 = vadd.f32 %v1638_v59, %v950_v44  ;;  %v2433_v9 = vmax.f32 %v2432_v61, %v953_v55  ;;  %v2694_v10 = vmax.f32 %v2693_v62, %v954_v56  ;;  %v1900_v13 = vadd.f32 %v1899_v1, %v951_v45  ;;  %v979_v1 = vld [vmem:[%s3753_s30 + $0x19b0] sm:$0xff] }
 0x1b5   : > { %v2955_v11 = vmax.f32 %v2954_v63, %v955_v57  ;;  %v3216_v14 = vmax.f32 %v3215_v2, %v956_v0  ;;  %v1379_v18 = vadd.f32 %v1378_v6, %v953_v55  ;;  %v2161_v20 = vadd.f32 %v2160_v8, %v952_v52  ;;  %v974_v52 = vld [vmem:[%s3753_s30 + $0x1988] sm:$0xff]  ;;  %v977_v63 = vld [vmem:[%s3753_s30 + $0x19a0] sm:$0xff]  ;;  %v980_v8 = vld [vmem:[%s3753_s30 + $0x19b8] sm:$0xff] }
 0x1b6   : > { %v1640_v19 = vadd.f32 %v1639_v7, %v954_v56  ;;  %v2434_v21 = vmax.f32 %v2433_v9, %v957_v3  ;;  %v2695_v22 = vmax.f32 %v2694_v10, %v958_v4  ;;  %v1901_v25 = vadd.f32 %v1900_v13, %v955_v57  ;;  %v983_v13 = vld [vmem:[%s3753_s30 + $0x19d0] sm:$0xff] }
 0x1b7   : > { %v2956_v23 = vmax.f32 %v2955_v11, %v959_v5  ;;  %v3217_v26 = vmax.f32 %v3216_v14, %v960_v12  ;;  %v1380_v30 = vadd.f32 %v1379_v18, %v957_v3  ;;  %v2162_v32 = vadd.f32 %v2161_v20, %v956_v0  ;;  %v978_v0 = vld [vmem:[%s3753_s30 + $0x19a8] sm:$0xff]  ;;  %v981_v11 = vld [vmem:[%s3753_s30 + $0x19c0] sm:$0xff]  ;;  %v984_v20 = vld [vmem:[%s3753_s30 + $0x19d8] sm:$0xff] }
 0x1b8   : > { %v1641_v31 = vadd.f32 %v1640_v19, %v958_v4  ;;  %v2435_v33 = vmax.f32 %v2434_v21, %v961_v15  ;;  %v2696_v34 = vmax.f32 %v2695_v22, %v962_v16  ;;  %v1902_v37 = vadd.f32 %v1901_v25, %v959_v5  ;;  %v987_v25 = vld [vmem:[%s3753_s30 + $0x19f0] sm:$0xff] }
 0x1b9   : > { %v2957_v35 = vmax.f32 %v2956_v23, %v963_v17  ;;  %v3218_v38 = vmax.f32 %v3217_v26, %v964_v24  ;;  %v1381_v42 = vadd.f32 %v1380_v30, %v961_v15  ;;  %v2163_v44 = vadd.f32 %v2162_v32, %v960_v12  ;;  %v982_v12 = vld [vmem:[%s3753_s30 + $0x19c8] sm:$0xff]  ;;  %v985_v23 = vld [vmem:[%s3753_s30 + $0x19e0] sm:$0xff]  ;;  %v988_v32 = vld [vmem:[%s3753_s30 + $0x19f8] sm:$0xff] }
 0x1ba   : > { %v1642_v43 = vadd.f32 %v1641_v31, %v962_v16  ;;  %v2436_v45 = vmax.f32 %v2435_v33, %v965_v27  ;;  %v2697_v46 = vmax.f32 %v2696_v34, %v966_v28  ;;  %v1903_v49 = vadd.f32 %v1902_v37, %v963_v17  ;;  %v991_v37 = vld [vmem:[%s3753_s30 + $0x1a10] sm:$0xff] }
 0x1bb   : > { %v2958_v47 = vmax.f32 %v2957_v35, %v967_v29  ;;  %v3219_v50 = vmax.f32 %v3218_v38, %v968_v36  ;;  %v1382_v54 = vadd.f32 %v1381_v42, %v965_v27  ;;  %v2164_v56 = vadd.f32 %v2163_v44, %v964_v24  ;;  %v986_v24 = vld [vmem:[%s3753_s30 + $0x19e8] sm:$0xff]  ;;  %v989_v35 = vld [vmem:[%s3753_s30 + $0x1a00] sm:$0xff]  ;;  %v992_v44 = vld [vmem:[%s3753_s30 + $0x1a18] sm:$0xff] }
 0x1bc   : > { %v1643_v55 = vadd.f32 %v1642_v43, %v966_v28  ;;  %v2437_v57 = vmax.f32 %v2436_v45, %v969_v39  ;;  %v2698_v58 = vmax.f32 %v2697_v46, %v970_v40  ;;  %v1904_v61 = vadd.f32 %v1903_v49, %v967_v29  ;;  %v995_v49 = vld [vmem:[%s3753_s30 + $0x1a30] sm:$0xff] }
 0x1bd   : > { %v2959_v59 = vmax.f32 %v2958_v47, %v971_v41  ;;  %v3220_v62 = vmax.f32 %v3219_v50, %v972_v48  ;;  %v1383_v2 = vadd.f32 %v1382_v54, %v969_v39  ;;  %v2165_v4 = vadd.f32 %v2164_v56, %v968_v36  ;;  %v990_v36 = vld [vmem:[%s3753_s30 + $0x1a08] sm:$0xff]  ;;  %v993_v47 = vld [vmem:[%s3753_s30 + $0x1a20] sm:$0xff]  ;;  %v996_v56 = vld [vmem:[%s3753_s30 + $0x1a38] sm:$0xff] }
 0x1be   : > { %v1644_v3 = vadd.f32 %v1643_v55, %v970_v40  ;;  %v2438_v5 = vmax.f32 %v2437_v57, %v973_v51  ;;  %v2699_v6 = vmax.f32 %v2698_v58, %v974_v52  ;;  %v1905_v9 = vadd.f32 %v1904_v61, %v971_v41  ;;  %v999_v61 = vld [vmem:[%s3753_s30 + $0x1a50] sm:$0xff] }
 0x1bf   : > { %v2960_v7 = vmax.f32 %v2959_v59, %v975_v53  ;;  %v3221_v10 = vmax.f32 %v3220_v62, %v976_v60  ;;  %v1384_v14 = vadd.f32 %v1383_v2, %v973_v51  ;;  %v2166_v16 = vadd.f32 %v2165_v4, %v972_v48  ;;  %v994_v48 = vld [vmem:[%s3753_s30 + $0x1a28] sm:$0xff]  ;;  %v997_v59 = vld [vmem:[%s3753_s30 + $0x1a40] sm:$0xff]  ;;  %v1000_v4 = vld [vmem:[%s3753_s30 + $0x1a58] sm:$0xff] }
 0x1c0   : > { %v1645_v15 = vadd.f32 %v1644_v3, %v974_v52  ;;  %v2439_v17 = vmax.f32 %v2438_v5, %v977_v63  ;;  %v2700_v18 = vmax.f32 %v2699_v6, %v978_v0  ;;  %v1906_v21 = vadd.f32 %v1905_v9, %v975_v53  ;;  %v1003_v9 = vld [vmem:[%s3753_s30 + $0x1a70] sm:$0xff] }
 0x1c1   : > { %v2961_v19 = vmax.f32 %v2960_v7, %v979_v1  ;;  %v3222_v22 = vmax.f32 %v3221_v10, %v980_v8  ;;  %v1385_v26 = vadd.f32 %v1384_v14, %v977_v63  ;;  %v2167_v28 = vadd.f32 %v2166_v16, %v976_v60  ;;  %v998_v60 = vld [vmem:[%s3753_s30 + $0x1a48] sm:$0xff]  ;;  %v1001_v7 = vld [vmem:[%s3753_s30 + $0x1a60] sm:$0xff]  ;;  %v1004_v16 = vld [vmem:[%s3753_s30 + $0x1a78] sm:$0xff] }
 0x1c2   : > { %v1646_v27 = vadd.f32 %v1645_v15, %v978_v0  ;;  %v2440_v29 = vmax.f32 %v2439_v17, %v981_v11  ;;  %v2701_v30 = vmax.f32 %v2700_v18, %v982_v12  ;;  %v1907_v33 = vadd.f32 %v1906_v21, %v979_v1  ;;  %v1007_v21 = vld [vmem:[%s3753_s30 + $0x1a90] sm:$0xff] }
 0x1c3   : > { %v2962_v31 = vmax.f32 %v2961_v19, %v983_v13  ;;  %v3223_v34 = vmax.f32 %v3222_v22, %v984_v20  ;;  %v1386_v38 = vadd.f32 %v1385_v26, %v981_v11  ;;  %v2168_v40 = vadd.f32 %v2167_v28, %v980_v8  ;;  %v1002_v8 = vld [vmem:[%s3753_s30 + $0x1a68] sm:$0xff]  ;;  %v1005_v19 = vld [vmem:[%s3753_s30 + $0x1a80] sm:$0xff]  ;;  %v1008_v28 = vld [vmem:[%s3753_s30 + $0x1a98] sm:$0xff] }
 0x1c4   : > { %v1647_v39 = vadd.f32 %v1646_v27, %v982_v12  ;;  %v2441_v41 = vmax.f32 %v2440_v29, %v985_v23  ;;  %v2702_v42 = vmax.f32 %v2701_v30, %v986_v24  ;;  %v1908_v45 = vadd.f32 %v1907_v33, %v983_v13  ;;  %v1011_v33 = vld [vmem:[%s3753_s30 + $0x1ab0] sm:$0xff] }
 0x1c5   : > { %v2963_v43 = vmax.f32 %v2962_v31, %v987_v25  ;;  %v3224_v46 = vmax.f32 %v3223_v34, %v988_v32  ;;  %v1387_v50 = vadd.f32 %v1386_v38, %v985_v23  ;;  %v2169_v52 = vadd.f32 %v2168_v40, %v984_v20  ;;  %v1006_v20 = vld [vmem:[%s3753_s30 + $0x1a88] sm:$0xff]  ;;  %v1009_v31 = vld [vmem:[%s3753_s30 + $0x1aa0] sm:$0xff]  ;;  %v1012_v40 = vld [vmem:[%s3753_s30 + $0x1ab8] sm:$0xff] }
 0x1c6   : > { %v1648_v51 = vadd.f32 %v1647_v39, %v986_v24  ;;  %v2442_v53 = vmax.f32 %v2441_v41, %v989_v35  ;;  %v2703_v54 = vmax.f32 %v2702_v42, %v990_v36  ;;  %v1909_v57 = vadd.f32 %v1908_v45, %v987_v25  ;;  %v1015_v45 = vld [vmem:[%s3753_s30 + $0x1ad0] sm:$0xff] }
 0x1c7   : > { %v2964_v55 = vmax.f32 %v2963_v43, %v991_v37  ;;  %v3225_v58 = vmax.f32 %v3224_v46, %v992_v44  ;;  %v1388_v62 = vadd.f32 %v1387_v50, %v989_v35  ;;  %v2170_v0 = vadd.f32 %v2169_v52, %v988_v32  ;;  %v1010_v32 = vld [vmem:[%s3753_s30 + $0x1aa8] sm:$0xff]  ;;  %v1013_v43 = vld [vmem:[%s3753_s30 + $0x1ac0] sm:$0xff]  ;;  %v1016_v52 = vld [vmem:[%s3753_s30 + $0x1ad8] sm:$0xff] }
 0x1c8   : > { %v1649_v63 = vadd.f32 %v1648_v51, %v990_v36  ;;  %v2443_v1 = vmax.f32 %v2442_v53, %v993_v47  ;;  %v2704_v2 = vmax.f32 %v2703_v54, %v994_v48  ;;  %v1910_v5 = vadd.f32 %v1909_v57, %v991_v37  ;;  %v1019_v57 = vld [vmem:[%s3753_s30 + $0x1af0] sm:$0xff] }
 0x1c9   : > { %v2965_v3 = vmax.f32 %v2964_v55, %v995_v49  ;;  %v3226_v6 = vmax.f32 %v3225_v58, %v996_v56  ;;  %v1389_v10 = vadd.f32 %v1388_v62, %v993_v47  ;;  %v2171_v12 = vadd.f32 %v2170_v0, %v992_v44  ;;  %v1014_v44 = vld [vmem:[%s3753_s30 + $0x1ac8] sm:$0xff]  ;;  %v1017_v55 = vld [vmem:[%s3753_s30 + $0x1ae0] sm:$0xff]  ;;  %v1020_v0 = vld [vmem:[%s3753_s30 + $0x1af8] sm:$0xff] }
 0x1ca   : > { %v1650_v11 = vadd.f32 %v1649_v63, %v994_v48  ;;  %v2444_v13 = vmax.f32 %v2443_v1, %v997_v59  ;;  %v2705_v14 = vmax.f32 %v2704_v2, %v998_v60  ;;  %v1911_v17 = vadd.f32 %v1910_v5, %v995_v49  ;;  %v1023_v5 = vld [vmem:[%s3753_s30 + $0x1b10] sm:$0xff] }
 0x1cb   : > { %v2966_v15 = vmax.f32 %v2965_v3, %v999_v61  ;;  %v3227_v18 = vmax.f32 %v3226_v6, %v1000_v4  ;;  %v1390_v22 = vadd.f32 %v1389_v10, %v997_v59  ;;  %v2172_v24 = vadd.f32 %v2171_v12, %v996_v56  ;;  %v1018_v56 = vld [vmem:[%s3753_s30 + $0x1ae8] sm:$0xff]  ;;  %v1021_v3 = vld [vmem:[%s3753_s30 + $0x1b00] sm:$0xff]  ;;  %v1024_v12 = vld [vmem:[%s3753_s30 + $0x1b18] sm:$0xff] }
 0x1cc   : > { %v1651_v23 = vadd.f32 %v1650_v11, %v998_v60  ;;  %v2445_v25 = vmax.f32 %v2444_v13, %v1001_v7  ;;  %v2706_v26 = vmax.f32 %v2705_v14, %v1002_v8  ;;  %v1912_v29 = vadd.f32 %v1911_v17, %v999_v61  ;;  %v1027_v17 = vld [vmem:[%s3753_s30 + $0x1b30] sm:$0xff] }
 0x1cd   : > { %v2967_v27 = vmax.f32 %v2966_v15, %v1003_v9  ;;  %v3228_v30 = vmax.f32 %v3227_v18, %v1004_v16  ;;  %v1391_v34 = vadd.f32 %v1390_v22, %v1001_v7  ;;  %v2173_v36 = vadd.f32 %v2172_v24, %v1000_v4  ;;  %v1022_v4 = vld [vmem:[%s3753_s30 + $0x1b08] sm:$0xff]  ;;  %v1025_v15 = vld [vmem:[%s3753_s30 + $0x1b20] sm:$0xff]  ;;  %v1028_v24 = vld [vmem:[%s3753_s30 + $0x1b38] sm:$0xff] }
 0x1ce   : > { %v1652_v35 = vadd.f32 %v1651_v23, %v1002_v8  ;;  %v2446_v37 = vmax.f32 %v2445_v25, %v1005_v19  ;;  %v2707_v38 = vmax.f32 %v2706_v26, %v1006_v20  ;;  %v1913_v41 = vadd.f32 %v1912_v29, %v1003_v9  ;;  %v1031_v29 = vld [vmem:[%s3753_s30 + $0x1b50] sm:$0xff] }
 0x1cf   : > { %v2968_v39 = vmax.f32 %v2967_v27, %v1007_v21  ;;  %v3229_v42 = vmax.f32 %v3228_v30, %v1008_v28  ;;  %v1392_v46 = vadd.f32 %v1391_v34, %v1005_v19  ;;  %v2174_v48 = vadd.f32 %v2173_v36, %v1004_v16  ;;  %v1026_v16 = vld [vmem:[%s3753_s30 + $0x1b28] sm:$0xff]  ;;  %v1029_v27 = vld [vmem:[%s3753_s30 + $0x1b40] sm:$0xff]  ;;  %v1032_v36 = vld [vmem:[%s3753_s30 + $0x1b58] sm:$0xff] }
 0x1d0   : > { %v1653_v47 = vadd.f32 %v1652_v35, %v1006_v20  ;;  %v2447_v49 = vmax.f32 %v2446_v37, %v1009_v31  ;;  %v2708_v50 = vmax.f32 %v2707_v38, %v1010_v32  ;;  %v1914_v53 = vadd.f32 %v1913_v41, %v1007_v21  ;;  %v1035_v41 = vld [vmem:[%s3753_s30 + $0x1b70] sm:$0xff] }
 0x1d1   : > { %v2969_v51 = vmax.f32 %v2968_v39, %v1011_v33  ;;  %v3230_v54 = vmax.f32 %v3229_v42, %v1012_v40  ;;  %v1393_v58 = vadd.f32 %v1392_v46, %v1009_v31  ;;  %v2175_v60 = vadd.f32 %v2174_v48, %v1008_v28  ;;  %v1030_v28 = vld [vmem:[%s3753_s30 + $0x1b48] sm:$0xff]  ;;  %v1033_v39 = vld [vmem:[%s3753_s30 + $0x1b60] sm:$0xff]  ;;  %v1036_v48 = vld [vmem:[%s3753_s30 + $0x1b78] sm:$0xff] }
 0x1d2   : > { %v1654_v59 = vadd.f32 %v1653_v47, %v1010_v32  ;;  %v2448_v61 = vmax.f32 %v2447_v49, %v1013_v43  ;;  %v2709_v62 = vmax.f32 %v2708_v50, %v1014_v44  ;;  %v1915_v1 = vadd.f32 %v1914_v53, %v1011_v33  ;;  %v1039_v53 = vld [vmem:[%s3753_s30 + $0x1b90] sm:$0xff] }
 0x1d3   : > { %v2970_v63 = vmax.f32 %v2969_v51, %v1015_v45  ;;  %v3231_v2 = vmax.f32 %v3230_v54, %v1016_v52  ;;  %v1394_v6 = vadd.f32 %v1393_v58, %v1013_v43  ;;  %v2176_v8 = vadd.f32 %v2175_v60, %v1012_v40  ;;  %v1034_v40 = vld [vmem:[%s3753_s30 + $0x1b68] sm:$0xff]  ;;  %v1037_v51 = vld [vmem:[%s3753_s30 + $0x1b80] sm:$0xff]  ;;  %v1040_v60 = vld [vmem:[%s3753_s30 + $0x1b98] sm:$0xff] }
 0x1d4   : > { %v1655_v7 = vadd.f32 %v1654_v59, %v1014_v44  ;;  %v2449_v9 = vmax.f32 %v2448_v61, %v1017_v55  ;;  %v2710_v10 = vmax.f32 %v2709_v62, %v1018_v56  ;;  %v1916_v13 = vadd.f32 %v1915_v1, %v1015_v45  ;;  %v1043_v1 = vld [vmem:[%s3753_s30 + $0x1bb0] sm:$0xff] }
 0x1d5   : > { %v2971_v11 = vmax.f32 %v2970_v63, %v1019_v57  ;;  %v3232_v14 = vmax.f32 %v3231_v2, %v1020_v0  ;;  %v1395_v18 = vadd.f32 %v1394_v6, %v1017_v55  ;;  %v2177_v20 = vadd.f32 %v2176_v8, %v1016_v52  ;;  %v1038_v52 = vld [vmem:[%s3753_s30 + $0x1b88] sm:$0xff]  ;;  %v1041_v63 = vld [vmem:[%s3753_s30 + $0x1ba0] sm:$0xff]  ;;  %v1044_v8 = vld [vmem:[%s3753_s30 + $0x1bb8] sm:$0xff] }
 0x1d6   : > { %v1656_v19 = vadd.f32 %v1655_v7, %v1018_v56  ;;  %v2450_v21 = vmax.f32 %v2449_v9, %v1021_v3  ;;  %v2711_v22 = vmax.f32 %v2710_v10, %v1022_v4  ;;  %v1917_v25 = vadd.f32 %v1916_v13, %v1019_v57  ;;  %v1047_v13 = vld [vmem:[%s3753_s30 + $0x1bd0] sm:$0xff] }
 0x1d7   : > { %v2972_v23 = vmax.f32 %v2971_v11, %v1023_v5  ;;  %v3233_v26 = vmax.f32 %v3232_v14, %v1024_v12  ;;  %v1396_v30 = vadd.f32 %v1395_v18, %v1021_v3  ;;  %v2178_v32 = vadd.f32 %v2177_v20, %v1020_v0  ;;  %v1042_v0 = vld [vmem:[%s3753_s30 + $0x1ba8] sm:$0xff]  ;;  %v1045_v11 = vld [vmem:[%s3753_s30 + $0x1bc0] sm:$0xff]  ;;  %v1048_v20 = vld [vmem:[%s3753_s30 + $0x1bd8] sm:$0xff] }
 0x1d8   : > { %v1657_v31 = vadd.f32 %v1656_v19, %v1022_v4  ;;  %v2451_v33 = vmax.f32 %v2450_v21, %v1025_v15  ;;  %v2712_v34 = vmax.f32 %v2711_v22, %v1026_v16  ;;  %v1918_v37 = vadd.f32 %v1917_v25, %v1023_v5  ;;  %v1051_v25 = vld [vmem:[%s3753_s30 + $0x1bf0] sm:$0xff] }
 0x1d9   : > { %v2973_v35 = vmax.f32 %v2972_v23, %v1027_v17  ;;  %v3234_v38 = vmax.f32 %v3233_v26, %v1028_v24  ;;  %v1397_v42 = vadd.f32 %v1396_v30, %v1025_v15  ;;  %v2179_v44 = vadd.f32 %v2178_v32, %v1024_v12  ;;  %v1046_v12 = vld [vmem:[%s3753_s30 + $0x1bc8] sm:$0xff]  ;;  %v1049_v23 = vld [vmem:[%s3753_s30 + $0x1be0] sm:$0xff]  ;;  %v1052_v32 = vld [vmem:[%s3753_s30 + $0x1bf8] sm:$0xff] }
 0x1da   : > { %v1658_v43 = vadd.f32 %v1657_v31, %v1026_v16  ;;  %v2452_v45 = vmax.f32 %v2451_v33, %v1029_v27  ;;  %v2713_v46 = vmax.f32 %v2712_v34, %v1030_v28  ;;  %v1919_v49 = vadd.f32 %v1918_v37, %v1027_v17  ;;  %v1055_v37 = vld [vmem:[%s3753_s30 + $0x1c10] sm:$0xff] }
 0x1db   : > { %v2974_v47 = vmax.f32 %v2973_v35, %v1031_v29  ;;  %v3235_v50 = vmax.f32 %v3234_v38, %v1032_v36  ;;  %v1398_v54 = vadd.f32 %v1397_v42, %v1029_v27  ;;  %v2180_v56 = vadd.f32 %v2179_v44, %v1028_v24  ;;  %v1050_v24 = vld [vmem:[%s3753_s30 + $0x1be8] sm:$0xff]  ;;  %v1053_v35 = vld [vmem:[%s3753_s30 + $0x1c00] sm:$0xff]  ;;  %v1056_v44 = vld [vmem:[%s3753_s30 + $0x1c18] sm:$0xff] }
 0x1dc   : > { %v1659_v55 = vadd.f32 %v1658_v43, %v1030_v28  ;;  %v2453_v57 = vmax.f32 %v2452_v45, %v1033_v39  ;;  %v2714_v58 = vmax.f32 %v2713_v46, %v1034_v40  ;;  %v1920_v61 = vadd.f32 %v1919_v49, %v1031_v29  ;;  %v1059_v49 = vld [vmem:[%s3753_s30 + $0x1c30] sm:$0xff] }
 0x1dd   : > { %v2975_v59 = vmax.f32 %v2974_v47, %v1035_v41  ;;  %v3236_v62 = vmax.f32 %v3235_v50, %v1036_v48  ;;  %v1399_v2 = vadd.f32 %v1398_v54, %v1033_v39  ;;  %v2181_v4 = vadd.f32 %v2180_v56, %v1032_v36  ;;  %v1054_v36 = vld [vmem:[%s3753_s30 + $0x1c08] sm:$0xff]  ;;  %v1057_v47 = vld [vmem:[%s3753_s30 + $0x1c20] sm:$0xff]  ;;  %v1060_v56 = vld [vmem:[%s3753_s30 + $0x1c38] sm:$0xff] }
 0x1de   : > { %v1660_v3 = vadd.f32 %v1659_v55, %v1034_v40  ;;  %v2454_v5 = vmax.f32 %v2453_v57, %v1037_v51  ;;  %v2715_v6 = vmax.f32 %v2714_v58, %v1038_v52  ;;  %v1921_v9 = vadd.f32 %v1920_v61, %v1035_v41  ;;  %v1063_v61 = vld [vmem:[%s3753_s30 + $0x1c50] sm:$0xff] }
 0x1df   : > { %v2976_v7 = vmax.f32 %v2975_v59, %v1039_v53  ;;  %v3237_v10 = vmax.f32 %v3236_v62, %v1040_v60  ;;  %v1400_v14 = vadd.f32 %v1399_v2, %v1037_v51  ;;  %v2182_v16 = vadd.f32 %v2181_v4, %v1036_v48  ;;  %v1058_v48 = vld [vmem:[%s3753_s30 + $0x1c28] sm:$0xff]  ;;  %v1061_v59 = vld [vmem:[%s3753_s30 + $0x1c40] sm:$0xff]  ;;  %v1064_v4 = vld [vmem:[%s3753_s30 + $0x1c58] sm:$0xff] }
 0x1e0   : > { %v1661_v15 = vadd.f32 %v1660_v3, %v1038_v52  ;;  %v2455_v17 = vmax.f32 %v2454_v5, %v1041_v63  ;;  %v2716_v18 = vmax.f32 %v2715_v6, %v1042_v0  ;;  %v1922_v21 = vadd.f32 %v1921_v9, %v1039_v53  ;;  %v1067_v9 = vld [vmem:[%s3753_s30 + $0x1c70] sm:$0xff] }
 0x1e1   : > { %v2977_v19 = vmax.f32 %v2976_v7, %v1043_v1  ;;  %v3238_v22 = vmax.f32 %v3237_v10, %v1044_v8  ;;  %v1401_v26 = vadd.f32 %v1400_v14, %v1041_v63  ;;  %v2183_v28 = vadd.f32 %v2182_v16, %v1040_v60  ;;  %v1062_v60 = vld [vmem:[%s3753_s30 + $0x1c48] sm:$0xff]  ;;  %v1065_v7 = vld [vmem:[%s3753_s30 + $0x1c60] sm:$0xff]  ;;  %v1068_v16 = vld [vmem:[%s3753_s30 + $0x1c78] sm:$0xff] }
 0x1e2   : > { %v1662_v27 = vadd.f32 %v1661_v15, %v1042_v0  ;;  %v2456_v29 = vmax.f32 %v2455_v17, %v1045_v11  ;;  %v2717_v30 = vmax.f32 %v2716_v18, %v1046_v12  ;;  %v1923_v33 = vadd.f32 %v1922_v21, %v1043_v1  ;;  %v1071_v21 = vld [vmem:[%s3753_s30 + $0x1c90] sm:$0xff] }
 0x1e3   : > { %v2978_v31 = vmax.f32 %v2977_v19, %v1047_v13  ;;  %v3239_v34 = vmax.f32 %v3238_v22, %v1048_v20  ;;  %v1402_v38 = vadd.f32 %v1401_v26, %v1045_v11  ;;  %v2184_v40 = vadd.f32 %v2183_v28, %v1044_v8  ;;  %v1066_v8 = vld [vmem:[%s3753_s30 + $0x1c68] sm:$0xff]  ;;  %v1069_v19 = vld [vmem:[%s3753_s30 + $0x1c80] sm:$0xff]  ;;  %v1072_v28 = vld [vmem:[%s3753_s30 + $0x1c98] sm:$0xff] }
 0x1e4   : > { %v1663_v39 = vadd.f32 %v1662_v27, %v1046_v12  ;;  %v2457_v41 = vmax.f32 %v2456_v29, %v1049_v23  ;;  %v2718_v42 = vmax.f32 %v2717_v30, %v1050_v24  ;;  %v1924_v45 = vadd.f32 %v1923_v33, %v1047_v13  ;;  %v1075_v33 = vld [vmem:[%s3753_s30 + $0x1cb0] sm:$0xff] }
 0x1e5   : > { %v2979_v43 = vmax.f32 %v2978_v31, %v1051_v25  ;;  %v3240_v46 = vmax.f32 %v3239_v34, %v1052_v32  ;;  %v1403_v50 = vadd.f32 %v1402_v38, %v1049_v23  ;;  %v2185_v52 = vadd.f32 %v2184_v40, %v1048_v20  ;;  %v1070_v20 = vld [vmem:[%s3753_s30 + $0x1c88] sm:$0xff]  ;;  %v1073_v31 = vld [vmem:[%s3753_s30 + $0x1ca0] sm:$0xff]  ;;  %v1076_v40 = vld [vmem:[%s3753_s30 + $0x1cb8] sm:$0xff] }
 0x1e6   : > { %v1664_v51 = vadd.f32 %v1663_v39, %v1050_v24  ;;  %v2458_v53 = vmax.f32 %v2457_v41, %v1053_v35  ;;  %v2719_v54 = vmax.f32 %v2718_v42, %v1054_v36  ;;  %v1925_v57 = vadd.f32 %v1924_v45, %v1051_v25  ;;  %v1079_v45 = vld [vmem:[%s3753_s30 + $0x1cd0] sm:$0xff] }
 0x1e7   : > { %v2980_v55 = vmax.f32 %v2979_v43, %v1055_v37  ;;  %v3241_v58 = vmax.f32 %v3240_v46, %v1056_v44  ;;  %v1404_v62 = vadd.f32 %v1403_v50, %v1053_v35  ;;  %v2186_v0 = vadd.f32 %v2185_v52, %v1052_v32  ;;  %v1074_v32 = vld [vmem:[%s3753_s30 + $0x1ca8] sm:$0xff]  ;;  %v1077_v43 = vld [vmem:[%s3753_s30 + $0x1cc0] sm:$0xff]  ;;  %v1080_v52 = vld [vmem:[%s3753_s30 + $0x1cd8] sm:$0xff] }
 0x1e8   : > { %v1665_v63 = vadd.f32 %v1664_v51, %v1054_v36  ;;  %v2459_v1 = vmax.f32 %v2458_v53, %v1057_v47  ;;  %v2720_v2 = vmax.f32 %v2719_v54, %v1058_v48  ;;  %v1926_v5 = vadd.f32 %v1925_v57, %v1055_v37  ;;  %v1083_v57 = vld [vmem:[%s3753_s30 + $0x1cf0] sm:$0xff] }
 0x1e9   : > { %v2981_v3 = vmax.f32 %v2980_v55, %v1059_v49  ;;  %v3242_v6 = vmax.f32 %v3241_v58, %v1060_v56  ;;  %v1405_v10 = vadd.f32 %v1404_v62, %v1057_v47  ;;  %v2187_v12 = vadd.f32 %v2186_v0, %v1056_v44  ;;  %v1078_v44 = vld [vmem:[%s3753_s30 + $0x1cc8] sm:$0xff]  ;;  %v1081_v55 = vld [vmem:[%s3753_s30 + $0x1ce0] sm:$0xff]  ;;  %v1084_v0 = vld [vmem:[%s3753_s30 + $0x1cf8] sm:$0xff] }
 0x1ea   : > { %v1666_v11 = vadd.f32 %v1665_v63, %v1058_v48  ;;  %v2460_v13 = vmax.f32 %v2459_v1, %v1061_v59  ;;  %v2721_v14 = vmax.f32 %v2720_v2, %v1062_v60  ;;  %v1927_v17 = vadd.f32 %v1926_v5, %v1059_v49  ;;  %v1087_v5 = vld [vmem:[%s3753_s30 + $0x1d10] sm:$0xff] }
 0x1eb   : > { %v2982_v15 = vmax.f32 %v2981_v3, %v1063_v61  ;;  %v3243_v18 = vmax.f32 %v3242_v6, %v1064_v4  ;;  %v1406_v22 = vadd.f32 %v1405_v10, %v1061_v59  ;;  %v2188_v24 = vadd.f32 %v2187_v12, %v1060_v56  ;;  %v1082_v56 = vld [vmem:[%s3753_s30 + $0x1ce8] sm:$0xff]  ;;  %v1085_v3 = vld [vmem:[%s3753_s30 + $0x1d00] sm:$0xff]  ;;  %v1088_v12 = vld [vmem:[%s3753_s30 + $0x1d18] sm:$0xff] }
 0x1ec   : > { %v1667_v23 = vadd.f32 %v1666_v11, %v1062_v60  ;;  %v2461_v25 = vmax.f32 %v2460_v13, %v1065_v7  ;;  %v2722_v26 = vmax.f32 %v2721_v14, %v1066_v8  ;;  %v1928_v29 = vadd.f32 %v1927_v17, %v1063_v61  ;;  %v1091_v17 = vld [vmem:[%s3753_s30 + $0x1d30] sm:$0xff] }
 0x1ed   : > { %v2983_v27 = vmax.f32 %v2982_v15, %v1067_v9  ;;  %v3244_v30 = vmax.f32 %v3243_v18, %v1068_v16  ;;  %v1407_v34 = vadd.f32 %v1406_v22, %v1065_v7  ;;  %v2189_v36 = vadd.f32 %v2188_v24, %v1064_v4  ;;  %v1086_v4 = vld [vmem:[%s3753_s30 + $0x1d08] sm:$0xff]  ;;  %v1089_v15 = vld [vmem:[%s3753_s30 + $0x1d20] sm:$0xff]  ;;  %v1092_v24 = vld [vmem:[%s3753_s30 + $0x1d38] sm:$0xff] }
 0x1ee   : > { %v1668_v35 = vadd.f32 %v1667_v23, %v1066_v8  ;;  %v2462_v37 = vmax.f32 %v2461_v25, %v1069_v19  ;;  %v2723_v38 = vmax.f32 %v2722_v26, %v1070_v20  ;;  %v1929_v41 = vadd.f32 %v1928_v29, %v1067_v9  ;;  %v1095_v29 = vld [vmem:[%s3753_s30 + $0x1d50] sm:$0xff] }
 0x1ef   : > { %v2984_v39 = vmax.f32 %v2983_v27, %v1071_v21  ;;  %v3245_v42 = vmax.f32 %v3244_v30, %v1072_v28  ;;  %v1408_v46 = vadd.f32 %v1407_v34, %v1069_v19  ;;  %v2190_v48 = vadd.f32 %v2189_v36, %v1068_v16  ;;  %v1090_v16 = vld [vmem:[%s3753_s30 + $0x1d28] sm:$0xff]  ;;  %v1093_v27 = vld [vmem:[%s3753_s30 + $0x1d40] sm:$0xff]  ;;  %v1096_v36 = vld [vmem:[%s3753_s30 + $0x1d58] sm:$0xff] }
 0x1f0   : > { %v1669_v47 = vadd.f32 %v1668_v35, %v1070_v20  ;;  %v2463_v49 = vmax.f32 %v2462_v37, %v1073_v31  ;;  %v2724_v50 = vmax.f32 %v2723_v38, %v1074_v32  ;;  %v1930_v53 = vadd.f32 %v1929_v41, %v1071_v21  ;;  %v1099_v41 = vld [vmem:[%s3753_s30 + $0x1d70] sm:$0xff] }
 0x1f1   : > { %v2985_v51 = vmax.f32 %v2984_v39, %v1075_v33  ;;  %v3246_v54 = vmax.f32 %v3245_v42, %v1076_v40  ;;  %v1409_v58 = vadd.f32 %v1408_v46, %v1073_v31  ;;  %v2191_v60 = vadd.f32 %v2190_v48, %v1072_v28  ;;  %v1094_v28 = vld [vmem:[%s3753_s30 + $0x1d48] sm:$0xff]  ;;  %v1097_v39 = vld [vmem:[%s3753_s30 + $0x1d60] sm:$0xff]  ;;  %v1100_v48 = vld [vmem:[%s3753_s30 + $0x1d78] sm:$0xff] }
 0x1f2   : > { %v1670_v59 = vadd.f32 %v1669_v47, %v1074_v32  ;;  %v2464_v61 = vmax.f32 %v2463_v49, %v1077_v43  ;;  %v2725_v62 = vmax.f32 %v2724_v50, %v1078_v44  ;;  %v1931_v1 = vadd.f32 %v1930_v53, %v1075_v33  ;;  %v1103_v53 = vld [vmem:[%s3753_s30 + $0x1d90] sm:$0xff] }
 0x1f3   : > { %v2986_v63 = vmax.f32 %v2985_v51, %v1079_v45  ;;  %v3247_v2 = vmax.f32 %v3246_v54, %v1080_v52  ;;  %v1410_v6 = vadd.f32 %v1409_v58, %v1077_v43  ;;  %v2192_v8 = vadd.f32 %v2191_v60, %v1076_v40  ;;  %v1098_v40 = vld [vmem:[%s3753_s30 + $0x1d68] sm:$0xff]  ;;  %v1101_v51 = vld [vmem:[%s3753_s30 + $0x1d80] sm:$0xff]  ;;  %v1104_v60 = vld [vmem:[%s3753_s30 + $0x1d98] sm:$0xff] }
 0x1f4   : > { %v1671_v7 = vadd.f32 %v1670_v59, %v1078_v44  ;;  %v2465_v9 = vmax.f32 %v2464_v61, %v1081_v55  ;;  %v2726_v10 = vmax.f32 %v2725_v62, %v1082_v56  ;;  %v1932_v13 = vadd.f32 %v1931_v1, %v1079_v45  ;;  %v1107_v1 = vld [vmem:[%s3753_s30 + $0x1db0] sm:$0xff] }
 0x1f5   : > { %v2987_v11 = vmax.f32 %v2986_v63, %v1083_v57  ;;  %v3248_v14 = vmax.f32 %v3247_v2, %v1084_v0  ;;  %v1411_v18 = vadd.f32 %v1410_v6, %v1081_v55  ;;  %v2193_v20 = vadd.f32 %v2192_v8, %v1080_v52  ;;  %v1102_v52 = vld [vmem:[%s3753_s30 + $0x1d88] sm:$0xff]  ;;  %v1105_v63 = vld [vmem:[%s3753_s30 + $0x1da0] sm:$0xff]  ;;  %v1108_v8 = vld [vmem:[%s3753_s30 + $0x1db8] sm:$0xff] }
 0x1f6   : > { %v1672_v19 = vadd.f32 %v1671_v7, %v1082_v56  ;;  %v2466_v21 = vmax.f32 %v2465_v9, %v1085_v3  ;;  %v2727_v22 = vmax.f32 %v2726_v10, %v1086_v4  ;;  %v1933_v25 = vadd.f32 %v1932_v13, %v1083_v57  ;;  %v1111_v13 = vld [vmem:[%s3753_s30 + $0x1dd0] sm:$0xff] }
 0x1f7   : > { %v2988_v23 = vmax.f32 %v2987_v11, %v1087_v5  ;;  %v3249_v26 = vmax.f32 %v3248_v14, %v1088_v12  ;;  %v1412_v30 = vadd.f32 %v1411_v18, %v1085_v3  ;;  %v2194_v32 = vadd.f32 %v2193_v20, %v1084_v0  ;;  %v1106_v0 = vld [vmem:[%s3753_s30 + $0x1da8] sm:$0xff]  ;;  %v1109_v11 = vld [vmem:[%s3753_s30 + $0x1dc0] sm:$0xff]  ;;  %v1112_v20 = vld [vmem:[%s3753_s30 + $0x1dd8] sm:$0xff] }
 0x1f8   : > { %v1673_v31 = vadd.f32 %v1672_v19, %v1086_v4  ;;  %v2467_v33 = vmax.f32 %v2466_v21, %v1089_v15  ;;  %v2728_v34 = vmax.f32 %v2727_v22, %v1090_v16  ;;  %v1934_v37 = vadd.f32 %v1933_v25, %v1087_v5  ;;  %v1115_v25 = vld [vmem:[%s3753_s30 + $0x1df0] sm:$0xff] }
 0x1f9   : > { %v2989_v35 = vmax.f32 %v2988_v23, %v1091_v17  ;;  %v3250_v38 = vmax.f32 %v3249_v26, %v1092_v24  ;;  %v1413_v42 = vadd.f32 %v1412_v30, %v1089_v15  ;;  %v2195_v44 = vadd.f32 %v2194_v32, %v1088_v12  ;;  %v1110_v12 = vld [vmem:[%s3753_s30 + $0x1dc8] sm:$0xff]  ;;  %v1113_v23 = vld [vmem:[%s3753_s30 + $0x1de0] sm:$0xff]  ;;  %v1116_v32 = vld [vmem:[%s3753_s30 + $0x1df8] sm:$0xff] }
 0x1fa   : > { %v1674_v43 = vadd.f32 %v1673_v31, %v1090_v16  ;;  %v2468_v45 = vmax.f32 %v2467_v33, %v1093_v27  ;;  %v2729_v46 = vmax.f32 %v2728_v34, %v1094_v28  ;;  %v1935_v49 = vadd.f32 %v1934_v37, %v1091_v17  ;;  %v1119_v37 = vld [vmem:[%s3753_s30 + $0x1e10] sm:$0xff] }
 0x1fb   : > { %v2990_v47 = vmax.f32 %v2989_v35, %v1095_v29  ;;  %v3251_v50 = vmax.f32 %v3250_v38, %v1096_v36  ;;  %v1414_v54 = vadd.f32 %v1413_v42, %v1093_v27  ;;  %v2196_v56 = vadd.f32 %v2195_v44, %v1092_v24  ;;  %v1114_v24 = vld [vmem:[%s3753_s30 + $0x1de8] sm:$0xff]  ;;  %v1117_v35 = vld [vmem:[%s3753_s30 + $0x1e00] sm:$0xff]  ;;  %v1120_v44 = vld [vmem:[%s3753_s30 + $0x1e18] sm:$0xff] }
 0x1fc   : > { %v1675_v55 = vadd.f32 %v1674_v43, %v1094_v28  ;;  %v2469_v57 = vmax.f32 %v2468_v45, %v1097_v39  ;;  %v2730_v58 = vmax.f32 %v2729_v46, %v1098_v40  ;;  %v1936_v61 = vadd.f32 %v1935_v49, %v1095_v29  ;;  %v1123_v49 = vld [vmem:[%s3753_s30 + $0x1e30] sm:$0xff] }
 0x1fd   : > { %v2991_v59 = vmax.f32 %v2990_v47, %v1099_v41  ;;  %v3252_v62 = vmax.f32 %v3251_v50, %v1100_v48  ;;  %v1415_v2 = vadd.f32 %v1414_v54, %v1097_v39  ;;  %v2197_v4 = vadd.f32 %v2196_v56, %v1096_v36  ;;  %v1118_v36 = vld [vmem:[%s3753_s30 + $0x1e08] sm:$0xff]  ;;  %v1121_v47 = vld [vmem:[%s3753_s30 + $0x1e20] sm:$0xff]  ;;  %v1124_v56 = vld [vmem:[%s3753_s30 + $0x1e38] sm:$0xff] }
 0x1fe   : > { %v1676_v3 = vadd.f32 %v1675_v55, %v1098_v40  ;;  %v2470_v5 = vmax.f32 %v2469_v57, %v1101_v51  ;;  %v2731_v6 = vmax.f32 %v2730_v58, %v1102_v52  ;;  %v1937_v9 = vadd.f32 %v1936_v61, %v1099_v41  ;;  %v1127_v61 = vld [vmem:[%s3753_s30 + $0x1e50] sm:$0xff] }
 0x1ff   : > { %v2992_v7 = vmax.f32 %v2991_v59, %v1103_v53  ;;  %v3253_v10 = vmax.f32 %v3252_v62, %v1104_v60  ;;  %v1416_v14 = vadd.f32 %v1415_v2, %v1101_v51  ;;  %v2198_v16 = vadd.f32 %v2197_v4, %v1100_v48  ;;  %v1122_v48 = vld [vmem:[%s3753_s30 + $0x1e28] sm:$0xff]  ;;  %v1125_v59 = vld [vmem:[%s3753_s30 + $0x1e40] sm:$0xff]  ;;  %v1128_v4 = vld [vmem:[%s3753_s30 + $0x1e58] sm:$0xff] }
 0x200   : > { %v1677_v15 = vadd.f32 %v1676_v3, %v1102_v52  ;;  %v2471_v17 = vmax.f32 %v2470_v5, %v1105_v63  ;;  %v2732_v18 = vmax.f32 %v2731_v6, %v1106_v0  ;;  %v1938_v21 = vadd.f32 %v1937_v9, %v1103_v53  ;;  %v1131_v9 = vld [vmem:[%s3753_s30 + $0x1e70] sm:$0xff] }
 0x201   : > { %v2993_v19 = vmax.f32 %v2992_v7, %v1107_v1  ;;  %v3254_v22 = vmax.f32 %v3253_v10, %v1108_v8  ;;  %v1417_v26 = vadd.f32 %v1416_v14, %v1105_v63  ;;  %v2199_v28 = vadd.f32 %v2198_v16, %v1104_v60  ;;  %v1126_v60 = vld [vmem:[%s3753_s30 + $0x1e48] sm:$0xff]  ;;  %v1129_v7 = vld [vmem:[%s3753_s30 + $0x1e60] sm:$0xff]  ;;  %v1132_v16 = vld [vmem:[%s3753_s30 + $0x1e78] sm:$0xff] }
 0x202   : > { %v1678_v27 = vadd.f32 %v1677_v15, %v1106_v0  ;;  %v2472_v29 = vmax.f32 %v2471_v17, %v1109_v11  ;;  %v2733_v30 = vmax.f32 %v2732_v18, %v1110_v12  ;;  %v1939_v33 = vadd.f32 %v1938_v21, %v1107_v1  ;;  %v1135_v21 = vld [vmem:[%s3753_s30 + $0x1e90] sm:$0xff] }
 0x203   : > { %v2994_v31 = vmax.f32 %v2993_v19, %v1111_v13  ;;  %v3255_v34 = vmax.f32 %v3254_v22, %v1112_v20  ;;  %v1418_v38 = vadd.f32 %v1417_v26, %v1109_v11  ;;  %v2200_v40 = vadd.f32 %v2199_v28, %v1108_v8  ;;  %v1130_v8 = vld [vmem:[%s3753_s30 + $0x1e68] sm:$0xff]  ;;  %v1133_v19 = vld [vmem:[%s3753_s30 + $0x1e80] sm:$0xff]  ;;  %v1136_v28 = vld [vmem:[%s3753_s30 + $0x1e98] sm:$0xff] }
 0x204   : > { %v1679_v39 = vadd.f32 %v1678_v27, %v1110_v12  ;;  %v2473_v41 = vmax.f32 %v2472_v29, %v1113_v23  ;;  %v2734_v42 = vmax.f32 %v2733_v30, %v1114_v24  ;;  %v1940_v45 = vadd.f32 %v1939_v33, %v1111_v13  ;;  %v1139_v33 = vld [vmem:[%s3753_s30 + $0x1eb0] sm:$0xff] }
 0x205   : > { %v2995_v43 = vmax.f32 %v2994_v31, %v1115_v25  ;;  %v3256_v46 = vmax.f32 %v3255_v34, %v1116_v32  ;;  %v1419_v50 = vadd.f32 %v1418_v38, %v1113_v23  ;;  %v2201_v52 = vadd.f32 %v2200_v40, %v1112_v20  ;;  %v1134_v20 = vld [vmem:[%s3753_s30 + $0x1e88] sm:$0xff]  ;;  %v1137_v31 = vld [vmem:[%s3753_s30 + $0x1ea0] sm:$0xff]  ;;  %v1140_v40 = vld [vmem:[%s3753_s30 + $0x1eb8] sm:$0xff] }
 0x206   : > { %v1680_v51 = vadd.f32 %v1679_v39, %v1114_v24  ;;  %v2474_v53 = vmax.f32 %v2473_v41, %v1117_v35  ;;  %v2735_v54 = vmax.f32 %v2734_v42, %v1118_v36  ;;  %v1941_v57 = vadd.f32 %v1940_v45, %v1115_v25  ;;  %v1143_v45 = vld [vmem:[%s3753_s30 + $0x1ed0] sm:$0xff] }
 0x207   : > { %v2996_v55 = vmax.f32 %v2995_v43, %v1119_v37  ;;  %v3257_v58 = vmax.f32 %v3256_v46, %v1120_v44  ;;  %v1420_v62 = vadd.f32 %v1419_v50, %v1117_v35  ;;  %v2202_v0 = vadd.f32 %v2201_v52, %v1116_v32  ;;  %v1138_v32 = vld [vmem:[%s3753_s30 + $0x1ea8] sm:$0xff]  ;;  %v1141_v43 = vld [vmem:[%s3753_s30 + $0x1ec0] sm:$0xff]  ;;  %v1144_v52 = vld [vmem:[%s3753_s30 + $0x1ed8] sm:$0xff] }
 0x208   : > { %v1681_v63 = vadd.f32 %v1680_v51, %v1118_v36  ;;  %v2475_v1 = vmax.f32 %v2474_v53, %v1121_v47  ;;  %v2736_v2 = vmax.f32 %v2735_v54, %v1122_v48  ;;  %v1942_v5 = vadd.f32 %v1941_v57, %v1119_v37  ;;  %v1147_v57 = vld [vmem:[%s3753_s30 + $0x1ef0] sm:$0xff] }
 0x209   : > { %v2997_v3 = vmax.f32 %v2996_v55, %v1123_v49  ;;  %v3258_v6 = vmax.f32 %v3257_v58, %v1124_v56  ;;  %v1421_v10 = vadd.f32 %v1420_v62, %v1121_v47  ;;  %v2203_v12 = vadd.f32 %v2202_v0, %v1120_v44  ;;  %v1142_v44 = vld [vmem:[%s3753_s30 + $0x1ec8] sm:$0xff]  ;;  %v1145_v55 = vld [vmem:[%s3753_s30 + $0x1ee0] sm:$0xff]  ;;  %v1148_v0 = vld [vmem:[%s3753_s30 + $0x1ef8] sm:$0xff] }
 0x20a   : > { %v1682_v11 = vadd.f32 %v1681_v63, %v1122_v48  ;;  %v2476_v13 = vmax.f32 %v2475_v1, %v1125_v59  ;;  %v2737_v14 = vmax.f32 %v2736_v2, %v1126_v60  ;;  %v1943_v17 = vadd.f32 %v1942_v5, %v1123_v49  ;;  %v1151_v5 = vld [vmem:[%s3753_s30 + $0x1f10] sm:$0xff] }
 0x20b   : > { %v2998_v15 = vmax.f32 %v2997_v3, %v1127_v61  ;;  %v3259_v18 = vmax.f32 %v3258_v6, %v1128_v4  ;;  %v1422_v22 = vadd.f32 %v1421_v10, %v1125_v59  ;;  %v2204_v24 = vadd.f32 %v2203_v12, %v1124_v56  ;;  %v1146_v56 = vld [vmem:[%s3753_s30 + $0x1ee8] sm:$0xff]  ;;  %v1149_v3 = vld [vmem:[%s3753_s30 + $0x1f00] sm:$0xff]  ;;  %v1152_v12 = vld [vmem:[%s3753_s30 + $0x1f18] sm:$0xff] }
 0x20c   : > { %v1683_v23 = vadd.f32 %v1682_v11, %v1126_v60  ;;  %v2477_v25 = vmax.f32 %v2476_v13, %v1129_v7  ;;  %v2738_v26 = vmax.f32 %v2737_v14, %v1130_v8  ;;  %v1944_v29 = vadd.f32 %v1943_v17, %v1127_v61  ;;  %v1155_v17 = vld [vmem:[%s3753_s30 + $0x1f30] sm:$0xff] }
 0x20d   : > { %v2999_v27 = vmax.f32 %v2998_v15, %v1131_v9  ;;  %v3260_v30 = vmax.f32 %v3259_v18, %v1132_v16  ;;  %v1423_v34 = vadd.f32 %v1422_v22, %v1129_v7  ;;  %v2205_v36 = vadd.f32 %v2204_v24, %v1128_v4  ;;  %v1150_v4 = vld [vmem:[%s3753_s30 + $0x1f08] sm:$0xff]  ;;  %v1153_v15 = vld [vmem:[%s3753_s30 + $0x1f20] sm:$0xff]  ;;  %v1156_v24 = vld [vmem:[%s3753_s30 + $0x1f38] sm:$0xff] }
 0x20e   : > { %v1684_v35 = vadd.f32 %v1683_v23, %v1130_v8  ;;  %v2478_v37 = vmax.f32 %v2477_v25, %v1133_v19  ;;  %v2739_v38 = vmax.f32 %v2738_v26, %v1134_v20  ;;  %v1945_v41 = vadd.f32 %v1944_v29, %v1131_v9  ;;  %v1159_v29 = vld [vmem:[%s3753_s30 + $0x1f50] sm:$0xff] }
 0x20f   : > { %v3000_v39 = vmax.f32 %v2999_v27, %v1135_v21  ;;  %v3261_v42 = vmax.f32 %v3260_v30, %v1136_v28  ;;  %v1424_v46 = vadd.f32 %v1423_v34, %v1133_v19  ;;  %v2206_v48 = vadd.f32 %v2205_v36, %v1132_v16  ;;  %v1154_v16 = vld [vmem:[%s3753_s30 + $0x1f28] sm:$0xff]  ;;  %v1157_v27 = vld [vmem:[%s3753_s30 + $0x1f40] sm:$0xff]  ;;  %v1160_v36 = vld [vmem:[%s3753_s30 + $0x1f58] sm:$0xff] }
 0x210   : > { %v1685_v47 = vadd.f32 %v1684_v35, %v1134_v20  ;;  %v2479_v49 = vmax.f32 %v2478_v37, %v1137_v31  ;;  %v2740_v50 = vmax.f32 %v2739_v38, %v1138_v32  ;;  %v1946_v53 = vadd.f32 %v1945_v41, %v1135_v21  ;;  %v1163_v41 = vld [vmem:[%s3753_s30 + $0x1f70] sm:$0xff] }
 0x211   : > { %v3001_v51 = vmax.f32 %v3000_v39, %v1139_v33  ;;  %v3262_v54 = vmax.f32 %v3261_v42, %v1140_v40  ;;  %v1425_v58 = vadd.f32 %v1424_v46, %v1137_v31  ;;  %v2207_v60 = vadd.f32 %v2206_v48, %v1136_v28  ;;  %v1158_v28 = vld [vmem:[%s3753_s30 + $0x1f48] sm:$0xff]  ;;  %v1161_v39 = vld [vmem:[%s3753_s30 + $0x1f60] sm:$0xff]  ;;  %v1164_v48 = vld [vmem:[%s3753_s30 + $0x1f78] sm:$0xff] }
 0x212   : > { %v1686_v59 = vadd.f32 %v1685_v47, %v1138_v32  ;;  %v2480_v61 = vmax.f32 %v2479_v49, %v1141_v43  ;;  %v2741_v62 = vmax.f32 %v2740_v50, %v1142_v44  ;;  %v1947_v1 = vadd.f32 %v1946_v53, %v1139_v33  ;;  %v1167_v53 = vld [vmem:[%s3753_s30 + $0x1f90] sm:$0xff] }
 0x213   : > { %v3002_v63 = vmax.f32 %v3001_v51, %v1143_v45  ;;  %v3263_v2 = vmax.f32 %v3262_v54, %v1144_v52  ;;  %v1426_v6 = vadd.f32 %v1425_v58, %v1141_v43  ;;  %v2208_v8 = vadd.f32 %v2207_v60, %v1140_v40  ;;  %v1162_v40 = vld [vmem:[%s3753_s30 + $0x1f68] sm:$0xff]  ;;  %v1165_v51 = vld [vmem:[%s3753_s30 + $0x1f80] sm:$0xff]  ;;  %v1168_v60 = vld [vmem:[%s3753_s30 + $0x1f98] sm:$0xff] }
 0x214   : > { %v1687_v7 = vadd.f32 %v1686_v59, %v1142_v44  ;;  %v2481_v9 = vmax.f32 %v2480_v61, %v1145_v55  ;;  %v2742_v10 = vmax.f32 %v2741_v62, %v1146_v56  ;;  %v1948_v13 = vadd.f32 %v1947_v1, %v1143_v45  ;;  %v1171_v1 = vld [vmem:[%s3753_s30 + $0x1fb0] sm:$0xff] }
 0x215   : > { %v3003_v11 = vmax.f32 %v3002_v63, %v1147_v57  ;;  %v3264_v14 = vmax.f32 %v3263_v2, %v1148_v0  ;;  %v1427_v18 = vadd.f32 %v1426_v6, %v1145_v55  ;;  %v2209_v20 = vadd.f32 %v2208_v8, %v1144_v52  ;;  %v1166_v52 = vld [vmem:[%s3753_s30 + $0x1f88] sm:$0xff]  ;;  %v1169_v63 = vld [vmem:[%s3753_s30 + $0x1fa0] sm:$0xff]  ;;  %v1172_v8 = vld [vmem:[%s3753_s30 + $0x1fb8] sm:$0xff] }
 0x216   : > { %v1688_v19 = vadd.f32 %v1687_v7, %v1146_v56  ;;  %v2482_v21 = vmax.f32 %v2481_v9, %v1149_v3  ;;  %v2743_v22 = vmax.f32 %v2742_v10, %v1150_v4  ;;  %v1949_v25 = vadd.f32 %v1948_v13, %v1147_v57  ;;  %v1175_v13 = vld [vmem:[%s3753_s30 + $0x1fd0] sm:$0xff] }
 0x217   : > { %v3004_v23 = vmax.f32 %v3003_v11, %v1151_v5  ;;  %v3265_v26 = vmax.f32 %v3264_v14, %v1152_v12  ;;  %v1428_v30 = vadd.f32 %v1427_v18, %v1149_v3  ;;  %v2210_v32 = vadd.f32 %v2209_v20, %v1148_v0  ;;  %v1170_v0 = vld [vmem:[%s3753_s30 + $0x1fa8] sm:$0xff]  ;;  %v1173_v11 = vld [vmem:[%s3753_s30 + $0x1fc0] sm:$0xff]  ;;  %v1176_v20 = vld [vmem:[%s3753_s30 + $0x1fd8] sm:$0xff] }
 0x218   : > { %v1689_v31 = vadd.f32 %v1688_v19, %v1150_v4  ;;  %v2483_v33 = vmax.f32 %v2482_v21, %v1153_v15  ;;  %v2744_v34 = vmax.f32 %v2743_v22, %v1154_v16  ;;  %v1950_v37 = vadd.f32 %v1949_v25, %v1151_v5  ;;  %v1179_v25 = vld [vmem:[%s3753_s30 + $0x1ff0] sm:$0xff] }
 0x219   : > { %v3005_v35 = vmax.f32 %v3004_v23, %v1155_v17  ;;  %v3266_v38 = vmax.f32 %v3265_v26, %v1156_v24  ;;  %v1429_v42 = vadd.f32 %v1428_v30, %v1153_v15  ;;  %v2211_v44 = vadd.f32 %v2210_v32, %v1152_v12  ;;  %v1174_v12 = vld [vmem:[%s3753_s30 + $0x1fc8] sm:$0xff]  ;;  %v1177_v23 = vld [vmem:[%s3753_s30 + $0x1fe0] sm:$0xff]  ;;  %v1180_v32 = vld [vmem:[%s3753_s30 + $0x1ff8] sm:$0xff] }
 0x21a   : > { %v1690_v43 = vadd.f32 %v1689_v31, %v1154_v16  ;;  %v2484_v45 = vmax.f32 %v2483_v33, %v1157_v27  ;;  %v2745_v46 = vmax.f32 %v2744_v34, %v1158_v28  ;;  %v1951_v49 = vadd.f32 %v1950_v37, %v1155_v17 }
 0x21b   : > { %v3006_v47 = vmax.f32 %v3005_v35, %v1159_v29  ;;  %v3267_v50 = vmax.f32 %v3266_v38, %v1160_v36  ;;  %v1430_v54 = vadd.f32 %v1429_v42, %v1157_v27  ;;  %v2212_v56 = vadd.f32 %v2211_v44, %v1156_v24  ;;  %v1178_v24 = vld [vmem:[%s3753_s30 + $0x1fe8] sm:$0xff] }
 0x21c   : > { %v1691_v55 = vadd.f32 %v1690_v43, %v1158_v28  ;;  %v2485_v57 = vmax.f32 %v2484_v45, %v1161_v39  ;;  %v2746_v58 = vmax.f32 %v2745_v46, %v1162_v40  ;;  %v1952_v61 = vadd.f32 %v1951_v49, %v1159_v29 }
 0x21d   : > { %v3007_v59 = vmax.f32 %v3006_v47, %v1163_v41  ;;  %v3268_v62 = vmax.f32 %v3267_v50, %v1164_v48  ;;  %v1431_v2 = vadd.f32 %v1430_v54, %v1161_v39  ;;  %v2213_v4 = vadd.f32 %v2212_v56, %v1160_v36  ;;  %v3507_v47 = vld [vmem:[%s3753_s30] sm:$0xff]  ;;  %v3509_v50 = vld [vmem:[%s3753_s30 + $0x8] sm:$0xff] }
 0x21e   : > { %v1692_v3 = vadd.f32 %v1691_v55, %v1162_v40  ;;  %v2486_v5 = vmax.f32 %v2485_v57, %v1165_v51  ;;  %v2747_v6 = vmax.f32 %v2746_v58, %v1166_v52  ;;  %v1953_v9 = vadd.f32 %v1952_v61, %v1163_v41  ;;  %v3512_v61 = vld [vmem:[%s3753_s30 + $0x30] sm:$0xff] }
 0x21f   : > { %v3008_v7 = vmax.f32 %v3007_v59, %v1167_v53  ;;  %v3269_v10 = vmax.f32 %v3268_v62, %v1168_v60  ;;  %v1432_v14 = vadd.f32 %v1431_v2, %v1165_v51  ;;  %v2214_v16 = vadd.f32 %v2213_v4, %v1164_v48  ;;  %v3508_v48 = vld [vmem:[%s3753_s30 + $0x20] sm:$0xff]  ;;  %v3510_v51 = vld [vmem:[%s3753_s30 + $0x28] sm:$0xff]  ;;  %v3513_v2 = vld [vmem:[%s3753_s30 + $0x18] sm:$0xff] }
 0x220   : > { %v1693_v15 = vadd.f32 %v1692_v3, %v1166_v52  ;;  %v2487_v17 = vmax.f32 %v2486_v5, %v1169_v63  ;;  %v2748_v18 = vmax.f32 %v2747_v6, %v1170_v0  ;;  %v1954_v21 = vadd.f32 %v1953_v9, %v1167_v53  ;;  %v3514_v3 = vld [vmem:[%s3753_s30 + $0x38] sm:$0xff] }
 0x221   : > { %v3009_v19 = vmax.f32 %v3008_v7, %v1171_v1  ;;  %v3270_v22 = vmax.f32 %v3269_v10, %v1172_v8  ;;  %v1433_v26 = vadd.f32 %v1432_v14, %v1169_v63  ;;  %v2215_v28 = vadd.f32 %v2214_v16, %v1168_v60  ;;  %v3511_v60 = vld [vmem:[%s3753_s30 + $0x10] sm:$0xff] }
 0x222   : > { %v1694_v27 = vadd.f32 %v1693_v15, %v1170_v0  ;;  %v2488_v29 = vmax.f32 %v2487_v17, %v1173_v11  ;;  %v2749_v30 = vmax.f32 %v2748_v18, %v1174_v12  ;;  %v1955_v33 = vadd.f32 %v1954_v21, %v1171_v1 }
 0x223   : > { %v3010_v31 = vmax.f32 %v3009_v19, %v1175_v13  ;;  %v3271_v34 = vmax.f32 %v3270_v22, %v1176_v20  ;;  %v1434_v35 = vadd.f32 %v1433_v26, %v1173_v11  ;;  %v2216_v37 = vadd.f32 %v2215_v28, %v1172_v8 }
 0x224   : > { %v1695_v36 = vadd.f32 %v1694_v27, %v1174_v12  ;;  %v2489_v38 = vmax.f32 %v2488_v29, %v1177_v23  ;;  %v2750_v39 = vmax.f32 %v2749_v30, %v1178_v24  ;;  %v1956_v41 = vadd.f32 %v1955_v33, %v1175_v13 }
 0x225   : > { %v3011_v40 = vmax.f32 %v3010_v31, %v1179_v25  ;;  %v3272_v42 = vmax.f32 %v3271_v34, %v1180_v32  ;;  %v1435_v43 = vadd.f32 %v1434_v35, %v1177_v23  ;;  %v2217_v45 = vadd.f32 %v2216_v37, %v1176_v20 }
 0x226   : > { %v1696_v44 = vadd.f32 %v1695_v36, %v1178_v24  ;;  %v1957_v46 = vadd.f32 %v1956_v41, %v1179_v25  ;;  %v2236_v49 = vmax.f32 %v3507_v47, %v3508_v48  ;;  %v2497_v52 = vmax.f32 %v3509_v50, %v3510_v51 }
 0x227   : > { %v1436_v53 = vrot.slane %v1435_v43, 4  ;;  %v2218_v55 = vadd.f32 %v2217_v45, %v1180_v32  ;;  %v3648_v56 = vmov 2048.0   ;;  %v2758_v62 = vmax.f32 %v3511_v60, %v3512_v61 }
 0x228   : > { %v1697_v54 = vrot.slane %v1696_v44, 4  ;;  %3505 = vrcp.f32 %v3648_v56  ;;  %v1958_v57 = vrot.slane %v1957_v46, 4  ;;  %v2490_v58 = vmax.f32 %v2489_v38, %v2236_v49 }
 0x229   : > { %v2751_v59 = vmax.f32 %v2750_v39, %v2497_v52  ;;  %v1437_v63 = vadd.f32 %v1436_v53, %v1435_v43  ;;  %v2219_v1 = vrot.slane %v2218_v55, 4  ;;  %v3019_v4 = vmax.f32 %v3513_v2, %v3514_v3 }
 0x22a   : > { %v1698_v0 = vadd.f32 %v1697_v54, %v1696_v44  ;;  %v1959_v5 = vadd.f32 %v1958_v57, %v1957_v46  ;;  %v2491_v6 = vrot.slane %v2490_v58, 4  ;;  %v3012_v8 = vmax.f32 %v3011_v40, %v2758_v62 }
 0x22b   : > { %v2752_v7 = vrot.slane %v2751_v59, 4  ;;  %v1438_v9 = vrot.slane %v1437_v63, 2  ;;  %v2220_v11 = vadd.f32 %v2219_v1, %v2218_v55  ;;  %v3273_v12 = vmax.f32 %v3272_v42, %v3019_v4 }
 0x22c   : > { %v1699_v10 = vrot.slane %v1698_v0, 2  ;;  %v1960_v13 = vrot.slane %v1959_v5, 2  ;;  %v2492_v14 = vmax.f32 %v2490_v58, %v2491_v6  ;;  %v3013_v16 = vrot.slane %v3012_v8, 4 }
 0x22d   : > { %v2753_v15 = vmax.f32 %v2751_v59, %v2752_v7  ;;  %v1439_v18 = vadd.f32 %v1438_v9, %v1437_v63  ;;  %v2221_v20 = vrot.slane %v2220_v11, 2  ;;  %v3274_v24 = vrot.slane %v3273_v12, 4 }
 0x22e   : > { %v3506_v17 = vpop.eup %3505  ;;  %v1700_v19 = vadd.f32 %v1699_v10, %v1698_v0  ;;  %v1961_v21 = vadd.f32 %v1960_v13, %v1959_v5  ;;  %v2493_v23 = vrot.slane %v2492_v14, 2  ;;  %v3014_v32 = vmax.f32 %v3012_v8, %v3013_v16 }
 0x22f   : > { %v2226_v22 = vmul.f32 2048.0, %v3506_v17  ;;  %v1440_v25 = vrot.slane %v1439_v18, 1  ;;  %v2222_v27 = vadd.f32 %v2221_v20, %v2220_v11  ;;  %v2754_v28 = vrot.slane %v2753_v15, 2 }
 0x230   : > { %v1701_v26 = vrot.slane %v1700_v19, 1  ;;  %v1962_v29 = vrot.slane %v1961_v21, 1  ;;  %v2494_v31 = vmax.f32 %v2492_v14, %v2493_v23  ;;  %vm2230_vm0 = vweird.f32 %v3506_v17 }
 0x231   : > { %v2227_v30 = vsub.f32 1.0, %v2226_v22  ;;  %v2755_v33 = vmax.f32 %v2753_v15, %v2754_v28  ;;  %v2223_v34 = vrot.slane %v2222_v27, 1  ;;  %v3015_v36 = vrot.slane %v3014_v32, 2 }
 0x232   : > { %v1702_v37 = vadd.f32 %v1701_v26, %v1700_v19  ;;  %v1963_v38 = vadd.f32 %v1962_v29, %v1961_v21  ;;  %v3275_v40 = vmax.f32 %v3273_v12, %v3274_v24  ;;  %v1441_v41 = vadd.f32 %v1440_v25, %v1439_v18 }
 0x233   : > { %v2228_v35 = vmul.f32 %v3506_v17, %v2227_v30  ;;  %v2756_v39 = vrot.slane %v2755_v33, 1  ;;  %v2495_v43 = vrot.slane %v2494_v31, 1  ;;  %v3016_v44 = vmax.f32 %v3014_v32, %v3015_v36 }
 0x234   : > { %v3276_v46 = vrot.slane %v3275_v40, 2  ;;  %v2224_v47 = vadd.f32 %v2223_v34, %v2222_v27 }
 0x235   : > { %v2229_v42 = vadd.f32 %v3506_v17, %v2228_v35  ;;  %v2757_v45 = vmax.f32 %v2755_v33, %v2756_v39  ;;  %v3017_v49 = vrot.slane %v3016_v44, 1  ;;  %v2496_v53 = vmax.f32 %v2494_v31, %v2495_v43 }
 0x236   : > { %v3277_v55 = vmax.f32 %v3275_v40, %v3276_v46 }
 0x237   : > { %v2231_v48 = vsel %vm2230_vm0, %v3506_v17, %v2229_v42  ;;  %v3018_v54 = vmax.f32 %v3016_v44, %v3017_v49 }
 0x238   : > { %v2233_v50 = vmul.f32 %v2231_v48, %v1702_v37  ;;  %v2234_v51 = vmul.f32 %v2231_v48, %v1963_v38  ;;  %v2232_v52 = vmul.f32 %v2231_v48, %v1441_v41  ;;  %v2235_v57 = vmul.f32 %v2231_v48, %v2224_v47 }
 0x239   : > { %v3278_v58 = vrot.slane %v3277_v55, 1 }
 0x23a   : > { %v3282_v56 = vsel %vm3280_vm1, %v2233_v50, %v2757_v45  ;;  %v3283_v59 = vsel %vm3280_vm1, %v2234_v51, %v3018_v54  ;;  %v3281_v62 = vsel %vm3280_vm1, %v2232_v52, %v2496_v53 }
 0x23b   : > { %v3289_v60 = vrot.slane %v3282_v56, 6  ;;  %v3279_v61 = vmax.f32 %v3277_v55, %v3278_v58  ;;  %v3290_v63 = vrot.slane %v3283_v59, 4 }
 0x23d   : > { %v3284_v0 = vsel %vm3280_vm1, %v2235_v57, %v3279_v61  ;;  %v3293_v2 = vsel %vm3292_vm2, %v3281_v62, %v3289_v60 }
 0x23e   : > { %v3291_v1 = vrot.slane %v3284_v0, 2 }
 0x240   : > { %v3295_v3 = vsel %vm3294_vm3, %v3290_v63, %v3291_v1 }
 0x241   : > { %v3297_v4 = vsel %vm3296_vm4, %v3293_v2, %v3295_v3 }
 0x242   : > { %3299 = vst [vmem:[%s154_s4] sm:$0xff] %v3297_v4 }
 0x243   : > { %3572 = shalt.err (!%p3569_p11)
}
 0x244   : > { %3425 = dma.vmem_to_hbm [thread:$0]  (%p3724_p9), %s3317_s5, 128, %s3319_s14, %s3301_s15  }
 0x245 PF: > { %p3436_p13 = scmp.ge.s32.totalorder %s3643_s13, 2  ;;  %s3330_s28 = sand.u32 1, %s3615_s6  }
 0x246   : > { %s3331_s16 = scalar_lea.sflag [#allocation4], %s3330_s28 }
 0x247   : > { %p3432_p0 = pnand %p3436_p13, %p3730_p12 }
 0x249   : > { %p3433_p1 = pneg %p3432_p0 }
 0x24b   : > { %3610 = dma.done.wait (%p3433_p1), %s3331_s16, 128  }
 0x24c   : > { %3612 = vsyncadd (%p3433_p1), %s3331_s16, 4294967168  ;;  %s17_s13 = sadd.s32 1, %s3643_s13   ;;  %s4851_s22 = sld [smem:[#allocation8_spill]] }
 0x24d   : > { %p14_p2 = scmp.ge.s32.totalorder %s17_s13, 6   ;;  %s4852_s17 = sld [smem:[#allocation9_spill]] }
 0x24e   : > { %s4853_s6 = smov %s3619_s7  ;;  %s4854_s7 = smov %s3623_s8 }
 0x24f   : > { %s4855_s8 = smov %s3737_s27  ;;  %s4856_s9 = smov %s3635_s11 }
 0x250   : > { %s4857_s10 = smov %s3639_s12  ;;  %16 = sbr.rel (!%p14_p2) target bundleno = 7 (0x7), region = 69 }
 0x252   : > { %s4858_s11 = smov %s4851_s22 }
 0x253   : > { %s4859_s12 = smov %s4852_s17 }
 0x255   :  { %3337 = vsyncpa [#allocation3], 1 }
 0x256   :  { %3339 = vsyncpa [#allocation3 + $0x1], 1 }
 0x257   :  { %3340 = vsyncpa [#allocation4], 1 }
 0x258   :  { %3342 = vsyncpa [#allocation4 + $0x1], 1 }

</bundles_post_ra>
